<compile_context>
chip_gen: v7x
topology: tpu7x:2x2x1
jax: 0.10.0
libtpu: 0.0.40
codegen_flags: <defaults>
</compile_context>

<pallas_src>
import jax
import jax.numpy as jnp
from jax.experimental import pallas as pl
from jax.experimental.pallas import tpu as pltpu

NUM_CLASSES = 10
BN_EPS = 1e-5
TB_MAX = 128      # images per grid step (batch tile); multiple of 32
LANE = 128


def _round_up(a, b):
    return (a + b - 1) // b * b


# ---------------------------------------------------------------------------
# Pallas kernels
# ---------------------------------------------------------------------------
def conv_bn_relu_pool_kernel(p_ref, w_ref, scale_ref, shift_ref, out_ref):
    """Fused conv(5x5,pad=2) + BN(eval) + ReLU + 2x2 maxpool for a tile of TB images.

    p_ref:     (25, 4*TB*196) bf16  im2col patches, lanes ordered (pool window, image, pos)
    w_ref:     (8, 25)        bf16  conv weight (out_channel, tap)
    scale_ref: (8, 1)         f32   folded BN scale
    shift_ref: (8, 1)         f32   folded BN shift (includes conv bias)
    out_ref:   (8, TB*196)    bf16  pooled activations, lanes ordered (image, pos)
    """
    acc = jnp.dot(w_ref[...], p_ref[...],
                  preferred_element_type=jnp.float32)          # (8, 4*TB*196) f32
    y = acc * scale_ref[...] + shift_ref[...]                   # BN affine (f32)
    l = out_ref.shape[1]                                        # TB*196, multiple of 128
    pooled = jnp.maximum(jnp.maximum(y[:, 0 * l:1 * l], y[:, 1 * l:2 * l]),
                         jnp.maximum(y[:, 2 * l:3 * l], y[:, 3 * l:4 * l]))
    out_ref[...] = jnp.maximum(pooled, 0.0).astype(out_ref.dtype)


def fc_kernel(x_ref, w_ref, b_ref, o_ref):
    """(TB, 1568) @ (1568, 128) + bias, lane-dense 128-wide output."""
    o_ref[...] = (
        jnp.dot(x_ref[...], w_ref[...], preferred_element_type=jnp.float32)
        + b_ref[...]
    )


# ---------------------------------------------------------------------------
# JAX glue
# ---------------------------------------------------------------------------
def _build_patches(img_bf16, n_pad, tb):
    """img: (n_pad, 28, 28) bf16 -> im2col patches (25, NT*4*TB*196) bf16.

    Lane order inside one batch tile: pool-window w = dy*2+dx, then image j within
    the tile, then spatial s = ph*14 + pw.  Tap index k = ky*5 + kx is the sublane dim.
    """
    nt = n_pad // tb
    xp = jnp.pad(img_bf16, ((0, 0), (2, 2), (2, 2)))       # (n_pad, 32, 32)
    cols = []
    for ky in range(5):
        for kx in range(5):
            c = xp[:, ky:ky + 28, kx:kx + 28]               # (n_pad, 28, 28)
            c = c.reshape(nt, tb, 14, 2, 14, 2)             # (t, j, ph, dy, pw, dx)
            c = c.transpose(0, 3, 5, 1, 2, 4)               # (t, dy, dx, j, ph, pw)
            cols.append(c.reshape(nt, 4, tb, 196))
    p = jnp.stack(cols, axis=0)                             # (25, t, w, j, s)
    return p.reshape(25, nt * 4 * tb * 196)


def femnist_forward(x, params):
    conv_w, conv_b = params["conv_w"], params["conv_b"]     # (8,1,5,5), (8,)
    gamma, beta = params["bn_gamma"], params["bn_beta"]     # (8,), (8,)
    mean, var = params["bn_mean"], params["bn_var"]         # (8,), (8,)
    fc_w, fc_b = params["fc_w"], params["fc_b"]             # (C,1568), (C,)
    num_classes = fc_w.shape[0]
    c_pad = _round_up(num_classes, LANE)

    img = x.reshape(-1, 28, 28).astype(jnp.float32)         # x.view(-1, 1, 28, 28)
    n = img.shape[0]
    tb = min(TB_MAX, _round_up(n, 32))                      # batch tile (multiple of 32)
    n_pad = _round_up(n, tb)
    nt = n_pad // tb
    img = jnp.pad(img, ((0, n_pad - n), (0, 0), (0, 0)))

    patches = _build_patches(img.astype(jnp.bfloat16), n_pad, tb)   # (25, nt*4*tb*196)

    w_mat = conv_w.reshape(8, 25).astype(jnp.bfloat16)               # (8, 25)
    scale = (gamma / jnp.sqrt(var + BN_EPS)).reshape(8, 1)           # f32
    shift = ((conv_b - mean) * scale[:, 0] + beta).reshape(8, 1)     # f32

    pooled = pl.pallas_call(
        conv_bn_relu_pool_kernel,
        out_shape=jax.ShapeDtypeStruct((8, n_pad * 196), jnp.bfloat16),
        grid=(nt,),
        in_specs=[
            pl.BlockSpec((25, 4 * tb * 196), lambda t: (0, t)),
            pl.BlockSpec((8, 25), lambda t: (0, 0)),
            pl.BlockSpec((8, 1), lambda t: (0, 0)),
            pl.BlockSpec((8, 1), lambda t: (0, 0)),
        ],
        out_specs=pl.BlockSpec((8, tb * 196), lambda t: (0, t)),
        compiler_params=pltpu.CompilerParams(
            dimension_semantics=("parallel",),
            vmem_limit_bytes=48 * 1024 * 1024),
    )(patches, w_mat, scale, shift)

    # PyTorch's x.view(N, -1) on NCHW: feature index = c*196 + ph*14 + pw.
    feat = pooled.reshape(8, n_pad, 196).transpose(1, 0, 2).reshape(n_pad, 1568)

    fcw_pad = jnp.zeros((1568, c_pad), jnp.bfloat16)
    fcw_pad = fcw_pad.at[:, :num_classes].set(fc_w.T.astype(jnp.bfloat16))
    fcb_pad = jnp.zeros((1, c_pad), jnp.float32)
    fcb_pad = fcb_pad.at[:, :num_classes].set(fc_b.reshape(1, -1))

    logits = pl.pallas_call(
        fc_kernel,
        out_shape=jax.ShapeDtypeStruct((n_pad, c_pad), jnp.float32),
        grid=(nt,),
        in_specs=[
            pl.BlockSpec((tb, 1568), lambda t: (t, 0)),
            pl.BlockSpec((1568, c_pad), lambda t: (0, 0)),
            pl.BlockSpec((1, c_pad), lambda t: (0, 0)),
        ],
        out_specs=pl.BlockSpec((tb, c_pad), lambda t: (t, 0)),
        compiler_params=pltpu.CompilerParams(
            dimension_semantics=("parallel",)),
    )(feat, fcw_pad, fcb_pad)
    return logits[:n, :num_classes]


def init_params(key, num_classes=NUM_CLASSES):
    k1, k2, k3, k4 = jax.random.split(key, 4)
    return dict(
        conv_w=jax.random.normal(k1, (8, 1, 5, 5), jnp.float32) * 0.1,
        conv_b=jax.random.normal(k2, (8,), jnp.float32) * 0.1,
        bn_gamma=jnp.ones((8,), jnp.float32),
        bn_beta=jnp.zeros((8,), jnp.float32),
        bn_mean=jnp.zeros((8,), jnp.float32),   # running stats (eval-mode BN)
        bn_var=jnp.ones((8,), jnp.float32),
        fc_w=jax.random.normal(k3, (num_classes, 1568), jnp.float32) * 0.02,
        fc_b=jax.random.normal(k4, (num_classes,), jnp.float32) * 0.02,
    )


def reference_forward(x, params):
    """Pure-JAX f32 reference mirroring the PyTorch forward (eval mode)."""
    conv_w, conv_b = params["conv_w"], params["conv_b"]
    gamma, beta = params["bn_gamma"], params["bn_beta"]
    mean, var = params["bn_mean"], params["bn_var"]
    fc_w, fc_b = params["fc_w"], params["fc_b"]
    img = x.reshape(-1, 1, 28, 28)
    n = img.shape[0]
    y = jax.lax.conv_general_dilated(
        img, conv_w, window_strides=(1, 1), padding=((2, 2), (2, 2)),
        dimension_numbers=("NCHW", "OIHW", "NCHW"),
        precision=jax.lax.Precision.HIGHEST)
    y = y + conv_b.reshape(1, 8, 1, 1)
    y = (y - mean.reshape(1, 8, 1, 1)) / jnp.sqrt(var.reshape(1, 8, 1, 1) + BN_EPS)
    y = y * gamma.reshape(1, 8, 1, 1) + beta.reshape(1, 8, 1, 1)
    y = jnp.maximum(y, 0.0)
    y = y.reshape(n, 8, 14, 2, 14, 2).max(axis=(3, 5))
    y = y.reshape(n, 8 * 14 * 14)
    return jnp.dot(y, fc_w.T, precision=jax.lax.Precision.HIGHEST) + fc_b


if __name__ == "__main__":
    key = jax.random.PRNGKey(0)
    pkey, xkey = jax.random.split(key)
    params = init_params(pkey, NUM_CLASSES)
    x = jax.random.normal(xkey, (2, 28 * 28), jnp.float32)   # batch=2, flat 28*28

    fwd = jax.jit(femnist_forward)
    out = jax.block_until_ready(fwd(x, params))

    ref = reference_forward(x, params)
    assert out.shape == (2, NUM_CLASSES), out.shape
    if not jnp.allclose(out, ref, rtol=2e-2, atol=2e-2):
        max_err = jnp.max(jnp.abs(out - ref))
        raise AssertionError(f"Pallas output does not match JAX reference (max|err|={max_err})")
    print("KERNEL_OK")
</pallas_src>

<mosaic_0001>
module attributes {stable_mosaic.version = 11 : i64} {
  func.func @conv_bn_relu_pool_kernel(%arg0: i32, %arg1: memref<25x25088xbf16, #tpu.memory_space<vmem>>, %arg2: memref<8x25xbf16, #tpu.memory_space<vmem>>, %arg3: memref<8x1xf32, #tpu.memory_space<vmem>>, %arg4: memref<8x1xf32, #tpu.memory_space<vmem>>, %arg5: memref<8x6272xbf16, #tpu.memory_space<vmem>>) attributes {dimension_semantics = [#tpu.dimension_semantics<parallel>], iteration_bounds = array<i64: 1>, scalar_prefetch = 0 : i64, scratch_operands = 0 : i64, tpu.core_type = #tpu.core_type<tc>, window_params = [{transform_indices = @transform_0, window_bounds = array<i64: 25, 25088>}, {pipeline_mode = #tpu.pipeline_mode<synchronous>, transform_indices = @transform_1, window_bounds = array<i64: 8, 25>}, {pipeline_mode = #tpu.pipeline_mode<synchronous>, transform_indices = @transform_2, window_bounds = array<i64: 8, 1>}, {pipeline_mode = #tpu.pipeline_mode<synchronous>, transform_indices = @transform_3, window_bounds = array<i64: 8, 1>}, {transform_indices = @transform_4, window_bounds = array<i64: 8, 6272>}]} {
    %c0 = arith.constant 0 : index
    %c0_0 = arith.constant 0 : index
    %0 = vector.load %arg2[%c0, %c0_0] : memref<8x25xbf16, #tpu.memory_space<vmem>>, vector<8x25xbf16>
    %c0_1 = arith.constant 0 : index
    %c0_2 = arith.constant 0 : index
    %1 = vector.load %arg1[%c0_1, %c0_2] : memref<25x25088xbf16, #tpu.memory_space<vmem>>, vector<25x25088xbf16>
    %cst = arith.constant dense<0.000000e+00> : vector<8x25088xf32>
    %2 = tpu.matmul %0, %1, %cst {dimension_numbers = #tpu.dot_dimension_numbers<[1], [0], [0], [1], [0, 0, 1, 1], [], []>} : vector<8x25xbf16>, vector<25x25088xbf16>, vector<8x25088xf32> -> vector<8x25088xf32>
    %c0_3 = arith.constant 0 : index
    %c0_4 = arith.constant 0 : index
    %3 = vector.load %arg3[%c0_3, %c0_4] : memref<8x1xf32, #tpu.memory_space<vmem>>, vector<8x1xf32>
    %4 = vector.broadcast %3 : vector<8x1xf32> to vector<8x25088xf32>
    %5 = arith.mulf %2, %4 : vector<8x25088xf32>
    %c0_5 = arith.constant 0 : index
    %c0_6 = arith.constant 0 : index
    %6 = vector.load %arg4[%c0_5, %c0_6] : memref<8x1xf32, #tpu.memory_space<vmem>>, vector<8x1xf32>
    %7 = vector.broadcast %6 : vector<8x1xf32> to vector<8x25088xf32>
    %8 = arith.addf %5, %7 : vector<8x25088xf32>
    %9 = vector.extract_strided_slice %8 {offsets = [0, 0], sizes = [8, 6272], strides = [1, 1]} : vector<8x25088xf32> to vector<8x6272xf32>
    %10 = vector.extract_strided_slice %8 {offsets = [0, 6272], sizes = [8, 6272], strides = [1, 1]} : vector<8x25088xf32> to vector<8x6272xf32>
    %11 = arith.maximumf %9, %10 : vector<8x6272xf32>
    %12 = vector.extract_strided_slice %8 {offsets = [0, 12544], sizes = [8, 6272], strides = [1, 1]} : vector<8x25088xf32> to vector<8x6272xf32>
    %13 = vector.extract_strided_slice %8 {offsets = [0, 18816], sizes = [8, 6272], strides = [1, 1]} : vector<8x25088xf32> to vector<8x6272xf32>
    %14 = arith.maximumf %12, %13 : vector<8x6272xf32>
    %15 = arith.maximumf %11, %14 : vector<8x6272xf32>
    %cst_7 = arith.constant 0.000000e+00 : f32
    %16 = vector.broadcast %cst_7 : f32 to vector<8x6272xf32>
    %17 = arith.maximumf %15, %16 : vector<8x6272xf32>
    %18 = arith.truncf %17 : vector<8x6272xf32> to vector<8x6272xbf16>
    %c0_8 = arith.constant 0 : index
    %c0_9 = arith.constant 0 : index
    %19 = vector.load %arg5[%c0_8, %c0_9] : memref<8x6272xbf16, #tpu.memory_space<vmem>>, vector<8x6272xbf16>
    tpu.vector_store %arg5[%c0_8, %c0_9], %18 {strides = array<i32>} : memref<8x6272xbf16, #tpu.memory_space<vmem>>, vector<8x6272xbf16>,
    return
  }
  func.func @transform_0(%arg0: i32) -> (i32, i32) {
    %c0_i32 = arith.constant 0 : i32
    %c0_i32_0 = arith.constant 0 : i32
    return %c0_i32, %arg0 : i32, i32
  }
  func.func @transform_1(%arg0: i32) -> (i32, i32) {
    %c0_i32 = arith.constant 0 : i32
    %c0_i32_0 = arith.constant 0 : i32
    %c0_i32_1 = arith.constant 0 : i32
    return %c0_i32, %c0_i32_0 : i32, i32
  }
  func.func @transform_2(%arg0: i32) -> (i32, i32) {
    %c0_i32 = arith.constant 0 : i32
    %c0_i32_0 = arith.constant 0 : i32
    %c0_i32_1 = arith.constant 0 : i32
    return %c0_i32, %c0_i32_0 : i32, i32
  }
  func.func @transform_3(%arg0: i32) -> (i32, i32) {
    %c0_i32 = arith.constant 0 : i32
    %c0_i32_0 = arith.constant 0 : i32
    %c0_i32_1 = arith.constant 0 : i32
    return %c0_i32, %c0_i32_0 : i32, i32
  }
  func.func @transform_4(%arg0: i32) -> (i32, i32) {
    %c0_i32 = arith.constant 0 : i32
    %c0_i32_0 = arith.constant 0 : i32
    return %c0_i32, %arg0 : i32, i32
  }
}

module attributes {stable_mosaic.version = 11 : i64} {
  func.func @fc_kernel(%arg0: i32, %arg1: memref<32x1568xbf16, #tpu.memory_space<vmem>>, %arg2: memref<1568x128xbf16, #tpu.memory_space<vmem>>, %arg3: memref<1x128xf32, #tpu.memory_space<vmem>>, %arg4: memref<32x128xf32, #tpu.memory_space<vmem>>) attributes {dimension_semantics = [#tpu.dimension_semantics<parallel>], iteration_bounds = array<i64: 1>, scalar_prefetch = 0 : i64, scratch_operands = 0 : i64, tpu.core_type = #tpu.core_type<tc>, window_params = [{transform_indices = @transform_0, window_bounds = array<i64: 32, 1568>}, {pipeline_mode = #tpu.pipeline_mode<synchronous>, transform_indices = @transform_1, window_bounds = array<i64: 1568, 128>}, {pipeline_mode = #tpu.pipeline_mode<synchronous>, transform_indices = @transform_2, window_bounds = array<i64: 1, 128>}, {transform_indices = @transform_3, window_bounds = array<i64: 32, 128>}]} {
    %c0 = arith.constant 0 : index
    %c0_0 = arith.constant 0 : index
    %0 = vector.load %arg1[%c0, %c0_0] : memref<32x1568xbf16, #tpu.memory_space<vmem>>, vector<32x1568xbf16>
    %c0_1 = arith.constant 0 : index
    %c0_2 = arith.constant 0 : index
    %1 = vector.load %arg2[%c0_1, %c0_2] : memref<1568x128xbf16, #tpu.memory_space<vmem>>, vector<1568x128xbf16>
    %cst = arith.constant dense<0.000000e+00> : vector<32x128xf32>
    %2 = tpu.matmul %0, %1, %cst {dimension_numbers = #tpu.dot_dimension_numbers<[1], [0], [0], [1], [0, 0, 1, 1], [], []>} : vector<32x1568xbf16>, vector<1568x128xbf16>, vector<32x128xf32> -> vector<32x128xf32>
    %c0_3 = arith.constant 0 : index
    %c0_4 = arith.constant 0 : index
    %3 = vector.load %arg3[%c0_3, %c0_4] : memref<1x128xf32, #tpu.memory_space<vmem>>, vector<1x128xf32>
    %4 = vector.broadcast %3 : vector<1x128xf32> to vector<32x128xf32>
    %5 = arith.addf %2, %4 : vector<32x128xf32>
    %c0_5 = arith.constant 0 : index
    %c0_6 = arith.constant 0 : index
    %6 = vector.load %arg4[%c0_5, %c0_6] : memref<32x128xf32, #tpu.memory_space<vmem>>, vector<32x128xf32>
    tpu.vector_store %arg4[%c0_5, %c0_6], %5 {strides = array<i32>} : memref<32x128xf32, #tpu.memory_space<vmem>>, vector<32x128xf32>,
    return
  }
  func.func @transform_0(%arg0: i32) -> (i32, i32) {
    %c0_i32 = arith.constant 0 : i32
    %c0_i32_0 = arith.constant 0 : i32
    return %arg0, %c0_i32 : i32, i32
  }
  func.func @transform_1(%arg0: i32) -> (i32, i32) {
    %c0_i32 = arith.constant 0 : i32
    %c0_i32_0 = arith.constant 0 : i32
    %c0_i32_1 = arith.constant 0 : i32
    return %c0_i32, %c0_i32_0 : i32, i32
  }
  func.func @transform_2(%arg0: i32) -> (i32, i32) {
    %c0_i32 = arith.constant 0 : i32
    %c0_i32_0 = arith.constant 0 : i32
    %c0_i32_1 = arith.constant 0 : i32
    return %c0_i32, %c0_i32_0 : i32, i32
  }
  func.func @transform_3(%arg0: i32) -> (i32, i32) {
    %c0_i32 = arith.constant 0 : i32
    %c0_i32_0 = arith.constant 0 : i32
    return %arg0, %c0_i32 : i32, i32
  }
}

</mosaic_0001>

<bundles_post_ra>
// kernel: femnist_forward.2
= control target key start
LH: loop header
LB: loop body
LE: loop exit
PB: predicated region body
PF: predicated region fallthrough
CT: control target
= control target key end

     0   :  { %vm2179_vm0 = vcmask 1043456   ;;  %vm2180_vm1 = vcmask 1044480   ;;  %v8749_v1 = vmov 65535   ;;  %v11697_v3 = vmov 0   ;;  %s11692_s0 = inlined_call_operand.vmem [shape: bf16[25,25088], index: 0, kind: input, shape index: {}]   ;;  %s11693_s1 = inlined_call_operand.vmem [shape: bf16[8,25], index: 1, kind: input, shape index: {}]   ;;  %s11694_s2 = inlined_call_operand.vmem [shape: f32[8,1], index: 2, kind: input, shape index: {}]   ;;  %s11695_s3 = inlined_call_operand.vmem [shape: f32[8,1], index: 3, kind: input, shape index: {}]   ;;  %s11696_s4 = inlined_call_operand.vmem [shape: bf16[8,6272], index: 4, kind: output, shape index: {}]  }
   0x1   :  { %v8158_v0 = vld [vmem:[%s11692_s0 + $0x4] ss:$784 sps:$4 sm:$0xff]   ;;  %v2181_v2 = vsel %vm2179_vm0, 4294967295, %v8749_v1  ;;  %2803 = vmatprep.mubr.bf16.mxu0 %v11697_v3  ;;  %2844 = vmatprep.mubr.bf16.mxu1 %v11697_v3  ;;  %v8160_v4 = vld [vmem:[%s11692_s0 + $0xc] ss:$784 sps:$4 sm:$0xff]   ;;  %vm2175_vm2 = vcmask 203776  }
   0x2   :  { %8157 = vset.pattern.permute.xlu0 %v11697_v3  ;;  %2771 = vmatprep.subr.bf16.mxu0 %v8158_v0  ;;  %v8162_v5 = vld [vmem:[%s11692_s0] ss:$784 sps:$4 sm:$0xff]   ;;  %v8163_v6 = vld [vmem:[%s11692_s0 + $0x8] ss:$784 sps:$4 sm:$0xff]   ;;  %v8791_v7 = vsel %vm2180_vm1, %v2181_v2, 0 }
   0x3   :  { %2812 = vmatprep.subr.bf16.mxu1 %v8160_v4  ;;  %v8164_v8 = vld [vmem:[%s11692_s0 + $0x624] ss:$784 sps:$4 sm:$0x1f]   ;;  %2772 = vmatpush1.bf16.msra.mxu0 %v8162_v5  ;;  %v8166_v9 = vld [vmem:[%s11692_s0 + $0x62c] ss:$784 sps:$4 sm:$0x1f]  }
   0x4   :  { %2813 = vmatpush1.bf16.msra.mxu1 %v8163_v6  ;;  %v2187_v10 = vand.u32 %v8164_v8, %v8791_v7  ;;  %v8168_v11 = vld [vmem:[%s11692_s0 + $0x620] ss:$784 sps:$4 sm:$0x1f]   ;;  %v8169_v12 = vld [vmem:[%s11692_s0 + $0x628] ss:$784 sps:$4 sm:$0x1f]   ;;  %v2193_v13 = vand.u32 %v8166_v9, %v8791_v7 }
   0x5   :  { %v2184_v14 = vand.u32 %v8168_v11, %v8791_v7  ;;  %v2190_v15 = vand.u32 %v8169_v12, %v8791_v7  ;;  %v8812_v16 = vld [vmem:[%s11693_s1] sm:$0xf]  ;;  %v8172_v18 = vld [vmem:[%s11692_s0 + $0x14] ss:$784 sps:$4 sm:$0xff]   ;;  %v8173_v19 = vld [vmem:[%s11692_s0 + $0x18] ss:$784 sps:$4 sm:$0xff]  }
   0x6   :  { %2773 = vmatprep.subr.bf16.mxu0 %v2187_v10  ;;  %v8170_v17 = vld [vmem:[%s11692_s0 + $0x10] ss:$784 sps:$4 sm:$0xff]   ;;  %2814 = vmatprep.subr.bf16.mxu1 %v2193_v13  ;;  %v8175_v20 = vld [vmem:[%s11692_s0 + $0x1c] ss:$784 sps:$4 sm:$0xff]   ;;  %v8184_v29 = vld [vmem:[%s11692_s0 + $0x24] ss:$784 sps:$4 sm:$0xff]  }
   0x7   :  { %2774 = vmatpush1.bf16.msra.mxu0 %v2184_v14  ;;  %v8176_v21 = vld [vmem:[%s11692_s0 + $0x630] ss:$784 sps:$4 sm:$0x1f]   ;;  %v8178_v22 = vld [vmem:[%s11692_s0 + $0x634] ss:$784 sps:$4 sm:$0x1f]  }
   0x8   :  { %2815 = vmatpush1.bf16.msra.mxu1 %v2190_v15  ;;  %2853 = vmatprep.subr.bf16.mxu0 %v8172_v18  ;;  %v8179_v23 = vld [vmem:[%s11692_s0 + $0x638] ss:$784 sps:$4 sm:$0x1f]   ;;  %v8181_v24 = vld [vmem:[%s11692_s0 + $0x63c] ss:$784 sps:$4 sm:$0x1f]   ;;  %v2199_v25 = vand.u32 %v8178_v22, %v8791_v7  ;;  %v2196_v27 = vand.u32 %v8176_v21, %v8791_v7 }
   0x9   :  { %2894 = vmatprep.subr.bf16.mxu1 %v8175_v20  ;;  %v2205_v26 = vand.u32 %v8181_v24, %v8791_v7  ;;  %v2202_v28 = vand.u32 %v8179_v23, %v8791_v7  ;;  %v8187_v30 = vld [vmem:[%s11692_s0 + $0x2c] ss:$784 sps:$4 sm:$0xff]   ;;  %v8182_v31 = vld [vmem:[%s11692_s0 + $0x20] ss:$784 sps:$4 sm:$0xff]   ;;  %v8185_v32 = vld [vmem:[%s11692_s0 + $0x28] ss:$784 sps:$4 sm:$0xff]  }
   0xa   :  { %8007 = vmatmul.mubr.msk.bf16.vlgmr.msra.gmra.mrb[0].mxu0 %vm2175_vm2, %v8812_v16  ;;  %v8188_v33 = vld [vmem:[%s11692_s0 + $0x640] ss:$784 sps:$4 sm:$0x1f]   ;;  %v8190_v34 = vld [vmem:[%s11692_s0 + $0x644] ss:$784 sps:$4 sm:$0x1f]  }
   0xb   :  { %8008 = vmatmul.mubr.msk.bf16.vlgmr.msra.gmra.mrb[0].mxu1 %vm2175_vm2, %v8812_v16  ;;  %2854 = vmatpush1.bf16.msra.mxu0 %v8170_v17  ;;  %v8191_v35 = vld [vmem:[%s11692_s0 + $0x648] ss:$784 sps:$4 sm:$0x1f]   ;;  %v8193_v36 = vld [vmem:[%s11692_s0 + $0x64c] ss:$784 sps:$4 sm:$0x1f]   ;;  %v2211_v37 = vand.u32 %v8190_v34, %v8791_v7  ;;  %v2208_v40 = vand.u32 %v8188_v33, %v8791_v7 }
   0xc   :  { %2895 = vmatpush1.bf16.msra.mxu1 %v8173_v19  ;;  %2855 = vmatprep.subr.bf16.mxu0 %v2199_v25  ;;  %v2217_v38 = vand.u32 %v8193_v36, %v8791_v7  ;;  %v8196_v39 = vld [vmem:[%s11692_s0 + $0x34] ss:$784 sps:$4 sm:$0xff]   ;;  %v2214_v41 = vand.u32 %v8191_v35, %v8791_v7  ;;  %v8199_v42 = vld [vmem:[%s11692_s0 + $0x3c] ss:$784 sps:$4 sm:$0xff]   ;;  %v8194_v45 = vld [vmem:[%s11692_s0 + $0x30] ss:$784 sps:$4 sm:$0xff]  }
   0xd   :  { %2885 = vmatprep.mubr.bf16.mxu0 %v11697_v3  ;;  %2896 = vmatprep.subr.bf16.mxu1 %v2205_v26  ;;  %v8202_v43 = vld [vmem:[%s11692_s0 + $0x654] ss:$784 sps:$4 sm:$0x1f]   ;;  %v8205_v44 = vld [vmem:[%s11692_s0 + $0x65c] ss:$784 sps:$4 sm:$0x1f]  }
   0xe   :  { %2926 = vmatprep.mubr.bf16.mxu1 %v11697_v3  ;;  %v8200_v46 = vld [vmem:[%s11692_s0 + $0x650] ss:$784 sps:$4 sm:$0x1f]   ;;  %v8197_v47 = vld [vmem:[%s11692_s0 + $0x38] ss:$784 sps:$4 sm:$0xff]   ;;  %v2223_v49 = vand.u32 %v8202_v43, %v8791_v7  ;;  %v2229_v50 = vand.u32 %v8205_v44, %v8791_v7 }
   0xf   :  { %2856 = vmatpush1.bf16.msra.mxu0 %v2196_v27  ;;  %v8203_v48 = vld [vmem:[%s11692_s0 + $0x658] ss:$784 sps:$4 sm:$0x1f]   ;;  %v8208_v51 = vld [vmem:[%s11692_s0 + $0x44] ss:$784 sps:$4 sm:$0xff]   ;;  %v2220_v52 = vand.u32 %v8200_v46, %v8791_v7 }
  0x10   :  { %2897 = vmatpush1.bf16.msra.mxu1 %v2202_v28  ;;  %2935 = vmatprep.subr.bf16.mxu0 %v8184_v29  ;;  %v2226_v53 = vand.u32 %v8203_v48, %v8791_v7  ;;  %v8211_v54 = vld [vmem:[%s11692_s0 + $0x4c] ss:$784 sps:$4 sm:$0xff]   ;;  %v8214_v55 = vld [vmem:[%s11692_s0 + $0x664] ss:$784 sps:$4 sm:$0x1f]  }
  0x11   :  { %2976 = vmatprep.subr.bf16.mxu1 %v8187_v30  ;;  %v8217_v56 = vld [vmem:[%s11692_s0 + $0x66c] ss:$784 sps:$4 sm:$0x1f]   ;;  %v8206_v57 = vld [vmem:[%s11692_s0 + $0x40] ss:$784 sps:$4 sm:$0xff]   ;;  %v2235_v61 = vand.u32 %v8214_v55, %v8791_v7 }
  0x12   :  { %8009 = vmatmul.mubr.msk.bf16.vlgmr.msra.gmra.mrb[4].mxu0 %vm2175_vm2, %v8812_v16  ;;  %v8209_v58 = vld [vmem:[%s11692_s0 + $0x48] ss:$784 sps:$4 sm:$0xff]   ;;  %v8212_v59 = vld [vmem:[%s11692_s0 + $0x660] ss:$784 sps:$4 sm:$0x1f]   ;;  %v2241_v62 = vand.u32 %v8217_v56, %v8791_v7 }
  0x13   :  { %8010 = vmatmul.mubr.msk.bf16.vlgmr.msra.gmra.mrb[4].mxu1 %vm2175_vm2, %v8812_v16  ;;  %2936 = vmatpush1.bf16.msra.mxu0 %v8182_v31  ;;  %v8215_v60 = vld [vmem:[%s11692_s0 + $0x668] ss:$784 sps:$4 sm:$0x1f]   ;;  %v8220_v63 = vld [vmem:[%s11692_s0 + $0x54] ss:$784 sps:$4 sm:$0xff]   ;;  %v2232_v1 = vand.u32 %v8212_v59, %v8791_v7 }
  0x14   :  { %2977 = vmatpush1.bf16.msra.mxu1 %v8185_v32  ;;  %2937 = vmatprep.subr.bf16.mxu0 %v2211_v37  ;;  %v8223_v0 = vld [vmem:[%s11692_s0 + $0x5c] ss:$784 sps:$4 sm:$0xff]   ;;  %v2238_v2 = vand.u32 %v8215_v60, %v8791_v7  ;;  %v8226_v4 = vld [vmem:[%s11692_s0 + $0x674] ss:$784 sps:$4 sm:$0x1f]  }
  0x15   :  { %2978 = vmatprep.subr.bf16.mxu1 %v2217_v38  ;;  %2967 = vmatprep.mubr.bf16.mxu0 %v11697_v3  ;;  %v8229_v5 = vld [vmem:[%s11692_s0 + $0x67c] ss:$784 sps:$4 sm:$0x1f]   ;;  %v8218_v6 = vld [vmem:[%s11692_s0 + $0x50] ss:$784 sps:$4 sm:$0xff]   ;;  %v2247_v11 = vand.u32 %v8226_v4, %v8791_v7 }
  0x16   :  { %3008 = vmatprep.mubr.bf16.mxu1 %v11697_v3  ;;  %v8221_v8 = vld [vmem:[%s11692_s0 + $0x58] ss:$784 sps:$4 sm:$0xff]   ;;  %v8224_v9 = vld [vmem:[%s11692_s0 + $0x670] ss:$784 sps:$4 sm:$0x1f]   ;;  %v2253_v12 = vand.u32 %v8229_v5, %v8791_v7 }
  0x17   :  { %2938 = vmatpush1.bf16.msra.mxu0 %v2208_v40  ;;  %v8227_v10 = vld [vmem:[%s11692_s0 + $0x678] ss:$784 sps:$4 sm:$0x1f]   ;;  %v2244_v13 = vand.u32 %v8224_v9, %v8791_v7  ;;  %v8232_v15 = vld [vmem:[%s11692_s0 + $0x64] ss:$784 sps:$4 sm:$0xff]  }
  0x18   :  { %2979 = vmatpush1.bf16.msra.mxu1 %v2214_v41  ;;  %3017 = vmatprep.subr.bf16.mxu0 %v8196_v39  ;;  %v2250_v14 = vand.u32 %v8227_v10, %v8791_v7  ;;  %v8238_v17 = vld [vmem:[%s11692_s0 + $0x684] ss:$784 sps:$4 sm:$0x1f]   ;;  %v8235_v18 = vld [vmem:[%s11692_s0 + $0x6c] ss:$784 sps:$4 sm:$0xff]  }
  0x19   :  { %3058 = vmatprep.subr.bf16.mxu1 %v8199_v42  ;;  %v8241_v19 = vld [vmem:[%s11692_s0 + $0x68c] ss:$784 sps:$4 sm:$0x1f]   ;;  %v8230_v20 = vld [vmem:[%s11692_s0 + $0x60] ss:$784 sps:$4 sm:$0xff]   ;;  %v2259_v24 = vand.u32 %v8238_v17, %v8791_v7 }
  0x1a   :  { %8011 = vmatmul.mubr.msk.bf16.vlgmr.msra.gmra.mrb[8].mxu0 %vm2175_vm2, %v8812_v16  ;;  %v8233_v21 = vld [vmem:[%s11692_s0 + $0x68] ss:$784 sps:$4 sm:$0xff]   ;;  %v8236_v22 = vld [vmem:[%s11692_s0 + $0x680] ss:$784 sps:$4 sm:$0x1f]   ;;  %v2265_v25 = vand.u32 %v8241_v19, %v8791_v7 }
  0x1b   :  { %8012 = vmatmul.mubr.msk.bf16.vlgmr.msra.gmra.mrb[8].mxu1 %vm2175_vm2, %v8812_v16  ;;  %3018 = vmatpush1.bf16.msra.mxu0 %v8194_v45  ;;  %v8239_v23 = vld [vmem:[%s11692_s0 + $0x688] ss:$784 sps:$4 sm:$0x1f]   ;;  %v8244_v26 = vld [vmem:[%s11692_s0 + $0x74] ss:$784 sps:$4 sm:$0xff]   ;;  %v2256_v27 = vand.u32 %v8236_v22, %v8791_v7 }
  0x1c   :  { %3059 = vmatpush1.bf16.msra.mxu1 %v8197_v47  ;;  %3019 = vmatprep.subr.bf16.mxu0 %v2223_v49  ;;  %v2262_v28 = vand.u32 %v8239_v23, %v8791_v7  ;;  %v8247_v29 = vld [vmem:[%s11692_s0 + $0x7c] ss:$784 sps:$4 sm:$0xff]   ;;  %v8250_v30 = vld [vmem:[%s11692_s0 + $0x694] ss:$784 sps:$4 sm:$0x1f]  }
  0x1d   :  { %3060 = vmatprep.subr.bf16.mxu1 %v2229_v50  ;;  %3049 = vmatprep.mubr.bf16.mxu0 %v11697_v3  ;;  %v8253_v31 = vld [vmem:[%s11692_s0 + $0x69c] ss:$784 sps:$4 sm:$0x1f]   ;;  %v8242_v32 = vld [vmem:[%s11692_s0 + $0x70] ss:$784 sps:$4 sm:$0xff]   ;;  %v2271_v36 = vand.u32 %v8250_v30, %v8791_v7 }
  0x1e   :  { %3090 = vmatprep.mubr.bf16.mxu1 %v11697_v3  ;;  %v8245_v33 = vld [vmem:[%s11692_s0 + $0x78] ss:$784 sps:$4 sm:$0xff]   ;;  %v8248_v34 = vld [vmem:[%s11692_s0 + $0x690] ss:$784 sps:$4 sm:$0x1f]   ;;  %v2277_v37 = vand.u32 %v8253_v31, %v8791_v7 }
  0x1f   :  { %3020 = vmatpush1.bf16.msra.mxu0 %v2220_v52  ;;  %v8251_v35 = vld [vmem:[%s11692_s0 + $0x698] ss:$784 sps:$4 sm:$0x1f]   ;;  %v8256_v38 = vld [vmem:[%s11692_s0 + $0x84] ss:$784 sps:$4 sm:$0xff]   ;;  %v2268_v39 = vand.u32 %v8248_v34, %v8791_v7 }
  0x20   :  { %3061 = vmatpush1.bf16.msra.mxu1 %v2226_v53  ;;  %3099 = vmatprep.subr.bf16.mxu0 %v8208_v51  ;;  %v2274_v40 = vand.u32 %v8251_v35, %v8791_v7  ;;  %v8259_v41 = vld [vmem:[%s11692_s0 + $0x8c] ss:$784 sps:$4 sm:$0xff]   ;;  %v8262_v42 = vld [vmem:[%s11692_s0 + $0x6a4] ss:$784 sps:$4 sm:$0x1f]  }
  0x21   :  { %3140 = vmatprep.subr.bf16.mxu1 %v8211_v54  ;;  %v8265_v43 = vld [vmem:[%s11692_s0 + $0x6ac] ss:$784 sps:$4 sm:$0x1f]   ;;  %v8254_v44 = vld [vmem:[%s11692_s0 + $0x80] ss:$784 sps:$4 sm:$0xff]   ;;  %v2283_v49 = vand.u32 %v8262_v42, %v8791_v7 }
  0x22   :  { %8013 = vmatmul.mubr.msk.bf16.vlgmr.msra.gmra.mrb[12].mxu0 %vm2175_vm2, %v8812_v16  ;;  %v8257_v45 = vld [vmem:[%s11692_s0 + $0x88] ss:$784 sps:$4 sm:$0xff]   ;;  %v8260_v46 = vld [vmem:[%s11692_s0 + $0x6a0] ss:$784 sps:$4 sm:$0x1f]   ;;  %v2289_v50 = vand.u32 %v8265_v43, %v8791_v7 }
  0x23   :  { %8014 = vmatmul.mubr.msk.bf16.vlgmr.msra.gmra.mrb[12].mxu1 %vm2175_vm2, %v8812_v16  ;;  %3100 = vmatpush1.bf16.msra.mxu0 %v8206_v57  ;;  %v8263_v47 = vld [vmem:[%s11692_s0 + $0x6a8] ss:$784 sps:$4 sm:$0x1f]   ;;  %v6789_v48 = vld [vmem:[%s11694_s2] sm:$0xff]  ;;  %v8271_v52 = vld [vmem:[%s11692_s0 + $0x9c] ss:$784 sps:$4 sm:$0xff]   ;;  %v2280_v54 = vand.u32 %v8260_v46, %v8791_v7 }
  0x24   :  { %3141 = vmatpush1.bf16.msra.mxu1 %v8209_v58  ;;  %3101 = vmatprep.subr.bf16.mxu0 %v2235_v61  ;;  %v8268_v51 = vld [vmem:[%s11692_s0 + $0x94] ss:$784 sps:$4 sm:$0xff]   ;;  %v2286_v55 = vand.u32 %v8263_v47, %v8791_v7  ;;  %v8277_v57 = vld [vmem:[%s11692_s0 + $0x6bc] ss:$784 sps:$4 sm:$0x1f]  }
  0x25   :  { %3142 = vmatprep.subr.bf16.mxu1 %v2241_v62  ;;  %3131 = vmatprep.mubr.bf16.mxu0 %v11697_v3  ;;  %v8274_v53 = vld [vmem:[%s11692_s0 + $0x6b4] ss:$784 sps:$4 sm:$0x1f]   ;;  %v8266_v58 = vld [vmem:[%s11692_s0 + $0x90] ss:$784 sps:$4 sm:$0xff]  }
  0x26   :  { %3172 = vmatprep.mubr.bf16.mxu1 %v11697_v3  ;;  %6792 = vperm.xlu0 %8157, %v6789_v48   ;;  %v6991_v56 = vld [vmem:[%s11695_s3] sm:$0xff]  ;;  %v8269_v59 = vld [vmem:[%s11692_s0 + $0x98] ss:$784 sps:$4 sm:$0xff]   ;;  %v2295_v62 = vand.u32 %v8274_v53, %v8791_v7  ;;  %v8283_v4 = vld [vmem:[%s11692_s0 + $0xac] ss:$784 sps:$4 sm:$0xff]  }
  0x27   :  { %3102 = vmatpush1.bf16.msra.mxu0 %v2232_v1  ;;  %v8272_v60 = vld [vmem:[%s11692_s0 + $0x6b0] ss:$784 sps:$4 sm:$0x1f]   ;;  %v8275_v61 = vld [vmem:[%s11692_s0 + $0x6b8] ss:$784 sps:$4 sm:$0x1f]  }
  0x28   :  { %3143 = vmatpush1.bf16.msra.mxu1 %v2238_v2  ;;  %3181 = vmatprep.subr.bf16.mxu0 %v8220_v63  ;;  %v2301_v63 = vand.u32 %v8277_v57, %v8791_v7  ;;  %v2292_v1 = vand.u32 %v8272_v60, %v8791_v7  ;;  %v2298_v2 = vand.u32 %v8275_v61, %v8791_v7  ;;  %v8286_v5 = vld [vmem:[%s11692_s0 + $0x6c4] ss:$784 sps:$4 sm:$0x1f]   ;;  %v8284_v9 = vld [vmem:[%s11692_s0 + $0x6c0] ss:$784 sps:$4 sm:$0x1f]  }
  0x29   :  { %3222 = vmatprep.subr.bf16.mxu1 %v8223_v0  ;;  %v8280_v0 = vld [vmem:[%s11692_s0 + $0xa4] ss:$784 sps:$4 sm:$0xff]   ;;  %v8281_v10 = vld [vmem:[%s11692_s0 + $0xa8] ss:$784 sps:$4 sm:$0xff]   ;;  %v8319_v42 = vld [vmem:[%s11692_s0 + $0xdc] ss:$784 sps:$4 sm:$0xff]  }
  0x2a   :  { %8015 = vmatmul.mubr.msk.bf16.vlgmr.msra.gmra.mrb[16].mxu0 %vm2175_vm2, %v8812_v16  ;;  %6994 = vperm.xlu0 %8157, %v6991_v56   ;;  %v8298_v19 = vld [vmem:[%s11692_s0 + $0x6d4] ss:$784 sps:$4 sm:$0x1f]   ;;  %v8293_v22 = vld [vmem:[%s11692_s0 + $0xb8] ss:$784 sps:$4 sm:$0xff]  }
  0x2b   :  { %8016 = vmatmul.mubr.msk.bf16.vlgmr.msra.gmra.mrb[16].mxu1 %vm2175_vm2, %v8812_v16  ;;  %3182 = vmatpush1.bf16.msra.mxu0 %v8218_v6  ;;  %v8289_v6 = vld [vmem:[%s11692_s0 + $0x6cc] ss:$784 sps:$4 sm:$0x1f]   ;;  %v8296_v23 = vld [vmem:[%s11692_s0 + $0x6d0] ss:$784 sps:$4 sm:$0x1f]  }
  0x2c   :  { %3223 = vmatpush1.bf16.msra.mxu1 %v8221_v8  ;;  %3183 = vmatprep.subr.bf16.mxu0 %v2247_v11  ;;  %v8278_v8 = vld [vmem:[%s11692_s0 + $0xa0] ss:$784 sps:$4 sm:$0xff]   ;;  %v8287_v11 = vld [vmem:[%s11692_s0 + $0x6c8] ss:$784 sps:$4 sm:$0x1f]  }
  0x2d   :  { %3224 = vmatprep.subr.bf16.mxu1 %v2253_v12  ;;  %3213 = vmatprep.mubr.bf16.mxu0 %v11697_v3  ;;  %v2307_v12 = vand.u32 %v8286_v5, %v8791_v7  ;;  %v2310_v17 = vand.u32 %v8287_v11, %v8791_v7  ;;  %v8310_v31 = vld [vmem:[%s11692_s0 + $0x6e4] ss:$784 sps:$4 sm:$0x1f]   ;;  %v8305_v34 = vld [vmem:[%s11692_s0 + $0xc8] ss:$784 sps:$4 sm:$0xff]  }
  0x2e   :  { %3254 = vmatprep.mubr.bf16.mxu1 %v11697_v3  ;;  %v8308_v35 = vld [vmem:[%s11692_s0 + $0x6e0] ss:$784 sps:$4 sm:$0x1f]   ;;  %v8322_v43 = vld [vmem:[%s11692_s0 + $0x6f4] ss:$784 sps:$4 sm:$0x1f]  }
  0x2f   :  { %3184 = vmatpush1.bf16.msra.mxu0 %v2244_v13  ;;  %v2313_v13 = vand.u32 %v8289_v6, %v8791_v7  ;;  %v8320_v46 = vld [vmem:[%s11692_s0 + $0x6f0] ss:$784 sps:$4 sm:$0x1f]   ;;  %v8317_v47 = vld [vmem:[%s11692_s0 + $0xd8] ss:$784 sps:$4 sm:$0xff]  }
  0x30   :  { %3225 = vmatpush1.bf16.msra.mxu1 %v2250_v14  ;;  %3263 = vmatprep.subr.bf16.mxu0 %v8232_v15  ;;  %v8292_v14 = vld [vmem:[%s11692_s0 + $0xb4] ss:$784 sps:$4 sm:$0xff]   ;;  %v2304_v15 = vand.u32 %v8284_v9, %v8791_v7  ;;  %v8323_v48 = vld [vmem:[%s11692_s0 + $0x6f8] ss:$784 sps:$4 sm:$0x1f]  }
  0x31   :  { %3304 = vmatprep.subr.bf16.mxu1 %v8235_v18  ;;  %v8295_v18 = vld [vmem:[%s11692_s0 + $0xbc] ss:$784 sps:$4 sm:$0xff]   ;;  %v2346_v53 = vand.u32 %v8323_v48, %v8791_v7  ;;  %v8326_v57 = vld [vmem:[%s11692_s0 + $0xe0] ss:$784 sps:$4 sm:$0xff]   ;;  %v8341_v6 = vld [vmem:[%s11692_s0 + $0xf8] ss:$784 sps:$4 sm:$0xff]  }
  0x32   :  { %8017 = vmatmul.mubr.msk.bf16.vlgmr.msra.gmra.mrb[20].mxu0 %vm2175_vm2, %v8812_v16  ;;  %v8337_v56 = vld [vmem:[%s11692_s0 + $0x70c] ss:$784 sps:$4 sm:$0x1f]   ;;  %v8335_v60 = vld [vmem:[%s11692_s0 + $0x708] ss:$784 sps:$4 sm:$0x1f]  }
  0x33   :  { %8018 = vmatmul.mubr.msk.bf16.vlgmr.msra.gmra.mrb[20].mxu1 %vm2175_vm2, %v8812_v16  ;;  %3264 = vmatpush1.bf16.msra.mxu0 %v8230_v20  ;;  %v8301_v20 = vld [vmem:[%s11692_s0 + $0x6dc] ss:$784 sps:$4 sm:$0x1f]   ;;  %v8338_v5 = vld [vmem:[%s11692_s0 + $0xf0] ss:$784 sps:$4 sm:$0xff]  }
  0x34   :  { %3305 = vmatpush1.bf16.msra.mxu1 %v8233_v21  ;;  %3265 = vmatprep.subr.bf16.mxu0 %v2259_v24  ;;  %v8290_v21 = vld [vmem:[%s11692_s0 + $0xb0] ss:$784 sps:$4 sm:$0xff]   ;;  %v8299_v24 = vld [vmem:[%s11692_s0 + $0x6d8] ss:$784 sps:$4 sm:$0x1f]  }
  0x35   :  { %3306 = vmatprep.subr.bf16.mxu1 %v2265_v25  ;;  %3295 = vmatprep.mubr.bf16.mxu0 %v11697_v3  ;;  %v2319_v25 = vand.u32 %v8298_v19, %v8791_v7  ;;  %v2322_v30 = vand.u32 %v8299_v24, %v8791_v7  ;;  %v8347_v9 = vld [vmem:[%s11692_s0 + $0x718] ss:$784 sps:$4 sm:$0x1f]   ;;  %v8361_v19 = vld [vmem:[%s11692_s0 + $0x72c] ss:$784 sps:$4 sm:$0x1f]  }
  0x36   :  { %3336 = vmatprep.mubr.bf16.mxu1 %v11697_v3 }
  0x37   :  { %3266 = vmatpush1.bf16.msra.mxu0 %v2256_v27  ;;  %v8304_v27 = vld [vmem:[%s11692_s0 + $0xc4] ss:$784 sps:$4 sm:$0xff]  }
  0x38   :  { %3307 = vmatpush1.bf16.msra.mxu1 %v2262_v28  ;;  %3345 = vmatprep.subr.bf16.mxu0 %v8244_v26  ;;  %v2325_v26 = vand.u32 %v8301_v20, %v8791_v7  ;;  %v8307_v28 = vld [vmem:[%s11692_s0 + $0xcc] ss:$784 sps:$4 sm:$0xff]   ;;  %v8350_v20 = vld [vmem:[%s11692_s0 + $0x100] ss:$784 sps:$4 sm:$0xff]  }
  0x39   :  { %3386 = vmatprep.subr.bf16.mxu1 %v8247_v29  ;;  %v2316_v29 = vand.u32 %v8296_v23, %v8791_v7  ;;  %v8359_v23 = vld [vmem:[%s11692_s0 + $0x728] ss:$784 sps:$4 sm:$0x1f]  }
  0x3a   :  { %8019 = vmatmul.mubr.msk.bf16.vlgmr.msra.gmra.mrb[24].mxu0 %vm2175_vm2, %v8812_v16 }
  0x3b   :  { %8020 = vmatmul.mubr.msk.bf16.vlgmr.msra.gmra.mrb[24].mxu1 %vm2175_vm2, %v8812_v16  ;;  %3346 = vmatpush1.bf16.msra.mxu0 %v8242_v32  ;;  %v8313_v32 = vld [vmem:[%s11692_s0 + $0x6ec] ss:$784 sps:$4 sm:$0x1f]  }
  0x3c   :  { %3387 = vmatpush1.bf16.msra.mxu1 %v8245_v33  ;;  %3347 = vmatprep.subr.bf16.mxu0 %v2271_v36  ;;  %v8302_v33 = vld [vmem:[%s11692_s0 + $0xc0] ss:$784 sps:$4 sm:$0xff]   ;;  %v8311_v36 = vld [vmem:[%s11692_s0 + $0x6e8] ss:$784 sps:$4 sm:$0x1f]  }
  0x3d   :  { %3388 = vmatprep.subr.bf16.mxu1 %v2277_v37  ;;  %3377 = vmatprep.mubr.bf16.mxu0 %v11697_v3  ;;  %v2331_v37 = vand.u32 %v8310_v31, %v8791_v7  ;;  %v8373_v31 = vld [vmem:[%s11692_s0 + $0x73c] ss:$784 sps:$4 sm:$0x1f]  }
  0x3e   :  { %3418 = vmatprep.mubr.bf16.mxu1 %v11697_v3 }
  0x3f   :  { %3348 = vmatpush1.bf16.msra.mxu0 %v2268_v39  ;;  %v8316_v39 = vld [vmem:[%s11692_s0 + $0xd4] ss:$784 sps:$4 sm:$0xff]  }
  0x40   :  { %3389 = vmatpush1.bf16.msra.mxu1 %v2274_v40  ;;  %3427 = vmatprep.subr.bf16.mxu0 %v8256_v38  ;;  %v2337_v38 = vand.u32 %v8313_v32, %v8791_v7  ;;  %v2328_v40 = vand.u32 %v8308_v35, %v8791_v7  ;;  %v8362_v32 = vld [vmem:[%s11692_s0 + $0x110] ss:$784 sps:$4 sm:$0xff]   ;;  %v8371_v35 = vld [vmem:[%s11692_s0 + $0x738] ss:$784 sps:$4 sm:$0x1f]  }
  0x41   :  { %3468 = vmatprep.subr.bf16.mxu1 %v8259_v41  ;;  %v2334_v41 = vand.u32 %v8311_v36, %v8791_v7 }
  0x42   :  { %8021 = vmatmul.mubr.msk.bf16.vlgmr.msra.gmra.mrb[28].mxu0 %vm2175_vm2, %v8812_v16 }
  0x43   :  { %8022 = vmatmul.mubr.msk.bf16.vlgmr.msra.gmra.mrb[28].mxu1 %vm2175_vm2, %v8812_v16  ;;  %3428 = vmatpush1.bf16.msra.mxu0 %v8254_v44  ;;  %v8325_v44 = vld [vmem:[%s11692_s0 + $0x6fc] ss:$784 sps:$4 sm:$0x1f]  }
  0x44   :  { %3469 = vmatpush1.bf16.msra.mxu1 %v8257_v45  ;;  %3429 = vmatprep.subr.bf16.mxu0 %v2283_v49  ;;  %v8314_v45 = vld [vmem:[%s11692_s0 + $0xd0] ss:$784 sps:$4 sm:$0xff]   ;;  %v2343_v49 = vand.u32 %v8322_v43, %v8791_v7  ;;  %v8385_v43 = vld [vmem:[%s11692_s0 + $0x74c] ss:$784 sps:$4 sm:$0x1f]  }
  0x45   :  { %3470 = vmatprep.subr.bf16.mxu1 %v2289_v50  ;;  %3459 = vmatprep.mubr.bf16.mxu0 %v11697_v3  ;;  %v2349_v50 = vand.u32 %v8325_v44, %v8791_v7  ;;  %v8374_v44 = vld [vmem:[%s11692_s0 + $0x120] ss:$784 sps:$4 sm:$0xff]  }
  0x46   :  { %3500 = vmatprep.mubr.bf16.mxu1 %v11697_v3 }
  0x47   :  { %3430 = vmatpush1.bf16.msra.mxu0 %v2280_v54  ;;  %v8331_v54 = vld [vmem:[%s11692_s0 + $0xec] ss:$784 sps:$4 sm:$0xff]  }
  0x48   :  { %3471 = vmatpush1.bf16.msra.mxu1 %v2286_v55  ;;  %3509 = vmatprep.subr.bf16.mxu0 %v8268_v51  ;;  %v8328_v51 = vld [vmem:[%s11692_s0 + $0xe4] ss:$784 sps:$4 sm:$0xff]  }
  0x49   :  { %3550 = vmatprep.subr.bf16.mxu1 %v8271_v52  ;;  %v2340_v52 = vand.u32 %v8320_v46, %v8791_v7  ;;  %v8334_v55 = vld [vmem:[%s11692_s0 + $0x704] ss:$784 sps:$4 sm:$0x1f]   ;;  %v8380_v46 = vld [vmem:[%s11692_s0 + $0x740] ss:$784 sps:$4 sm:$0x1f]  }
  0x4a   :  { %8023 = vmatmul.mubr.msk.bf16.vlgmr.msra.gmra.mrb[32].mxu0 %vm2175_vm2, %v8812_v16  ;;  %v2355_v61 = vand.u32 %v8334_v55, %v8791_v7  ;;  %v8397_v55 = vld [vmem:[%s11692_s0 + $0x75c] ss:$784 sps:$4 sm:$0x1f]  }
  0x4b   :  { %8024 = vmatmul.mubr.msk.bf16.vlgmr.msra.gmra.mrb[32].mxu1 %vm2175_vm2, %v8812_v16  ;;  %3510 = vmatpush1.bf16.msra.mxu0 %v8266_v58  ;;  %v8329_v58 = vld [vmem:[%s11692_s0 + $0xe8] ss:$784 sps:$4 sm:$0xff]  }
  0x4c   :  { %3551 = vmatpush1.bf16.msra.mxu1 %v8269_v59  ;;  %3511 = vmatprep.subr.bf16.mxu0 %v2295_v62  ;;  %v8332_v59 = vld [vmem:[%s11692_s0 + $0x700] ss:$784 sps:$4 sm:$0x1f]   ;;  %v2361_v62 = vand.u32 %v8337_v56, %v8791_v7 }
  0x4d   :  { %3552 = vmatprep.subr.bf16.mxu1 %v2301_v63  ;;  %3541 = vmatprep.mubr.bf16.mxu0 %v11697_v3  ;;  %v8340_v63 = vld [vmem:[%s11692_s0 + $0xf4] ss:$784 sps:$4 sm:$0xff]   ;;  %v8386_v56 = vld [vmem:[%s11692_s0 + $0x130] ss:$784 sps:$4 sm:$0xff]  }
  0x4e   :  { %3582 = vmatprep.mubr.bf16.mxu1 %v11697_v3 }
  0x4f   :  { %3512 = vmatpush1.bf16.msra.mxu0 %v2292_v1  ;;  %v2352_v1 = vand.u32 %v8332_v59, %v8791_v7  ;;  %v8395_v59 = vld [vmem:[%s11692_s0 + $0x758] ss:$784 sps:$4 sm:$0x1f]  }
  0x50   :  { %3553 = vmatpush1.bf16.msra.mxu1 %v2298_v2  ;;  %3591 = vmatprep.subr.bf16.mxu0 %v8280_v0  ;;  %v8343_v0 = vld [vmem:[%s11692_s0 + $0xfc] ss:$784 sps:$4 sm:$0xff]   ;;  %v2358_v2 = vand.u32 %v8335_v60, %v8791_v7 }
  0x51   :  { %3632 = vmatprep.subr.bf16.mxu1 %v8283_v4  ;;  %v8346_v4 = vld [vmem:[%s11692_s0 + $0x714] ss:$784 sps:$4 sm:$0x1f]  }
  0x52   :  { %8025 = vmatmul.mubr.msk.bf16.vlgmr.msra.gmra.mrb[36].mxu0 %vm2175_vm2, %v8812_v16 }
  0x53   :  { %8026 = vmatmul.mubr.msk.bf16.vlgmr.msra.gmra.mrb[36].mxu1 %vm2175_vm2, %v8812_v16  ;;  %3592 = vmatpush1.bf16.msra.mxu0 %v8278_v8  ;;  %v8344_v8 = vld [vmem:[%s11692_s0 + $0x710] ss:$784 sps:$4 sm:$0x1f]  }
  0x54   :  { %3633 = vmatpush1.bf16.msra.mxu1 %v8281_v10  ;;  %3593 = vmatprep.subr.bf16.mxu0 %v2307_v12  ;;  %v2367_v10 = vand.u32 %v8346_v4, %v8791_v7  ;;  %v9325_v12 = vld [vmem:[%s11693_s1] sm:$0xf]  ;;  %v8409_v4 = vld [vmem:[%s11692_s0 + $0x76c] ss:$784 sps:$4 sm:$0x1f]  }
  0x55   :  { %3634 = vmatprep.subr.bf16.mxu1 %v2313_v13  ;;  %3623 = vmatprep.mubr.bf16.mxu0 %v11697_v3  ;;  %v2364_v13 = vand.u32 %v8344_v8, %v8791_v7  ;;  %v8407_v8 = vld [vmem:[%s11692_s0 + $0x768] ss:$784 sps:$4 sm:$0x1f]  }
  0x56   :  { %3664 = vmatprep.mubr.bf16.mxu1 %v11697_v3 }
  0x57   :  { %3594 = vmatpush1.bf16.msra.mxu0 %v2304_v15  ;;  %v8352_v15 = vld [vmem:[%s11692_s0 + $0x104] ss:$784 sps:$4 sm:$0xff]  }
  0x58   :  { %3635 = vmatpush1.bf16.msra.mxu1 %v2310_v17  ;;  %3673 = vmatprep.subr.bf16.mxu0 %v8292_v14  ;;  %v2370_v14 = vand.u32 %v8347_v9, %v8791_v7  ;;  %v8358_v17 = vld [vmem:[%s11692_s0 + $0x724] ss:$784 sps:$4 sm:$0x1f]  }
  0x59   :  { %3714 = vmatprep.subr.bf16.mxu1 %v8295_v18  ;;  %v8355_v18 = vld [vmem:[%s11692_s0 + $0x10c] ss:$784 sps:$4 sm:$0xff]   ;;  %v2379_v24 = vand.u32 %v8358_v17, %v8791_v7 }
  0x5a   :  { %8027 = vmatmul.mubr.msk.bf16.vlgmr.msra.gmra.mrb[40].mxu0 %vm2175_vm2, %v8812_v16  ;;  %v8415_v17 = vld [vmem:[%s11692_s0 + $0x15c] ss:$784 sps:$4 sm:$0xff]  }
  0x5b   :  { %8028 = vmatmul.mubr.msk.bf16.vlgmr.msra.gmra.mrb[40].mxu1 %vm2175_vm2, %v8812_v16  ;;  %3674 = vmatpush1.bf16.msra.mxu0 %v8290_v21  ;;  %v8353_v21 = vld [vmem:[%s11692_s0 + $0x108] ss:$784 sps:$4 sm:$0xff]  }
  0x5c   :  { %3715 = vmatpush1.bf16.msra.mxu1 %v8293_v22  ;;  %3675 = vmatprep.subr.bf16.mxu0 %v2319_v25  ;;  %v8356_v22 = vld [vmem:[%s11692_s0 + $0x720] ss:$784 sps:$4 sm:$0x1f]   ;;  %v2385_v25 = vand.u32 %v8361_v19, %v8791_v7 }
  0x5d   :  { %3716 = vmatprep.subr.bf16.mxu1 %v2325_v26  ;;  %3705 = vmatprep.mubr.bf16.mxu0 %v11697_v3  ;;  %v8364_v26 = vld [vmem:[%s11692_s0 + $0x114] ss:$784 sps:$4 sm:$0xff]   ;;  %v8410_v19 = vld [vmem:[%s11692_s0 + $0x150] ss:$784 sps:$4 sm:$0xff]  }
  0x5e   :  { %3746 = vmatprep.mubr.bf16.mxu1 %v11697_v3 }
  0x5f   :  { %3676 = vmatpush1.bf16.msra.mxu0 %v2316_v29  ;;  %v8367_v29 = vld [vmem:[%s11692_s0 + $0x11c] ss:$784 sps:$4 sm:$0xff]  }
  0x60   :  { %3717 = vmatpush1.bf16.msra.mxu1 %v2322_v30  ;;  %3755 = vmatprep.subr.bf16.mxu0 %v8304_v27  ;;  %v2376_v27 = vand.u32 %v8356_v22, %v8791_v7  ;;  %v8370_v30 = vld [vmem:[%s11692_s0 + $0x734] ss:$784 sps:$4 sm:$0x1f]   ;;  %v8419_v22 = vld [vmem:[%s11692_s0 + $0x778] ss:$784 sps:$4 sm:$0x1f]  }
  0x61   :  { %3796 = vmatprep.subr.bf16.mxu1 %v8307_v28  ;;  %v2382_v28 = vand.u32 %v8359_v23, %v8791_v7  ;;  %v2391_v36 = vand.u32 %v8370_v30, %v8791_v7  ;;  %v8433_v30 = vld [vmem:[%s11692_s0 + $0x78c] ss:$784 sps:$4 sm:$0x1f]  }
  0x62   :  { %8029 = vmatmul.mubr.msk.bf16.vlgmr.msra.gmra.mrb[44].mxu0 %vm2175_vm2, %v8812_v16 }
  0x63   :  { %8030 = vmatmul.mubr.msk.bf16.vlgmr.msra.gmra.mrb[44].mxu1 %vm2175_vm2, %v8812_v16  ;;  %3756 = vmatpush1.bf16.msra.mxu0 %v8302_v33  ;;  %v8365_v33 = vld [vmem:[%s11692_s0 + $0x118] ss:$784 sps:$4 sm:$0xff]  }
  0x64   :  { %3797 = vmatpush1.bf16.msra.mxu1 %v8305_v34  ;;  %3757 = vmatprep.subr.bf16.mxu0 %v2331_v37  ;;  %v8368_v34 = vld [vmem:[%s11692_s0 + $0x730] ss:$784 sps:$4 sm:$0x1f]   ;;  %v2397_v37 = vand.u32 %v8373_v31, %v8791_v7 }
  0x65   :  { %3798 = vmatprep.subr.bf16.mxu1 %v2337_v38  ;;  %3787 = vmatprep.mubr.bf16.mxu0 %v11697_v3  ;;  %v8376_v38 = vld [vmem:[%s11692_s0 + $0x124] ss:$784 sps:$4 sm:$0xff]   ;;  %v8422_v31 = vld [vmem:[%s11692_s0 + $0x160] ss:$784 sps:$4 sm:$0xff]  }
  0x66   :  { %3828 = vmatprep.mubr.bf16.mxu1 %v11697_v3 }
  0x67   :  { %3758 = vmatpush1.bf16.msra.mxu0 %v2328_v40  ;;  %v2394_v40 = vand.u32 %v8371_v35, %v8791_v7 }
  0x68   :  { %3799 = vmatpush1.bf16.msra.mxu1 %v2334_v41  ;;  %3837 = vmatprep.subr.bf16.mxu0 %v8316_v39  ;;  %v2388_v39 = vand.u32 %v8368_v34, %v8791_v7  ;;  %v8379_v41 = vld [vmem:[%s11692_s0 + $0x12c] ss:$784 sps:$4 sm:$0xff]   ;;  %v8431_v34 = vld [vmem:[%s11692_s0 + $0x788] ss:$784 sps:$4 sm:$0x1f]  }
  0x69   :  { %3878 = vmatprep.subr.bf16.mxu1 %v8319_v42  ;;  %v8382_v42 = vld [vmem:[%s11692_s0 + $0x744] ss:$784 sps:$4 sm:$0x1f]  }
  0x6a   :  { %8031 = vmatmul.mubr.msk.bf16.vlgmr.msra.gmra.mrb[48].mxu0 %vm2175_vm2, %v8812_v16  ;;  %v2403_v48 = vand.u32 %v8382_v42, %v8791_v7  ;;  %v8445_v42 = vld [vmem:[%s11692_s0 + $0x79c] ss:$784 sps:$4 sm:$0x1f]  }
  0x6b   :  { %8032 = vmatmul.mubr.msk.bf16.vlgmr.msra.gmra.mrb[48].mxu1 %vm2175_vm2, %v8812_v16  ;;  %3838 = vmatpush1.bf16.msra.mxu0 %v8314_v45  ;;  %v8377_v45 = vld [vmem:[%s11692_s0 + $0x128] ss:$784 sps:$4 sm:$0xff]  }
  0x6c   :  { %3879 = vmatpush1.bf16.msra.mxu1 %v8317_v47  ;;  %3839 = vmatprep.subr.bf16.mxu0 %v2343_v49  ;;  %v8383_v47 = vld [vmem:[%s11692_s0 + $0x748] ss:$784 sps:$4 sm:$0x1f]   ;;  %v2409_v49 = vand.u32 %v8385_v43, %v8791_v7  ;;  %v8434_v43 = vld [vmem:[%s11692_s0 + $0x170] ss:$784 sps:$4 sm:$0xff]  }
  0x6d   :  { %3880 = vmatprep.subr.bf16.mxu1 %v2349_v50  ;;  %3869 = vmatprep.mubr.bf16.mxu0 %v11697_v3  ;;  %v2400_v50 = vand.u32 %v8380_v46, %v8791_v7  ;;  %v8443_v46 = vld [vmem:[%s11692_s0 + $0x798] ss:$784 sps:$4 sm:$0x1f]  }
  0x6e   :  { %3910 = vmatprep.mubr.bf16.mxu1 %v11697_v3 }
  0x6f   :  { %3840 = vmatpush1.bf16.msra.mxu0 %v2340_v52  ;;  %v8388_v52 = vld [vmem:[%s11692_s0 + $0x134] ss:$784 sps:$4 sm:$0xff]  }
  0x70   :  { %3881 = vmatpush1.bf16.msra.mxu1 %v2346_v53  ;;  %3919 = vmatprep.subr.bf16.mxu0 %v8328_v51  ;;  %v2406_v51 = vand.u32 %v8383_v47, %v8791_v7  ;;  %v8394_v53 = vld [vmem:[%s11692_s0 + $0x754] ss:$784 sps:$4 sm:$0x1f]  }
  0x71   :  { %3960 = vmatprep.subr.bf16.mxu1 %v8331_v54  ;;  %v8391_v54 = vld [vmem:[%s11692_s0 + $0x13c] ss:$784 sps:$4 sm:$0xff]   ;;  %v2415_v60 = vand.u32 %v8394_v53, %v8791_v7 }
  0x72   :  { %8033 = vmatmul.mubr.msk.bf16.vlgmr.msra.gmra.mrb[52].mxu0 %vm2175_vm2, %v8812_v16  ;;  %v8451_v53 = vld [vmem:[%s11692_s0 + $0x18c] ss:$784 sps:$4 sm:$0xff]  }
  0x73   :  { %8034 = vmatmul.mubr.msk.bf16.vlgmr.msra.gmra.mrb[52].mxu1 %vm2175_vm2, %v8812_v16  ;;  %3920 = vmatpush1.bf16.msra.mxu0 %v8326_v57  ;;  %v8349_v16 = vld [vmem:[%s11692_s0 + $0x71c] ss:$784 sps:$4 sm:$0x1f]   ;;  %v8389_v57 = vld [vmem:[%s11692_s0 + $0x138] ss:$784 sps:$4 sm:$0xff]  }
  0x74   :  { %3961 = vmatpush1.bf16.msra.mxu1 %v8329_v58  ;;  %3921 = vmatprep.subr.bf16.mxu0 %v2355_v61  ;;  %v2373_v11 = vand.u32 %v8349_v16, %v8791_v7  ;;  %v8392_v58 = vld [vmem:[%s11692_s0 + $0x750] ss:$784 sps:$4 sm:$0x1f]   ;;  %v2421_v61 = vand.u32 %v8397_v55, %v8791_v7 }
  0x75   :  { %3962 = vmatprep.subr.bf16.mxu1 %v2361_v62  ;;  %3951 = vmatprep.mubr.bf16.mxu0 %v11697_v3  ;;  %v8400_v62 = vld [vmem:[%s11692_s0 + $0x144] ss:$784 sps:$4 sm:$0xff]   ;;  %v8398_v16 = vld [vmem:[%s11692_s0 + $0x140] ss:$784 sps:$4 sm:$0xff]  }
  0x76   :  { %3992 = vmatprep.mubr.bf16.mxu1 %v11697_v3  ;;  %v8446_v55 = vld [vmem:[%s11692_s0 + $0x180] ss:$784 sps:$4 sm:$0xff]  }
  0x77   :  { %3922 = vmatpush1.bf16.msra.mxu0 %v2352_v1  ;;  %v2418_v1 = vand.u32 %v8395_v59, %v8791_v7 }
  0x78   :  { %3963 = vmatpush1.bf16.msra.mxu1 %v2358_v2  ;;  %4001 = vmatprep.subr.bf16.mxu0 %v8340_v63  ;;  %v8403_v63 = vld [vmem:[%s11692_s0 + $0x14c] ss:$784 sps:$4 sm:$0xff]   ;;  %v8406_v2 = vld [vmem:[%s11692_s0 + $0x764] ss:$784 sps:$4 sm:$0x1f]  }
  0x79   :  { %4042 = vmatprep.subr.bf16.mxu1 %v8343_v0  ;;  %v2412_v0 = vand.u32 %v8392_v58, %v8791_v7  ;;  %v2427_v9 = vand.u32 %v8406_v2, %v8791_v7  ;;  %v8455_v58 = vld [vmem:[%s11692_s0 + $0x7a8] ss:$784 sps:$4 sm:$0x1f]   ;;  %v8469_v2 = vld [vmem:[%s11692_s0 + $0x7bc] ss:$784 sps:$4 sm:$0x1f]  }
  0x7a   :  { %8035 = vmatmul.mubr.msk.bf16.vlgmr.msra.gmra.mrb[56].mxu0 %vm2175_vm2, %v9325_v12 }
  0x7b   :  { %8036 = vmatmul.mubr.msk.bf16.vlgmr.msra.gmra.mrb[56].mxu1 %vm2175_vm2, %v9325_v12  ;;  %4002 = vmatpush1.bf16.msra.mxu0 %v8338_v5  ;;  %v8401_v5 = vld [vmem:[%s11692_s0 + $0x148] ss:$784 sps:$4 sm:$0xff]  }
  0x7c   :  { %4043 = vmatpush1.bf16.msra.mxu1 %v8341_v6  ;;  %4003 = vmatprep.subr.bf16.mxu0 %v2367_v10  ;;  %v8404_v6 = vld [vmem:[%s11692_s0 + $0x760] ss:$784 sps:$4 sm:$0x1f]   ;;  %v2433_v10 = vand.u32 %v8409_v4, %v8791_v7 }
  0x7d   :  { %4044 = vmatprep.subr.bf16.mxu1 %v2373_v11  ;;  %4033 = vmatprep.mubr.bf16.mxu0 %v11697_v3  ;;  %v8412_v11 = vld [vmem:[%s11692_s0 + $0x154] ss:$784 sps:$4 sm:$0xff]   ;;  %v8458_v4 = vld [vmem:[%s11692_s0 + $0x190] ss:$784 sps:$4 sm:$0xff]  }
  0x7e   :  { %4074 = vmatprep.mubr.bf16.mxu1 %v11697_v3 }
  0x7f   :  { %4004 = vmatpush1.bf16.msra.mxu0 %v2364_v13  ;;  %v2424_v13 = vand.u32 %v8404_v6, %v8791_v7  ;;  %v8467_v6 = vld [vmem:[%s11692_s0 + $0x7b8] ss:$784 sps:$4 sm:$0x1f]  }
  0x80   :  { %4045 = vmatpush1.bf16.msra.mxu1 %v2370_v14  ;;  %4083 = vmatprep.subr.bf16.mxu0 %v8352_v15  ;;  %v2430_v14 = vand.u32 %v8407_v8, %v8791_v7  ;;  %v8418_v15 = vld [vmem:[%s11692_s0 + $0x774] ss:$784 sps:$4 sm:$0x1f]  }
  0x81   :  { %4124 = vmatprep.subr.bf16.mxu1 %v8355_v18  ;;  %v8421_v18 = vld [vmem:[%s11692_s0 + $0x77c] ss:$784 sps:$4 sm:$0x1f]   ;;  %v2439_v23 = vand.u32 %v8418_v15, %v8791_v7  ;;  %v8478_v15 = vld [vmem:[%s11692_s0 + $0x7c4] ss:$784 sps:$4 sm:$0x1f]  }
  0x82   :  { %8037 = vmatmul.mubr.msk.bf16.vlgmr.msra.gmra.mrb[60].mxu0 %vm2175_vm2, %v9325_v12 }
  0x83   :  { %8038 = vmatmul.mubr.msk.bf16.vlgmr.msra.gmra.mrb[60].mxu1 %vm2175_vm2, %v9325_v12  ;;  %4084 = vmatpush1.bf16.msra.mxu0 %v8350_v20  ;;  %v8413_v20 = vld [vmem:[%s11692_s0 + $0x158] ss:$784 sps:$4 sm:$0xff]  }
  0x84   :  { %4125 = vmatpush1.bf16.msra.mxu1 %v8353_v21  ;;  %4085 = vmatprep.subr.bf16.mxu0 %v2379_v24  ;;  %v8416_v21 = vld [vmem:[%s11692_s0 + $0x770] ss:$784 sps:$4 sm:$0x1f]   ;;  %v2445_v24 = vand.u32 %v8421_v18, %v8791_v7 }
  0x85   :  { %4126 = vmatprep.subr.bf16.mxu1 %v2385_v25  ;;  %4115 = vmatprep.mubr.bf16.mxu0 %v11697_v3  ;;  %v8424_v25 = vld [vmem:[%s11692_s0 + $0x164] ss:$784 sps:$4 sm:$0xff]   ;;  %v8470_v18 = vld [vmem:[%s11692_s0 + $0x1a0] ss:$784 sps:$4 sm:$0xff]  }
  0x86   :  { %4156 = vmatprep.mubr.bf16.mxu1 %v11697_v3 }
  0x87   :  { %4086 = vmatpush1.bf16.msra.mxu0 %v2376_v27  ;;  %v2442_v27 = vand.u32 %v8419_v22, %v8791_v7  ;;  %v2499_v22 = vand.u32 %v8478_v15, %v8791_v7 }
  0x88   :  { %4127 = vmatpush1.bf16.msra.mxu1 %v2382_v28  ;;  %4165 = vmatprep.subr.bf16.mxu0 %v8364_v26  ;;  %v2436_v26 = vand.u32 %v8416_v21, %v8791_v7  ;;  %v8427_v28 = vld [vmem:[%s11692_s0 + $0x16c] ss:$784 sps:$4 sm:$0xff]   ;;  %v8479_v21 = vld [vmem:[%s11692_s0 + $0x7c8] ss:$784 sps:$4 sm:$0x1f]  }
  0x89   :  { %4206 = vmatprep.subr.bf16.mxu1 %v8367_v29  ;;  %v8430_v29 = vld [vmem:[%s11692_s0 + $0x784] ss:$784 sps:$4 sm:$0x1f]  }
  0x8a   :  { %8039 = vmatmul.mubr.msk.bf16.vlgmr.msra.gmra.mrb[64].mxu0 %vm2175_vm2, %v9325_v12  ;;  %v2451_v35 = vand.u32 %v8430_v29, %v8791_v7  ;;  %v8493_v29 = vld [vmem:[%s11692_s0 + $0x7dc] ss:$784 sps:$4 sm:$0x1f]  }
  0x8b   :  { %8040 = vmatmul.mubr.msk.bf16.vlgmr.msra.gmra.mrb[64].mxu1 %vm2175_vm2, %v9325_v12  ;;  %4166 = vmatpush1.bf16.msra.mxu0 %v8362_v32  ;;  %v8428_v32 = vld [vmem:[%s11692_s0 + $0x780] ss:$784 sps:$4 sm:$0x1f]  }
  0x8c   :  { %4207 = vmatpush1.bf16.msra.mxu1 %v8365_v33  ;;  %4167 = vmatprep.subr.bf16.mxu0 %v2391_v36  ;;  %v8425_v33 = vld [vmem:[%s11692_s0 + $0x168] ss:$784 sps:$4 sm:$0xff]   ;;  %v2457_v36 = vand.u32 %v8433_v30, %v8791_v7  ;;  %v8482_v30 = vld [vmem:[%s11692_s0 + $0x1b0] ss:$784 sps:$4 sm:$0xff]  }
  0x8d   :  { %4208 = vmatprep.subr.bf16.mxu1 %v2397_v37  ;;  %4197 = vmatprep.mubr.bf16.mxu0 %v11697_v3  ;;  %v8436_v37 = vld [vmem:[%s11692_s0 + $0x174] ss:$784 sps:$4 sm:$0xff]  }
  0x8e   :  { %4238 = vmatprep.mubr.bf16.mxu1 %v11697_v3 }
  0x8f   :  { %4168 = vmatpush1.bf16.msra.mxu0 %v2388_v39  ;;  %v2448_v39 = vand.u32 %v8428_v32, %v8791_v7  ;;  %v8485_v32 = vld [vmem:[%s11692_s0 + $0x1b8] ss:$784 sps:$4 sm:$0xff]  }
  0x90   :  { %4209 = vmatpush1.bf16.msra.mxu1 %v2394_v40  ;;  %4247 = vmatprep.subr.bf16.mxu0 %v8376_v38  ;;  %v8439_v38 = vld [vmem:[%s11692_s0 + $0x17c] ss:$784 sps:$4 sm:$0xff]   ;;  %v2454_v40 = vand.u32 %v8431_v34, %v8791_v7 }
  0x91   :  { %4288 = vmatprep.subr.bf16.mxu1 %v8379_v41  ;;  %v8442_v41 = vld [vmem:[%s11692_s0 + $0x794] ss:$784 sps:$4 sm:$0x1f]  }
  0x92   :  { %8041 = vmatmul.mubr.msk.bf16.vlgmr.msra.gmra.mrb[68].mxu0 %vm2175_vm2, %v9325_v12  ;;  %v2463_v47 = vand.u32 %v8442_v41, %v8791_v7  ;;  %v8505_v41 = vld [vmem:[%s11692_s0 + $0x7ec] ss:$784 sps:$4 sm:$0x1f]  }
  0x93   :  { %8042 = vmatmul.mubr.msk.bf16.vlgmr.msra.gmra.mrb[68].mxu1 %vm2175_vm2, %v9325_v12  ;;  %4248 = vmatpush1.bf16.msra.mxu0 %v8374_v44  ;;  %v8437_v44 = vld [vmem:[%s11692_s0 + $0x178] ss:$784 sps:$4 sm:$0xff]  }
  0x94   :  { %4289 = vmatpush1.bf16.msra.mxu1 %v8377_v45  ;;  %4249 = vmatprep.subr.bf16.mxu0 %v2403_v48  ;;  %v8440_v45 = vld [vmem:[%s11692_s0 + $0x790] ss:$784 sps:$4 sm:$0x1f]   ;;  %v2469_v48 = vand.u32 %v8445_v42, %v8791_v7 }
  0x95   :  { %4290 = vmatprep.subr.bf16.mxu1 %v2409_v49  ;;  %4279 = vmatprep.mubr.bf16.mxu0 %v11697_v3  ;;  %v8448_v49 = vld [vmem:[%s11692_s0 + $0x184] ss:$784 sps:$4 sm:$0xff]  }
  0x96   :  { %4320 = vmatprep.mubr.bf16.mxu1 %v11697_v3 }
  0x97   :  { %4250 = vmatpush1.bf16.msra.mxu0 %v2400_v50  ;;  %v2460_v50 = vand.u32 %v8440_v45, %v8791_v7  ;;  %v8497_v45 = vld [vmem:[%s11692_s0 + $0x1c8] ss:$784 sps:$4 sm:$0xff]  }
  0x98   :  { %4291 = vmatpush1.bf16.msra.mxu1 %v2406_v51  ;;  %4329 = vmatprep.subr.bf16.mxu0 %v8388_v52  ;;  %v2466_v51 = vand.u32 %v8443_v46, %v8791_v7  ;;  %v8454_v52 = vld [vmem:[%s11692_s0 + $0x7a4] ss:$784 sps:$4 sm:$0x1f]   ;;  %v8500_v46 = vld [vmem:[%s11692_s0 + $0x7e0] ss:$784 sps:$4 sm:$0x1f]  }
  0x99   :  { %4370 = vmatprep.subr.bf16.mxu1 %v8391_v54  ;;  %v8457_v54 = vld [vmem:[%s11692_s0 + $0x7ac] ss:$784 sps:$4 sm:$0x1f]   ;;  %v2475_v59 = vand.u32 %v8454_v52, %v8791_v7 }
  0x9a   :  { %8043 = vmatmul.mubr.msk.bf16.vlgmr.msra.gmra.mrb[72].mxu0 %vm2175_vm2, %v9325_v12 }
  0x9b   :  { %8044 = vmatmul.mubr.msk.bf16.vlgmr.msra.gmra.mrb[72].mxu1 %vm2175_vm2, %v9325_v12  ;;  %4330 = vmatpush1.bf16.msra.mxu0 %v8386_v56  ;;  %v8449_v56 = vld [vmem:[%s11692_s0 + $0x188] ss:$784 sps:$4 sm:$0xff]  }
  0x9c   :  { %4371 = vmatpush1.bf16.msra.mxu1 %v8389_v57  ;;  %4331 = vmatprep.subr.bf16.mxu0 %v2415_v60  ;;  %v8452_v57 = vld [vmem:[%s11692_s0 + $0x7a0] ss:$784 sps:$4 sm:$0x1f]   ;;  %v2481_v60 = vand.u32 %v8457_v54, %v8791_v7 }
  0x9d   :  { %4372 = vmatprep.subr.bf16.mxu1 %v2421_v61  ;;  %4361 = vmatprep.mubr.bf16.mxu0 %v11697_v3  ;;  %v8460_v61 = vld [vmem:[%s11692_s0 + $0x194] ss:$784 sps:$4 sm:$0xff]  }
  0x9e   :  { %4402 = vmatprep.mubr.bf16.mxu1 %v11697_v3 }
  0x9f   :  { %4332 = vmatpush1.bf16.msra.mxu0 %v2412_v0  ;;  %v8463_v0 = vld [vmem:[%s11692_s0 + $0x19c] ss:$784 sps:$4 sm:$0xff]  }
  0xa0   :  { %4373 = vmatpush1.bf16.msra.mxu1 %v2418_v1  ;;  %4411 = vmatprep.subr.bf16.mxu0 %v8400_v62  ;;  %v2472_v62 = vand.u32 %v8452_v57, %v8791_v7  ;;  %v8466_v1 = vld [vmem:[%s11692_s0 + $0x7b4] ss:$784 sps:$4 sm:$0x1f]  }
  0xa1   :  { %4452 = vmatprep.subr.bf16.mxu1 %v8403_v63  ;;  %v2478_v63 = vand.u32 %v8455_v58, %v8791_v7  ;;  %v2487_v8 = vand.u32 %v8466_v1, %v8791_v7  ;;  %v8508_v58 = vld [vmem:[%s11692_s0 + $0x1d4] ss:$784 sps:$4 sm:$0xff]   ;;  %v8509_v1 = vld [vmem:[%s11692_s0 + $0x1d8] ss:$784 sps:$4 sm:$0xff]  }
  0xa2   :  { %8045 = vmatmul.mubr.msk.bf16.vlgmr.msra.gmra.mrb[76].mxu0 %vm2175_vm2, %v9325_v12 }
  0xa3   :  { %8046 = vmatmul.mubr.msk.bf16.vlgmr.msra.gmra.mrb[76].mxu1 %vm2175_vm2, %v9325_v12  ;;  %4412 = vmatpush1.bf16.msra.mxu0 %v8398_v16  ;;  %v8464_v16 = vld [vmem:[%s11692_s0 + $0x7b0] ss:$784 sps:$4 sm:$0x1f]  }
  0xa4   :  { %4453 = vmatpush1.bf16.msra.mxu1 %v8401_v5  ;;  %4413 = vmatprep.subr.bf16.mxu0 %v2427_v9  ;;  %v8461_v5 = vld [vmem:[%s11692_s0 + $0x198] ss:$784 sps:$4 sm:$0xff]   ;;  %v2493_v9 = vand.u32 %v8469_v2, %v8791_v7 }
  0xa5   :  { %4454 = vmatprep.subr.bf16.mxu1 %v2433_v10  ;;  %4443 = vmatprep.mubr.bf16.mxu0 %v11697_v3  ;;  %v8472_v10 = vld [vmem:[%s11692_s0 + $0x1a4] ss:$784 sps:$4 sm:$0xff]  }
  0xa6   :  { %4484 = vmatprep.mubr.bf16.mxu1 %v11697_v3 }
  0xa7   :  { %4414 = vmatpush1.bf16.msra.mxu0 %v2424_v13  ;;  %v2484_v13 = vand.u32 %v8464_v16, %v8791_v7  ;;  %v8512_v16 = vld [vmem:[%s11692_s0 + $0x7f0] ss:$784 sps:$4 sm:$0x1f]  }
  0xa8   :  { %4455 = vmatpush1.bf16.msra.mxu1 %v2430_v14  ;;  %4493 = vmatprep.subr.bf16.mxu0 %v8412_v11  ;;  %v8475_v11 = vld [vmem:[%s11692_s0 + $0x1ac] ss:$784 sps:$4 sm:$0xff]   ;;  %v2490_v14 = vand.u32 %v8467_v6, %v8791_v7  ;;  %v2532_v15 = vand.u32 %v8512_v16, %v8791_v7 }
  0xa9   :  { %4534 = vmatprep.subr.bf16.mxu1 %v8415_v17  ;;  %v8481_v17 = vld [vmem:[%s11692_s0 + $0x7cc] ss:$784 sps:$4 sm:$0x1f]  }
  0xaa   :  { %8047 = vmatmul.mubr.msk.bf16.vlgmr.msra.gmra.mrb[80].mxu0 %vm2175_vm2, %v9325_v12  ;;  %v8553_v16 = vld [vmem:[%s11692_s0 + $0x82c] ss:$784 sps:$4 sm:$0x1f]  }
  0xab   :  { %8048 = vmatmul.mubr.msk.bf16.vlgmr.msra.gmra.mrb[80].mxu1 %vm2175_vm2, %v9325_v12  ;;  %4494 = vmatpush1.bf16.msra.mxu0 %v8410_v19  ;;  %v8473_v19 = vld [vmem:[%s11692_s0 + $0x1a8] ss:$784 sps:$4 sm:$0xff]  }
  0xac   :  { %4535 = vmatpush1.bf16.msra.mxu1 %v8413_v20  ;;  %4495 = vmatprep.subr.bf16.mxu0 %v2439_v23  ;;  %v8476_v20 = vld [vmem:[%s11692_s0 + $0x7c0] ss:$784 sps:$4 sm:$0x1f]   ;;  %v2505_v23 = vand.u32 %v8481_v17, %v8791_v7 }
  0xad   :  { %4536 = vmatprep.subr.bf16.mxu1 %v2445_v24  ;;  %4525 = vmatprep.mubr.bf16.mxu0 %v11697_v3  ;;  %v8484_v24 = vld [vmem:[%s11692_s0 + $0x1b4] ss:$784 sps:$4 sm:$0xff]  }
  0xae   :  { %4566 = vmatprep.mubr.bf16.mxu1 %v11697_v3 }
  0xaf   :  { %4496 = vmatpush1.bf16.msra.mxu0 %v2436_v26  ;;  %v2502_v26 = vand.u32 %v8479_v21, %v8791_v7 }
  0xb0   :  { %4537 = vmatpush1.bf16.msra.mxu1 %v2442_v27  ;;  %4575 = vmatprep.subr.bf16.mxu0 %v8424_v25  ;;  %v2496_v25 = vand.u32 %v8476_v20, %v8791_v7  ;;  %v8487_v27 = vld [vmem:[%s11692_s0 + $0x1bc] ss:$784 sps:$4 sm:$0xff]  }
  0xb1   :  { %4616 = vmatprep.subr.bf16.mxu1 %v8427_v28  ;;  %v8490_v28 = vld [vmem:[%s11692_s0 + $0x7d4] ss:$784 sps:$4 sm:$0x1f]  }
  0xb2   :  { %8049 = vmatmul.mubr.msk.bf16.vlgmr.msra.gmra.mrb[84].mxu0 %vm2175_vm2, %v9325_v12  ;;  %v2511_v34 = vand.u32 %v8490_v28, %v8791_v7 }
  0xb3   :  { %8050 = vmatmul.mubr.msk.bf16.vlgmr.msra.gmra.mrb[84].mxu1 %vm2175_vm2, %v9325_v12  ;;  %4576 = vmatpush1.bf16.msra.mxu0 %v8422_v31  ;;  %v8488_v31 = vld [vmem:[%s11692_s0 + $0x7d0] ss:$784 sps:$4 sm:$0x1f]  }
  0xb4   :  { %4617 = vmatpush1.bf16.msra.mxu1 %v8425_v33  ;;  %4577 = vmatprep.subr.bf16.mxu0 %v2451_v35  ;;  %v8491_v33 = vld [vmem:[%s11692_s0 + $0x7d8] ss:$784 sps:$4 sm:$0x1f]   ;;  %v2517_v35 = vand.u32 %v8493_v29, %v8791_v7 }
  0xb5   :  { %4618 = vmatprep.subr.bf16.mxu1 %v2457_v36  ;;  %4607 = vmatprep.mubr.bf16.mxu0 %v11697_v3  ;;  %v8496_v36 = vld [vmem:[%s11692_s0 + $0x1c4] ss:$784 sps:$4 sm:$0xff]   ;;  %v8527_v29 = vld [vmem:[%s11692_s0 + $0x808] ss:$784 sps:$4 sm:$0x1f]  }
  0xb6   :  { %4648 = vmatprep.mubr.bf16.mxu1 %v11697_v3 }
  0xb7   :  { %4578 = vmatpush1.bf16.msra.mxu0 %v2448_v39  ;;  %v8499_v39 = vld [vmem:[%s11692_s0 + $0x1cc] ss:$784 sps:$4 sm:$0xff]  }
  0xb8   :  { %4619 = vmatpush1.bf16.msra.mxu1 %v2454_v40  ;;  %4657 = vmatprep.subr.bf16.mxu0 %v8436_v37  ;;  %v2508_v37 = vand.u32 %v8488_v31, %v8791_v7  ;;  %v8502_v40 = vld [vmem:[%s11692_s0 + $0x7e4] ss:$784 sps:$4 sm:$0x1f]  }
  0xb9   :  { %4698 = vmatprep.subr.bf16.mxu1 %v8439_v38  ;;  %v2514_v38 = vand.u32 %v8491_v33, %v8791_v7  ;;  %v2523_v54 = vand.u32 %v8502_v40, %v8791_v7  ;;  %v8541_v40 = vld [vmem:[%s11692_s0 + $0x81c] ss:$784 sps:$4 sm:$0x1f]  }
  0xba   :  { %8051 = vmatmul.mubr.msk.bf16.vlgmr.msra.gmra.mrb[88].mxu0 %vm2175_vm2, %v9325_v12 }
  0xbb   :  { %8052 = vmatmul.mubr.msk.bf16.vlgmr.msra.gmra.mrb[88].mxu1 %vm2175_vm2, %v9325_v12  ;;  %4658 = vmatpush1.bf16.msra.mxu0 %v8434_v43 }
  0xbc   :  { %4699 = vmatpush1.bf16.msra.mxu1 %v8437_v44  ;;  %4659 = vmatprep.subr.bf16.mxu0 %v2463_v47  ;;  %v8494_v44 = vld [vmem:[%s11692_s0 + $0x1c0] ss:$784 sps:$4 sm:$0xff]  }
  0xbd   :  { %4700 = vmatprep.subr.bf16.mxu1 %v2469_v48  ;;  %4689 = vmatprep.mubr.bf16.mxu0 %v11697_v3 }
  0xbe   :  { %4730 = vmatprep.mubr.bf16.mxu1 %v11697_v3 }
  0xbf   :  { %4660 = vmatpush1.bf16.msra.mxu0 %v2460_v50 }
  0xc0   :  { %4701 = vmatpush1.bf16.msra.mxu1 %v2466_v51  ;;  %4739 = vmatprep.subr.bf16.mxu0 %v8448_v49  ;;  %v8503_v49 = vld [vmem:[%s11692_s0 + $0x7e8] ss:$784 sps:$4 sm:$0x1f]  }
  0xc1   :  { %4780 = vmatprep.subr.bf16.mxu1 %v8451_v53  ;;  %v2526_v57 = vand.u32 %v8503_v49, %v8791_v7 }
  0xc2   :  { %8053 = vmatmul.mubr.msk.bf16.vlgmr.msra.gmra.mrb[92].mxu0 %vm2175_vm2, %v9325_v12 }
  0xc3   :  { %8054 = vmatmul.mubr.msk.bf16.vlgmr.msra.gmra.mrb[92].mxu1 %vm2175_vm2, %v9325_v12  ;;  %4740 = vmatpush1.bf16.msra.mxu0 %v8446_v55  ;;  %v2529_v55 = vand.u32 %v8505_v41, %v8791_v7 }
  0xc4   :  { %4781 = vmatpush1.bf16.msra.mxu1 %v8449_v56  ;;  %4741 = vmatprep.subr.bf16.mxu0 %v2475_v59  ;;  %v2520_v56 = vand.u32 %v8500_v46, %v8791_v7  ;;  %v8514_v59 = vld [vmem:[%s11692_s0 + $0x7f4] ss:$784 sps:$4 sm:$0x1f]   ;;  %v8536_v46 = vld [vmem:[%s11692_s0 + $0x810] ss:$784 sps:$4 sm:$0x1f]  }
  0xc5   :  { %4782 = vmatprep.subr.bf16.mxu1 %v2481_v60  ;;  %4771 = vmatprep.mubr.bf16.mxu0 %v11697_v3  ;;  %v8511_v60 = vld [vmem:[%s11692_s0 + $0x1dc] ss:$784 sps:$4 sm:$0xff]  }
  0xc6   :  { %4812 = vmatprep.mubr.bf16.mxu1 %v11697_v3 }
  0xc7   :  { %4742 = vmatpush1.bf16.msra.mxu0 %v2472_v62 }
  0xc8   :  { %4783 = vmatpush1.bf16.msra.mxu1 %v2478_v63  ;;  %4821 = vmatprep.subr.bf16.mxu0 %v8460_v61  ;;  %v8517_v61 = vld [vmem:[%s11692_s0 + $0x7fc] ss:$784 sps:$4 sm:$0x1f]  }
  0xc9   :  { %4862 = vmatprep.subr.bf16.mxu1 %v8463_v0  ;;  %v8506_v0 = vld [vmem:[%s11692_s0 + $0x1d0] ss:$784 sps:$4 sm:$0xff]  }
  0xca   :  { %8055 = vmatmul.mubr.msk.bf16.vlgmr.msra.gmra.mrb[96].mxu0 %vm2175_vm2, %v9325_v12 }
  0xcb   :  { %8056 = vmatmul.mubr.msk.bf16.vlgmr.msra.gmra.mrb[96].mxu1 %vm2175_vm2, %v9325_v12  ;;  %4822 = vmatpush1.bf16.msra.mxu0 %v8458_v4 }
  0xcc   :  { %4863 = vmatpush1.bf16.msra.mxu1 %v8461_v5  ;;  %4823 = vmatprep.subr.bf16.mxu0 %v2487_v8  ;;  %v8515_v8 = vld [vmem:[%s11692_s0 + $0x7f8] ss:$784 sps:$4 sm:$0x1f]  }
  0xcd   :  { %4864 = vmatprep.subr.bf16.mxu1 %v2493_v9  ;;  %4853 = vmatprep.mubr.bf16.mxu0 %v11697_v3  ;;  %v2538_v17 = vand.u32 %v8515_v8, %v8791_v7  ;;  %v8542_v8 = vld [vmem:[%s11692_s0 + $0x200] ss:$784 sps:$4 sm:$0xff]  }
  0xce   :  { %4894 = vmatprep.mubr.bf16.mxu1 %v11697_v3 }
  0xcf   :  { %4824 = vmatpush1.bf16.msra.mxu0 %v2484_v13  ;;  %v2541_v13 = vand.u32 %v8517_v61, %v8791_v7  ;;  %v8544_v61 = vld [vmem:[%s11692_s0 + $0x204] ss:$784 sps:$4 sm:$0xff]  }
  0xd0   :  { %4865 = vmatpush1.bf16.msra.mxu1 %v2490_v14  ;;  %4903 = vmatprep.subr.bf16.mxu0 %v8472_v10  ;;  %v8520_v14 = vld [vmem:[%s11692_s0 + $0x1e4] ss:$784 sps:$4 sm:$0xff]  }
  0xd1   :  { %4944 = vmatprep.subr.bf16.mxu1 %v8475_v11  ;;  %v2535_v11 = vand.u32 %v8514_v59, %v8791_v7  ;;  %v2556_v59 = vand.u32 %v8536_v46, %v8791_v7 }
  0xd2   :  { %8057 = vmatmul.mubr.msk.bf16.vlgmr.msra.gmra.mrb[100].mxu0 %vm2175_vm2, %v9325_v12 }
  0xd3   :  { %8058 = vmatmul.mubr.msk.bf16.vlgmr.msra.gmra.mrb[100].mxu1 %vm2175_vm2, %v9325_v12  ;;  %4904 = vmatpush1.bf16.msra.mxu0 %v8470_v18  ;;  %v8523_v18 = vld [vmem:[%s11692_s0 + $0x1ec] ss:$784 sps:$4 sm:$0xff]  }
  0xd4   :  { %4945 = vmatpush1.bf16.msra.mxu1 %v8473_v19  ;;  %4905 = vmatprep.subr.bf16.mxu0 %v2499_v22  ;;  %v8526_v19 = vld [vmem:[%s11692_s0 + $0x804] ss:$784 sps:$4 sm:$0x1f]   ;;  %v8518_v22 = vld [vmem:[%s11692_s0 + $0x1e0] ss:$784 sps:$4 sm:$0xff]  }
  0xd5   :  { %4946 = vmatprep.subr.bf16.mxu1 %v2505_v23  ;;  %4935 = vmatprep.mubr.bf16.mxu0 %v11697_v3  ;;  %v8521_v23 = vld [vmem:[%s11692_s0 + $0x1e8] ss:$784 sps:$4 sm:$0xff]  }
  0xd6   :  { %4976 = vmatprep.mubr.bf16.mxu1 %v11697_v3 }
  0xd7   :  { %4906 = vmatpush1.bf16.msra.mxu0 %v2496_v25 }
  0xd8   :  { %4947 = vmatpush1.bf16.msra.mxu1 %v2502_v26  ;;  %4985 = vmatprep.subr.bf16.mxu0 %v8484_v24  ;;  %v8524_v24 = vld [vmem:[%s11692_s0 + $0x800] ss:$784 sps:$4 sm:$0x1f]  }
  0xd9   :  { %5026 = vmatprep.subr.bf16.mxu1 %v8487_v27 }
  0xda   :  { %8059 = vmatmul.mubr.msk.bf16.vlgmr.msra.gmra.mrb[104].mxu0 %vm2175_vm2, %v9325_v12 }
  0xdb   :  { %8060 = vmatmul.mubr.msk.bf16.vlgmr.msra.gmra.mrb[104].mxu1 %vm2175_vm2, %v9325_v12  ;;  %4986 = vmatpush1.bf16.msra.mxu0 %v8482_v30 }
  0xdc   :  { %5027 = vmatpush1.bf16.msra.mxu1 %v8485_v32  ;;  %4987 = vmatprep.subr.bf16.mxu0 %v2511_v34  ;;  %v2547_v32 = vand.u32 %v8526_v19, %v8791_v7  ;;  %v9864_v34 = vld [vmem:[%s11693_s1] sm:$0xf] }
  0xdd   :  { %5028 = vmatprep.subr.bf16.mxu1 %v2517_v35  ;;  %v9753_v42 = vpop.f32.mrb[0].mxu0  ;;  %5017 = vmatprep.mubr.bf16.mxu0 %v11697_v3  ;;  %v8532_v35 = vld [vmem:[%s11692_s0 + $0x1f4] ss:$784 sps:$4 sm:$0xff]  }
  0xde   :  { %v9755_v43 = vpop.f32.mrb[0].mxu1  ;;  %5058 = vmatprep.mubr.bf16.mxu1 %v11697_v3  ;;  %v9768_v47 = vpop.f32.mrb[1].mxu0 }
  0xdf   :  { %v9770_v48 = vpop.f32.mrb[1].mxu1  ;;  %v2809_v50 = vpop.f32.mrb[2].mxu0  ;;  %4988 = vmatpush1.bf16.msra.mxu0 %v2508_v37  ;;  %v2550_v37 = vand.u32 %v8527_v29, %v8791_v7  ;;  %v8562_v29 = vld [vmem:[%s11692_s0 + $0x834] ss:$784 sps:$4 sm:$0x1f]  }
  0xe0   :  { %v2850_v51 = vpop.f32.mrb[2].mxu1  ;;  %5029 = vmatpush1.bf16.msra.mxu1 %v2514_v38  ;;  %v2810_v52 = vpop.f32.mrb[3].mxu0  ;;  %5067 = vmatprep.subr.bf16.mxu0 %v8496_v36  ;;  %v2544_v36 = vand.u32 %v8524_v24, %v8791_v7  ;;  %v8535_v38 = vld [vmem:[%s11692_s0 + $0x1fc] ss:$784 sps:$4 sm:$0xff]  }
  0xe1   :  { %v2851_v53 = vpop.f32.mrb[3].mxu1  ;;  %5108 = vmatprep.subr.bf16.mxu1 %v8499_v39  ;;  %v8538_v39 = vld [vmem:[%s11692_s0 + $0x814] ss:$784 sps:$4 sm:$0x1f]  }
  0xe2   :  { %8061 = vmatmul.mubr.msk.bf16.vlgmr.msra.gmra.mrb[108].mxu0 %vm2175_vm2, %v9325_v12  ;;  %v8539_v51 = vld [vmem:[%s11692_s0 + $0x818] ss:$784 sps:$4 sm:$0x1f]  }
  0xe3   :  { %8062 = vmatmul.mubr.msk.bf16.vlgmr.msra.gmra.mrb[108].mxu1 %vm2175_vm2, %v9325_v12  ;;  %5068 = vmatpush1.bf16.msra.mxu0 %v8494_v44 }
  0xe4   :  { %5109 = vmatpush1.bf16.msra.mxu1 %v8497_v45  ;;  %5069 = vmatprep.subr.bf16.mxu0 %v2523_v54  ;;  %v8530_v45 = vld [vmem:[%s11692_s0 + $0x1f0] ss:$784 sps:$4 sm:$0xff]   ;;  %v8533_v54 = vld [vmem:[%s11692_s0 + $0x1f8] ss:$784 sps:$4 sm:$0xff]  }
  0xe5   :  { %5110 = vmatprep.subr.bf16.mxu1 %v2529_v55  ;;  %v9795_v62 = vpop.f32.mrb[4].mxu0  ;;  %5099 = vmatprep.mubr.bf16.mxu0 %v11697_v3 }
  0xe6   :  { %v9797_v63 = vpop.f32.mrb[4].mxu1  ;;  %5140 = vmatprep.mubr.bf16.mxu1 %v11697_v3  ;;  %v9807_v2 = vpop.f32.mrb[5].mxu0 }
  0xe7   :  { %v9809_v4 = vpop.f32.mrb[5].mxu1  ;;  %v2891_v5 = vpop.f32.mrb[6].mxu0  ;;  %5070 = vmatpush1.bf16.msra.mxu0 %v2520_v56 }
  0xe8   :  { %v2932_v6 = vpop.f32.mrb[6].mxu1  ;;  %5111 = vmatpush1.bf16.msra.mxu1 %v2526_v57  ;;  %v2892_v9 = vpop.f32.mrb[7].mxu0  ;;  %5149 = vmatprep.subr.bf16.mxu0 %v8508_v58  ;;  %v2559_v57 = vand.u32 %v8538_v39, %v8791_v7  ;;  %v2565_v58 = vand.u32 %v8541_v40, %v8791_v7  ;;  %v8563_v39 = vld [vmem:[%s11692_s0 + $0x838] ss:$784 sps:$4 sm:$0x1f]  }
  0xe9   :  { %v2933_v10 = vpop.f32.mrb[7].mxu1  ;;  %5190 = vmatprep.subr.bf16.mxu1 %v8511_v60  ;;  %v2562_v60 = vand.u32 %v8539_v51, %v8791_v7  ;;  %v8548_v9 = vld [vmem:[%s11692_s0 + $0x820] ss:$784 sps:$4 sm:$0x1f]  }
  0xea   :  { %8063 = vmatmul.mubr.msk.bf16.vlgmr.msra.gmra.mrb[112].mxu0 %vm2175_vm2, %v9325_v12  ;;  %v2568_v24 = vand.u32 %v8548_v9, %v8791_v7  ;;  %v8572_v9 = vld [vmem:[%s11692_s0 + $0x840] ss:$784 sps:$4 sm:$0x1f]  }
  0xeb   :  { %8064 = vmatmul.mubr.msk.bf16.vlgmr.msra.gmra.mrb[112].mxu1 %vm2175_vm2, %v9325_v12  ;;  %5150 = vmatpush1.bf16.msra.mxu0 %v8506_v0  ;;  %v8529_v12 = vld [vmem:[%s11692_s0 + $0x80c] ss:$784 sps:$4 sm:$0x1f]   ;;  %v8550_v0 = vld [vmem:[%s11692_s0 + $0x824] ss:$784 sps:$4 sm:$0x1f]  }
  0xec   :  { %5191 = vmatpush1.bf16.msra.mxu1 %v8509_v1  ;;  %5151 = vmatprep.subr.bf16.mxu0 %v2535_v11  ;;  %v2553_v33 = vand.u32 %v8529_v12, %v8791_v7  ;;  %v8547_v1 = vld [vmem:[%s11692_s0 + $0x20c] ss:$784 sps:$4 sm:$0xff]   ;;  %v2571_v12 = vand.u32 %v8550_v0, %v8791_v7  ;;  %v8566_v0 = vld [vmem:[%s11692_s0 + $0x220] ss:$784 sps:$4 sm:$0xff]  }
  0xed   :  { %5192 = vmatprep.subr.bf16.mxu1 %v2541_v13  ;;  %v9837_v20 = vpop.f32.mrb[8].mxu0  ;;  %5181 = vmatprep.mubr.bf16.mxu0 %v11697_v3  ;;  %v8545_v13 = vld [vmem:[%s11692_s0 + $0x208] ss:$784 sps:$4 sm:$0xff]  }
  0xee   :  { %v9839_v21 = vpop.f32.mrb[8].mxu1  ;;  %5222 = vmatprep.mubr.bf16.mxu1 %v11697_v3  ;;  %v9852_v25 = vpop.f32.mrb[9].mxu0 }
  0xef   :  { %v9854_v26 = vpop.f32.mrb[9].mxu1  ;;  %v2973_v27 = vpop.f32.mrb[10].mxu0  ;;  %5152 = vmatpush1.bf16.msra.mxu0 %v2532_v15 }
  0xf0   :  { %v3014_v28 = vpop.f32.mrb[10].mxu1  ;;  %5193 = vmatpush1.bf16.msra.mxu1 %v2538_v17  ;;  %v2974_v30 = vpop.f32.mrb[11].mxu0  ;;  %5231 = vmatprep.subr.bf16.mxu0 %v8520_v14  ;;  %v8551_v17 = vld [vmem:[%s11692_s0 + $0x828] ss:$784 sps:$4 sm:$0x1f]  }
  0xf1   :  { %v3015_v31 = vpop.f32.mrb[11].mxu1  ;;  %5272 = vmatprep.subr.bf16.mxu1 %v8523_v18  ;;  %v2574_v27 = vand.u32 %v8551_v17, %v8791_v7  ;;  %v8559_v28 = vld [vmem:[%s11692_s0 + $0x21c] ss:$784 sps:$4 sm:$0xff]  }
  0xf2   :  { %8065 = vmatmul.mubr.msk.bf16.vlgmr.msra.gmra.mrb[116].mxu0 %vm2175_vm2, %v9864_v34  ;;  %v8565_v30 = vld [vmem:[%s11692_s0 + $0x83c] ss:$784 sps:$4 sm:$0x1f]  }
  0xf3   :  { %8066 = vmatmul.mubr.msk.bf16.vlgmr.msra.gmra.mrb[116].mxu1 %vm2175_vm2, %v9864_v34  ;;  %5232 = vmatpush1.bf16.msra.mxu0 %v8518_v22  ;;  %v2577_v22 = vand.u32 %v8553_v16, %v8791_v7 }
  0xf4   :  { %5273 = vmatpush1.bf16.msra.mxu1 %v8521_v23  ;;  %5233 = vmatprep.subr.bf16.mxu0 %v2547_v32  ;;  %v8556_v23 = vld [vmem:[%s11692_s0 + $0x214] ss:$784 sps:$4 sm:$0xff]  }
  0xf5   :  { %5274 = vmatprep.subr.bf16.mxu1 %v2553_v33  ;;  %v9884_v41 = vpop.f32.mrb[12].mxu0  ;;  %5263 = vmatprep.mubr.bf16.mxu0 %v11697_v3  ;;  %v8554_v33 = vld [vmem:[%s11692_s0 + $0x210] ss:$784 sps:$4 sm:$0xff]  }
  0xf6   :  { %v9886_v44 = vpop.f32.mrb[12].mxu1  ;;  %5304 = vmatprep.mubr.bf16.mxu1 %v11697_v3  ;;  %v9896_v49 = vpop.f32.mrb[13].mxu0 }
  0xf7   :  { %v9898_v50 = vpop.f32.mrb[13].mxu1  ;;  %v3055_v52 = vpop.f32.mrb[14].mxu0  ;;  %5234 = vmatpush1.bf16.msra.mxu0 %v2544_v36  ;;  %v8560_v36 = vld [vmem:[%s11692_s0 + $0x830] ss:$784 sps:$4 sm:$0x1f]  }
  0xf8   :  { %v3096_v53 = vpop.f32.mrb[14].mxu1  ;;  %5275 = vmatpush1.bf16.msra.mxu1 %v2550_v37  ;;  %v3056_v55 = vpop.f32.mrb[15].mxu0  ;;  %5313 = vmatprep.subr.bf16.mxu0 %v8532_v35  ;;  %v8557_v35 = vld [vmem:[%s11692_s0 + $0x218] ss:$784 sps:$4 sm:$0xff]   ;;  %v2583_v52 = vand.u32 %v8562_v29, %v8791_v7 }
  0xf9   :  { %v3097_v56 = vpop.f32.mrb[15].mxu1  ;;  %5354 = vmatprep.subr.bf16.mxu1 %v8535_v38  ;;  %v2589_v53 = vand.u32 %v8565_v30, %v8791_v7  ;;  %v8571_v55 = vld [vmem:[%s11692_s0 + $0x22c] ss:$784 sps:$4 sm:$0xff]  }
  0xfa   :  { %8067 = vmatmul.mubr.msk.bf16.vlgmr.msra.gmra.mrb[120].mxu0 %vm2175_vm2, %v9864_v34  ;;  %v2580_v56 = vand.u32 %v8560_v36, %v8791_v7  ;;  %v8589_v29 = vld [vmem:[%s11692_s0 + $0x85c] ss:$784 sps:$4 sm:$0x1f]   ;;  %v8581_v36 = vld [vmem:[%s11692_s0 + $0x238] ss:$784 sps:$4 sm:$0xff]  }
  0xfb   :  { %8068 = vmatmul.mubr.msk.bf16.vlgmr.msra.gmra.mrb[120].mxu1 %vm2175_vm2, %v9864_v34  ;;  %5314 = vmatpush1.bf16.msra.mxu0 %v8530_v45 }
  0xfc   :  { %5355 = vmatpush1.bf16.msra.mxu1 %v8533_v54  ;;  %5315 = vmatprep.subr.bf16.mxu0 %v2559_v57  ;;  %v8568_v54 = vld [vmem:[%s11692_s0 + $0x224] ss:$784 sps:$4 sm:$0xff]   ;;  %v2586_v57 = vand.u32 %v8563_v39, %v8791_v7  ;;  %v8584_v39 = vld [vmem:[%s11692_s0 + $0x850] ss:$784 sps:$4 sm:$0x1f]  }
  0xfd   :  { %5356 = vmatprep.subr.bf16.mxu1 %v2565_v58  ;;  %v9926_v5 = vpop.f32.mrb[16].mxu0  ;;  %5345 = vmatprep.mubr.bf16.mxu0 %v11697_v3  ;;  %v8574_v58 = vld [vmem:[%s11692_s0 + $0x844] ss:$784 sps:$4 sm:$0x1f]  }
  0xfe   :  { %v9928_v6 = vpop.f32.mrb[16].mxu1  ;;  %5386 = vmatprep.mubr.bf16.mxu1 %v11697_v3  ;;  %v9938_v10 = vpop.f32.mrb[17].mxu0 }
  0xff   :  { %v9940_v11 = vpop.f32.mrb[17].mxu1  ;;  %v3137_v14 = vpop.f32.mrb[18].mxu0  ;;  %5316 = vmatpush1.bf16.msra.mxu0 %v2556_v59  ;;  %v8577_v59 = vld [vmem:[%s11692_s0 + $0x84c] ss:$784 sps:$4 sm:$0x1f]  }
 0x100   :  { %v3178_v15 = vpop.f32.mrb[18].mxu1  ;;  %5357 = vmatpush1.bf16.msra.mxu1 %v2562_v60  ;;  %v3138_v18 = vpop.f32.mrb[19].mxu0  ;;  %5395 = vmatprep.subr.bf16.mxu0 %v8544_v61 }
 0x101   :  { %v3179_v19 = vpop.f32.mrb[19].mxu1  ;;  %5436 = vmatprep.subr.bf16.mxu1 %v8547_v1  ;;  %v8569_v1 = vld [vmem:[%s11692_s0 + $0x228] ss:$784 sps:$4 sm:$0xff]  }
 0x102   :  { %8069 = vmatmul.mubr.msk.bf16.vlgmr.msra.gmra.mrb[124].mxu0 %vm2175_vm2, %v9864_v34  ;;  %v8575_v15 = vld [vmem:[%s11692_s0 + $0x848] ss:$784 sps:$4 sm:$0x1f]   ;;  %v2595_v19 = vand.u32 %v8574_v58, %v8791_v7 }
 0x103   :  { %8070 = vmatmul.mubr.msk.bf16.vlgmr.msra.gmra.mrb[124].mxu1 %vm2175_vm2, %v9864_v34  ;;  %5396 = vmatpush1.bf16.msra.mxu0 %v8542_v8 }
 0x104   :  { %5437 = vmatpush1.bf16.msra.mxu1 %v8545_v13  ;;  %5397 = vmatprep.subr.bf16.mxu0 %v2571_v12  ;;  %v2601_v12 = vand.u32 %v8577_v59, %v8791_v7  ;;  %v8592_v59 = vld [vmem:[%s11692_s0 + $0x244] ss:$784 sps:$4 sm:$0xff]  }
 0x105   :  { %5438 = vmatprep.subr.bf16.mxu1 %v2577_v22  ;;  %v9968_v31 = vpop.f32.mrb[20].mxu0  ;;  %5427 = vmatprep.mubr.bf16.mxu0 %v11697_v3  ;;  %v8580_v22 = vld [vmem:[%s11692_s0 + $0x234] ss:$784 sps:$4 sm:$0xff]  }
 0x106   :  { %v9970_v32 = vpop.f32.mrb[20].mxu1  ;;  %5468 = vmatprep.mubr.bf16.mxu1 %v11697_v3  ;;  %v9983_v37 = vpop.f32.mrb[21].mxu0 }
 0x107   :  { %v9985_v38 = vpop.f32.mrb[21].mxu1  ;;  %v3219_v40 = vpop.f32.mrb[22].mxu0  ;;  %5398 = vmatpush1.bf16.msra.mxu0 %v2568_v24  ;;  %v2598_v24 = vand.u32 %v8575_v15, %v8791_v7  ;;  %v8590_v15 = vld [vmem:[%s11692_s0 + $0x240] ss:$784 sps:$4 sm:$0xff]  }
 0x108   :  { %v3260_v45 = vpop.f32.mrb[22].mxu1  ;;  %5439 = vmatpush1.bf16.msra.mxu1 %v2574_v27  ;;  %v3220_v46 = vpop.f32.mrb[23].mxu0  ;;  %5477 = vmatprep.subr.bf16.mxu0 %v8556_v23  ;;  %v2592_v23 = vand.u32 %v8572_v9, %v8791_v7  ;;  %v8586_v27 = vld [vmem:[%s11692_s0 + $0x854] ss:$784 sps:$4 sm:$0x1f]  }
 0x109   :  { %v3261_v51 = vpop.f32.mrb[23].mxu1  ;;  %5518 = vmatprep.subr.bf16.mxu1 %v8559_v28  ;;  %v8583_v28 = vld [vmem:[%s11692_s0 + $0x23c] ss:$784 sps:$4 sm:$0xff]   ;;  %v8587_v46 = vld [vmem:[%s11692_s0 + $0x858] ss:$784 sps:$4 sm:$0x1f]  }
 0x10a   :  { %8071 = vmatmul.mubr.msk.bf16.vlgmr.msra.gmra.mrb[128].mxu0 %vm2175_vm2, %v9864_v34  ;;  %v2610_v58 = vand.u32 %v8587_v46, %v8791_v7  ;;  %v8601_v9 = vld [vmem:[%s11692_s0 + $0x86c] ss:$784 sps:$4 sm:$0x1f]   ;;  %v8604_v46 = vld [vmem:[%s11692_s0 + $0x254] ss:$784 sps:$4 sm:$0xff]  }
 0x10b   :  { %8072 = vmatmul.mubr.msk.bf16.vlgmr.msra.gmra.mrb[128].mxu1 %vm2175_vm2, %v9864_v34  ;;  %5478 = vmatpush1.bf16.msra.mxu0 %v8554_v33 }
 0x10c   :  { %5519 = vmatpush1.bf16.msra.mxu1 %v8557_v35  ;;  %5479 = vmatprep.subr.bf16.mxu0 %v2583_v52  ;;  %v8578_v35 = vld [vmem:[%s11692_s0 + $0x230] ss:$784 sps:$4 sm:$0xff]  }
 0x10d   :  { %5520 = vmatprep.subr.bf16.mxu1 %v2589_v53  ;;  %v10010_v60 = vpop.f32.mrb[24].mxu0  ;;  %5509 = vmatprep.mubr.bf16.mxu0 %v11697_v3 }
 0x10e   :  { %v10012_v61 = vpop.f32.mrb[24].mxu1  ;;  %5550 = vmatprep.mubr.bf16.mxu1 %v11697_v3  ;;  %v10022_v16 = vpop.f32.mrb[25].mxu0 }
 0x10f   :  { %v10024_v8 = vpop.f32.mrb[25].mxu1  ;;  %v3301_v13 = vpop.f32.mrb[26].mxu0  ;;  %5480 = vmatpush1.bf16.msra.mxu0 %v2580_v56  ;;  %v2613_v56 = vand.u32 %v8589_v29, %v8791_v7 }
 0x110   :  { %v3342_v14 = vpop.f32.mrb[26].mxu1  ;;  %5521 = vmatpush1.bf16.msra.mxu1 %v2586_v57  ;;  %v3302_v17 = vpop.f32.mrb[27].mxu0  ;;  %5559 = vmatprep.subr.bf16.mxu0 %v8568_v54  ;;  %v2604_v57 = vand.u32 %v8584_v39, %v8791_v7 }
 0x111   :  { %v3343_v18 = vpop.f32.mrb[27].mxu1  ;;  %5600 = vmatprep.subr.bf16.mxu1 %v8571_v55  ;;  %v2607_v55 = vand.u32 %v8586_v27, %v8791_v7  ;;  %v8593_v17 = vld [vmem:[%s11692_s0 + $0x248] ss:$784 sps:$4 sm:$0xff]  }
 0x112   :  { %8073 = vmatmul.mubr.msk.bf16.vlgmr.msra.gmra.mrb[132].mxu0 %vm2175_vm2, %v9864_v34 }
 0x113   :  { %8074 = vmatmul.mubr.msk.bf16.vlgmr.msra.gmra.mrb[132].mxu1 %vm2175_vm2, %v9864_v34  ;;  %5560 = vmatpush1.bf16.msra.mxu0 %v8566_v0  ;;  %v8595_v0 = vld [vmem:[%s11692_s0 + $0x24c] ss:$784 sps:$4 sm:$0xff]  }
 0x114   :  { %5601 = vmatpush1.bf16.msra.mxu1 %v8569_v1  ;;  %5561 = vmatprep.subr.bf16.mxu0 %v2595_v19  ;;  %v8598_v1 = vld [vmem:[%s11692_s0 + $0x864] ss:$784 sps:$4 sm:$0x1f]  }
 0x115   :  { %5602 = vmatprep.subr.bf16.mxu1 %v2601_v12  ;;  %v10052_v30 = vpop.f32.mrb[28].mxu0  ;;  %5591 = vmatprep.mubr.bf16.mxu0 %v11697_v3  ;;  %v8596_v12 = vld [vmem:[%s11692_s0 + $0x860] ss:$784 sps:$4 sm:$0x1f]   ;;  %v2619_v29 = vand.u32 %v8598_v1, %v8791_v7 }
 0x116   :  { %v10054_v33 = vpop.f32.mrb[28].mxu1  ;;  %5632 = vmatprep.mubr.bf16.mxu1 %v11697_v3  ;;  %v10067_v40 = vpop.f32.mrb[29].mxu0 }
 0x117   :  { %v10069_v45 = vpop.f32.mrb[29].mxu1  ;;  %v3383_v51 = vpop.f32.mrb[30].mxu0  ;;  %5562 = vmatpush1.bf16.msra.mxu0 %v2592_v23 }
 0x118   :  { %v3424_v52 = vpop.f32.mrb[30].mxu1  ;;  %5603 = vmatpush1.bf16.msra.mxu1 %v2598_v24  ;;  %v3384_v53 = vpop.f32.mrb[31].mxu0  ;;  %5641 = vmatprep.subr.bf16.mxu0 %v8580_v22  ;;  %v8599_v24 = vld [vmem:[%s11692_s0 + $0x868] ss:$784 sps:$4 sm:$0x1f]  }
 0x119   :  { %v3425_v54 = vpop.f32.mrb[31].mxu1  ;;  %5682 = vmatprep.subr.bf16.mxu1 %v8583_v28  ;;  %v2622_v39 = vand.u32 %v8599_v24, %v8791_v7  ;;  %v8607_v51 = vld [vmem:[%s11692_s0 + $0x25c] ss:$784 sps:$4 sm:$0xff]   ;;  %v8610_v52 = vld [vmem:[%s11692_s0 + $0x874] ss:$784 sps:$4 sm:$0x1f]  }
 0x11a   :  { %8075 = vmatmul.mubr.msk.bf16.vlgmr.msra.gmra.mrb[136].mxu0 %vm2175_vm2, %v9864_v34  ;;  %v8613_v53 = vld [vmem:[%s11692_s0 + $0x87c] ss:$784 sps:$4 sm:$0x1f]  }
 0x11b   :  { %8076 = vmatmul.mubr.msk.bf16.vlgmr.msra.gmra.mrb[136].mxu1 %vm2175_vm2, %v9864_v34  ;;  %5642 = vmatpush1.bf16.msra.mxu0 %v8578_v35  ;;  %v2625_v35 = vand.u32 %v8601_v9, %v8791_v7 }
 0x11c   :  { %5683 = vmatpush1.bf16.msra.mxu1 %v8581_v36  ;;  %5643 = vmatprep.subr.bf16.mxu0 %v2607_v55  ;;  %v2616_v36 = vand.u32 %v8596_v12, %v8791_v7 }
 0x11d   :  { %5684 = vmatprep.subr.bf16.mxu1 %v2613_v56  ;;  %v10094_v13 = vpop.f32.mrb[32].mxu0  ;;  %5673 = vmatprep.mubr.bf16.mxu0 %v11697_v3  ;;  %v8602_v56 = vld [vmem:[%s11692_s0 + $0x250] ss:$784 sps:$4 sm:$0xff]  }
 0x11e   :  { %v10096_v14 = vpop.f32.mrb[32].mxu1  ;;  %5714 = vmatprep.mubr.bf16.mxu1 %v11697_v3  ;;  %v10106_v18 = vpop.f32.mrb[33].mxu0 }
 0x11f   :  { %v10108_v19 = vpop.f32.mrb[33].mxu1  ;;  %v3465_v22 = vpop.f32.mrb[34].mxu0  ;;  %5644 = vmatpush1.bf16.msra.mxu0 %v2604_v57  ;;  %v8605_v57 = vld [vmem:[%s11692_s0 + $0x258] ss:$784 sps:$4 sm:$0xff]  }
 0x120   :  { %v3506_v23 = vpop.f32.mrb[34].mxu1  ;;  %5685 = vmatpush1.bf16.msra.mxu1 %v2610_v58  ;;  %v3466_v27 = vpop.f32.mrb[35].mxu0  ;;  %5723 = vmatprep.subr.bf16.mxu0 %v8592_v59  ;;  %v2631_v22 = vand.u32 %v8610_v52, %v8791_v7  ;;  %v8617_v52 = vld [vmem:[%s11692_s0 + $0x268] ss:$784 sps:$4 sm:$0xff]  }
 0x121   :  { %v3507_v28 = vpop.f32.mrb[35].mxu1  ;;  %5764 = vmatprep.subr.bf16.mxu1 %v8595_v0  ;;  %v8608_v0 = vld [vmem:[%s11692_s0 + $0x870] ss:$784 sps:$4 sm:$0x1f]   ;;  %v2637_v23 = vand.u32 %v8613_v53, %v8791_v7 }
 0x122   :  { %8077 = vmatmul.mubr.msk.bf16.vlgmr.msra.gmra.mrb[140].mxu0 %vm2175_vm2, %v9864_v34  ;;  %v2628_v24 = vand.u32 %v8608_v0, %v8791_v7  ;;  %v8616_v28 = vld [vmem:[%s11692_s0 + $0x264] ss:$784 sps:$4 sm:$0xff]  }
 0x123   :  { %8078 = vmatmul.mubr.msk.bf16.vlgmr.msra.gmra.mrb[140].mxu1 %vm2175_vm2, %v9864_v34  ;;  %5724 = vmatpush1.bf16.msra.mxu0 %v8590_v15  ;;  %v8611_v15 = vld [vmem:[%s11692_s0 + $0x878] ss:$784 sps:$4 sm:$0x1f]  }
 0x124   :  { %5765 = vmatpush1.bf16.msra.mxu1 %v8593_v17  ;;  %5725 = vmatprep.subr.bf16.mxu0 %v2619_v29  ;;  %v2634_v27 = vand.u32 %v8611_v15, %v8791_v7  ;;  %v8619_v29 = vld [vmem:[%s11692_s0 + $0x26c] ss:$784 sps:$4 sm:$0xff]  }
 0x125   :  { %5766 = vmatprep.subr.bf16.mxu1 %v2625_v35  ;;  %v10136_v54 = vpop.f32.mrb[36].mxu0  ;;  %5755 = vmatprep.mubr.bf16.mxu0 %v11697_v3  ;;  %v8622_v35 = vld [vmem:[%s11692_s0 + $0x884] ss:$784 sps:$4 sm:$0x1f]  }
 0x126   :  { %v10138_v55 = vpop.f32.mrb[36].mxu1  ;;  %5796 = vmatprep.mubr.bf16.mxu1 %v11697_v3  ;;  %v10148_v58 = vpop.f32.mrb[37].mxu0 }
 0x127   :  { %11776 = vst [vmem:[#allocation2_spill] sm:$0xff] %v10138_v55  ;;  %v10150_v59 = vpop.f32.mrb[37].mxu1  ;;  %v3547_v1 = vpop.f32.mrb[38].mxu0  ;;  %5726 = vmatpush1.bf16.msra.mxu0 %v2616_v36  ;;  %v8625_v36 = vld [vmem:[%s11692_s0 + $0x88c] ss:$784 sps:$4 sm:$0x1f]  }
 0x128   :  { %11777 = vst [vmem:[#allocation3_spill] sm:$0xff] %v10150_v59  ;;  %v3588_v9 = vpop.f32.mrb[38].mxu1  ;;  %5767 = vmatpush1.bf16.msra.mxu1 %v2622_v39  ;;  %v3548_v17 = vpop.f32.mrb[39].mxu0  ;;  %5805 = vmatprep.subr.bf16.mxu0 %v8604_v46 }
 0x129   :  { %v3589_v12 = vpop.f32.mrb[39].mxu1  ;;  %5846 = vmatprep.subr.bf16.mxu1 %v8607_v51  ;;  %v8614_v51 = vld [vmem:[%s11692_s0 + $0x260] ss:$784 sps:$4 sm:$0xff]   ;;  %v8623_v9 = vld [vmem:[%s11692_s0 + $0x888] ss:$784 sps:$4 sm:$0x1f]  }
 0x12a   :  { %8079 = vmatmul.mubr.msk.bf16.vlgmr.msra.gmra.mrb[144].mxu0 %vm2175_vm2, %v9864_v34  ;;  %v2643_v12 = vand.u32 %v8622_v35, %v8791_v7  ;;  %v8634_v35 = vld [vmem:[%s11692_s0 + $0x894] ss:$784 sps:$4 sm:$0x1f]  }
 0x12b   :  { %8080 = vmatmul.mubr.msk.bf16.vlgmr.msra.gmra.mrb[144].mxu1 %vm2175_vm2, %v9864_v34  ;;  %5806 = vmatpush1.bf16.msra.mxu0 %v8602_v56 }
 0x12c   :  { %5847 = vmatpush1.bf16.msra.mxu1 %v8605_v57  ;;  %5807 = vmatprep.subr.bf16.mxu0 %v2631_v22  ;;  %v8620_v57 = vld [vmem:[%s11692_s0 + $0x880] ss:$784 sps:$4 sm:$0x1f]   ;;  %v2649_v22 = vand.u32 %v8625_v36, %v8791_v7  ;;  %v8637_v36 = vld [vmem:[%s11692_s0 + $0x89c] ss:$784 sps:$4 sm:$0x1f]  }
 0x12d   :  { %5848 = vmatprep.subr.bf16.mxu1 %v2637_v23  ;;  %v10178_v39 = vpop.f32.mrb[40].mxu0  ;;  %5837 = vmatprep.mubr.bf16.mxu0 %v11697_v3  ;;  %v2640_v23 = vand.u32 %v8620_v57, %v8791_v7  ;;  %v8626_v57 = vld [vmem:[%s11692_s0 + $0x270] ss:$784 sps:$4 sm:$0xff]  }
 0x12e   :  { %11778 = vst [vmem:[#allocation4_spill] sm:$0xff] %v10178_v39  ;;  %v10180_v46 = vpop.f32.mrb[40].mxu1  ;;  %5878 = vmatprep.mubr.bf16.mxu1 %v11697_v3  ;;  %v10190_v53 = vpop.f32.mrb[41].mxu0 }
 0x12f   :  { %11779 = vst [vmem:[#allocation5_spill] sm:$0xff] %v10180_v46  ;;  %11780 = vst [vmem:[#allocation6_spill] sm:$0xff] %v10190_v53  ;;  %v10192_v56 = vpop.f32.mrb[41].mxu1  ;;  %v3629_v0 = vpop.f32.mrb[42].mxu0  ;;  %5808 = vmatpush1.bf16.msra.mxu0 %v2628_v24  ;;  %v2646_v24 = vand.u32 %v8623_v9, %v8791_v7 }
 0x130   :  { %11781 = vst [vmem:[#allocation7_spill] sm:$0xff] %v10192_v56  ;;  %v3670_v1 = vpop.f32.mrb[42].mxu1  ;;  %5849 = vmatpush1.bf16.msra.mxu1 %v2634_v27  ;;  %v3630_v15 = vpop.f32.mrb[43].mxu0  ;;  %5887 = vmatprep.subr.bf16.mxu0 %v8616_v28  ;;  %v8628_v27 = vld [vmem:[%s11692_s0 + $0x274] ss:$784 sps:$4 sm:$0xff]  }
 0x131   :  { %v3671_v17 = vpop.f32.mrb[43].mxu1  ;;  %5928 = vmatprep.subr.bf16.mxu1 %v8619_v29  ;;  %v8631_v28 = vld [vmem:[%s11692_s0 + $0x27c] ss:$784 sps:$4 sm:$0xff]   ;;  %v10214_v29 = vpop.permute.xlu0 %6792  ;;  %v8629_v0 = vld [vmem:[%s11692_s0 + $0x278] ss:$784 sps:$4 sm:$0xff]  }
 0x132   :  { %8081 = vmatmul.mubr.msk.bf16.vlgmr.msra.gmra.mrb[148].mxu0 %vm2175_vm2, %v9864_v34  ;;  %v8632_v15 = vld [vmem:[%s11692_s0 + $0x890] ss:$784 sps:$4 sm:$0x1f]  }
 0x133   :  { %8082 = vmatmul.mubr.msk.bf16.vlgmr.msra.gmra.mrb[148].mxu1 %vm2175_vm2, %v9864_v34  ;;  %5888 = vmatpush1.bf16.msra.mxu0 %v8614_v51  ;;  %v8644_v56 = vld [vmem:[%s11692_s0 + $0x8a0] ss:$784 sps:$4 sm:$0x1f]  }
 0x134   :  { %5929 = vmatpush1.bf16.msra.mxu1 %v8617_v52  ;;  %5889 = vmatprep.subr.bf16.mxu0 %v2643_v12 }
 0x135   :  { %5930 = vmatprep.subr.bf16.mxu1 %v2649_v22  ;;  %v10222_v51 = vpop.f32.mrb[44].mxu0  ;;  %5919 = vmatprep.mubr.bf16.mxu0 %v11697_v3  ;;  %v8635_v22 = vld [vmem:[%s11692_s0 + $0x898] ss:$784 sps:$4 sm:$0x1f]  }
 0x136   :  { %11782 = vst [vmem:[#allocation8_spill] sm:$0xff] %v10222_v51  ;;  %v10224_v52 = vpop.f32.mrb[44].mxu1  ;;  %5960 = vmatprep.mubr.bf16.mxu1 %v11697_v3  ;;  %v10234_v1 = vpop.f32.mrb[45].mxu0  ;;  %v2655_v51 = vand.u32 %v8634_v35, %v8791_v7 }
 0x137   :  { %11783 = vst [vmem:[#allocation9_spill] sm:$0xff] %v10224_v52  ;;  %11784 = vst [vmem:[#allocation10_spill] sm:$0xff] %v10234_v1  ;;  %v10236_v9 = vpop.f32.mrb[45].mxu1  ;;  %v3711_v17 = vpop.f32.mrb[46].mxu0  ;;  %5890 = vmatpush1.bf16.msra.mxu0 %v2640_v23  ;;  %v6795_v1 = vmul.f32 %v10214_v29, %v9753_v42  ;;  %v2658_v42 = vand.u32 %v8635_v22, %v8791_v7 }
 0x138   :  { %11785 = vst [vmem:[#allocation11_spill] sm:$0xff] %v10236_v9  ;;  %v3752_v12 = vpop.f32.mrb[46].mxu1  ;;  %5931 = vmatpush1.bf16.msra.mxu1 %v2646_v24  ;;  %v3712_v3 = vpop.f32.mrb[47].mxu0  ;;  %5969 = vmatprep.subr.bf16.mxu0 %v8628_v27  ;;  %v2661_v9 = vand.u32 %v8637_v36, %v8791_v7  ;;  %v6797_v17 = vmul.f32 %v10214_v29, %v9755_v43  ;;  %v8640_v43 = vld [vmem:[%s11692_s0 + $0x284] ss:$784 sps:$4 sm:$0xff]  }
 0x139   :  { %v3753_v52 = vpop.f32.mrb[47].mxu1  ;;  %6010 = vmatprep.subr.bf16.mxu1 %v8631_v28  ;;  %v6796_v3 = vmul.f32 %v10214_v29, %v9768_v47  ;;  %v10256_v23 = vpop.permute.xlu0 %6994  ;;  %v2652_v24 = vand.u32 %v8632_v15, %v8791_v7  ;;  %v8643_v27 = vld [vmem:[%s11692_s0 + $0x28c] ss:$784 sps:$4 sm:$0xff]   ;;  %v8646_v47 = vld [vmem:[%s11692_s0 + $0x8a4] ss:$784 sps:$4 sm:$0x1f]  }
 0x13a   :  { %8083 = vmatmul.mubr.msk.bf16.vlgmr.msra.gmra.mrb[152].mxu0 %vm2175_vm2, %v9864_v34  ;;  %v8649_v28 = vld [vmem:[%s11692_s0 + $0x8ac] ss:$784 sps:$4 sm:$0x1f]   ;;  %v11787_v52 = vmov 0   ;;  %v10286_v12 = vadd.f32 %v10256_v23, %v6795_v1 }
 0x13b   :  { %8084 = vmatmul.mubr.msk.bf16.vlgmr.msra.gmra.mrb[152].mxu1 %vm2175_vm2, %v9864_v34  ;;  %5970 = vmatpush1.bf16.msra.mxu0 %v8626_v57  ;;  %v8641_v57 = vld [vmem:[%s11692_s0 + $0x288] ss:$784 sps:$4 sm:$0xff]   ;;  %v10295_v46 = vadd.f32 %v10256_v23, %v6796_v3  ;;  %v2667_v3 = vand.u32 %v8646_v47, %v8791_v7  ;;  %v8655_v47 = vld [vmem:[%s11692_s0 + $0x29c] ss:$784 sps:$4 sm:$0xff]  }
 0x13c   :  { %6011 = vmatpush1.bf16.msra.mxu1 %v8629_v0  ;;  %5971 = vmatprep.subr.bf16.mxu0 %v2655_v51  ;;  %v8638_v51 = vld [vmem:[%s11692_s0 + $0x280] ss:$784 sps:$4 sm:$0xff]   ;;  %v6798_v0 = vmul.f32 %v10214_v29, %v9770_v48  ;;  %v8647_v1 = vld [vmem:[%s11692_s0 + $0x8a8] ss:$784 sps:$4 sm:$0x1f]  }
 0x13d   :  { %6012 = vmatprep.subr.bf16.mxu1 %v2661_v9  ;;  %v10272_v35 = vpop.f32.mrb[48].mxu0  ;;  %6001 = vmatprep.mubr.bf16.mxu0 %v11787_v52  ;;  %11789 = vst [vmem:[#allocation14_spill] sm:$0xff] %v10295_v46 }
 0x13e   :  { %11786 = vst [vmem:[#allocation12_spill] sm:$0xff] %v10272_v35  ;;  %v3830_v36 = vpop.f32.mrb[48].mxu1  ;;  %6042 = vmatprep.mubr.bf16.mxu1 %v11787_v52  ;;  %v3791_v15 = vpop.f32.mrb[49].mxu0  ;;  %v10289_v35 = vadd.f32 %v10256_v23, %v6797_v17 }
 0x13f   :  { %v6845_v9 = vmul.f32 %v10214_v29, %v3830_v36  ;;  %v3832_v22 = vpop.f32.mrb[49].mxu1  ;;  %v6844_v39 = vmul.f32 %v10214_v29, %v3791_v15  ;;  %v3793_v36 = vpop.f32.mrb[50].mxu0  ;;  %5972 = vmatpush1.bf16.msra.mxu0 %v2652_v24  ;;  %v2673_v15 = vand.u32 %v8649_v28, %v8791_v7  ;;  %v6801_v24 = vmul.f32 %v10214_v29, %v9797_v63  ;;  %v8661_v28 = vld [vmem:[%s11692_s0 + $0x8bc] ss:$784 sps:$4 sm:$0x1f]  }
 0x140   :  { %11788 = vst [vmem:[#allocation13_spill] sm:$0xff] %v10289_v35  ;;  %v6846_v48 = vmul.f32 %v10214_v29, %v3832_v22  ;;  %v3834_v53 = vpop.f32.mrb[50].mxu1  ;;  %6013 = vmatpush1.bf16.msra.mxu1 %v2658_v42  ;;  %v3794_v59 = vpop.f32.mrb[51].mxu0  ;;  %6051 = vmatprep.subr.bf16.mxu0 %v8640_v43  ;;  %v8652_v43 = vld [vmem:[%s11692_s0 + $0x294] ss:$784 sps:$4 sm:$0xff]  }
 0x141   :  { %v10303_v17 = vadd.f32 %v10256_v23, %v6845_v9  ;;  %v3835_v55 = vpop.f32.mrb[51].mxu1  ;;  %6092 = vmatprep.subr.bf16.mxu1 %v8643_v27  ;;  %v6799_v53 = vmul.f32 %v10214_v29, %v9795_v62  ;;  %v10312_v42 = vadd.f32 %v10256_v23, %v6844_v39  ;;  %v2664_v62 = vand.u32 %v8644_v56, %v8791_v7  ;;  %v8658_v27 = vld [vmem:[%s11692_s0 + $0x8b4] ss:$784 sps:$4 sm:$0x1f]   ;;  %v8650_v39 = vld [vmem:[%s11692_s0 + $0x290] ss:$784 sps:$4 sm:$0xff]  }
 0x142   :  { %v10315_v9 = vadd.f32 %v10256_v23, %v6846_v48  ;;  %v6800_v55 = vmul.f32 %v10214_v29, %v9807_v2  ;;  %8085 = vmatmul.mubr.msk.bf16.vlgmr.msra.gmra.mrb[156].mxu0 %vm2175_vm2, %v9864_v34  ;;  %v2670_v2 = vand.u32 %v8647_v1, %v8791_v7  ;;  %v10338_v56 = vadd.f32 %v10256_v23, %v6798_v0  ;;  %v10359_v36 = vld [vmem:[%s11692_s0 + $0x8b0] ss:$784 sps:$4 sm:$0x1f]   ;;  %v8653_v59 = vld [vmem:[%s11692_s0 + $0x298] ss:$784 sps:$4 sm:$0xff]  }
 0x143   :  { %11790 = vst [vmem:[#allocation15_spill] sm:$0xff] %v10303_v17  ;;  %8086 = vmatmul.mubr.msk.bf16.vlgmr.msra.gmra.mrb[156].mxu1 %vm2175_vm2, %v9864_v34  ;;  %6052 = vmatpush1.bf16.msra.mxu0 %v8638_v51  ;;  %v10347_v51 = vadd.f32 %v10256_v23, %v6799_v53  ;;  %v6802_v0 = vmul.f32 %v10214_v29, %v9809_v4 }
 0x144   :  { %11791 = vst [vmem:[#allocation16_spill] sm:$0xff] %v10315_v9  ;;  %6093 = vmatpush1.bf16.msra.mxu1 %v8641_v57  ;;  %6053 = vmatprep.subr.bf16.mxu0 %v2667_v3  ;;  %v10350_v57 = vadd.f32 %v10256_v23, %v6801_v24  ;;  %v10362_v1 = vadd.f32 %v10256_v23, %v6800_v55 }
 0x145   :  { %6094 = vmatprep.subr.bf16.mxu1 %v2673_v15  ;;  %v3871_v22 = vpop.f32.mrb[52].mxu0  ;;  %6083 = vmatprep.mubr.bf16.mxu0 %v11787_v52  ;;  %v6803_v3 = vmul.f32 %v10214_v29, %v9837_v20 }
 0x146   :  { %11792 = vst [vmem:[#allocation17_spill] sm:$0xff] %v10350_v57  ;;  %v3912_v48 = vpop.f32.mrb[52].mxu1  ;;  %6124 = vmatprep.mubr.bf16.mxu1 %v11787_v52  ;;  %11793 = vst [vmem:[#allocation18_spill] sm:$0xff] %v10362_v1  ;;  %v6847_v15 = vmul.f32 %v10214_v29, %v3871_v22  ;;  %v3873_v53 = vpop.f32.mrb[53].mxu0  ;;  %v2679_v22 = vand.u32 %v8658_v27, %v8791_v7 }
 0x147   :  { %v6849_v4 = vmul.f32 %v10214_v29, %v3912_v48  ;;  %v3914_v24 = vpop.f32.mrb[53].mxu1  ;;  %v6848_v55 = vmul.f32 %v10214_v29, %v3873_v53  ;;  %v3875_v9 = vpop.f32.mrb[54].mxu0  ;;  %6054 = vmatpush1.bf16.msra.mxu0 %v2664_v62  ;;  %v8659_v48 = vld [vmem:[%s11692_s0 + $0x8b8] ss:$784 sps:$4 sm:$0x1f]   ;;  %v6805_v62 = vmul.f32 %v10214_v29, %v9839_v21 }
 0x148   :  { %v6850_v63 = vmul.f32 %v10214_v29, %v3914_v24  ;;  %v3916_v20 = vpop.f32.mrb[54].mxu1  ;;  %6095 = vmatpush1.bf16.msra.mxu1 %v2670_v2  ;;  %v10381_v35 = vadd.f32 %v10256_v23, %v6847_v15  ;;  %v3876_v46 = vpop.f32.mrb[55].mxu0  ;;  %6133 = vmatprep.subr.bf16.mxu0 %v8652_v43  ;;  %v2685_v9 = vand.u32 %v8661_v28, %v8791_v7  ;;  %v8670_v21 = vld [vmem:[%s11692_s0 + $0x8c4] ss:$784 sps:$4 sm:$0x1f]  }
 0x149   :  { %v10384_v17 = vadd.f32 %v10256_v23, %v6849_v4  ;;  %v3917_v53 = vpop.f32.mrb[55].mxu1  ;;  %6174 = vmatprep.subr.bf16.mxu1 %v8655_v47  ;;  %v10390_v2 = vadd.f32 %v10256_v23, %v6848_v55  ;;  %v2676_v15 = vand.u32 %v10359_v36, %v8791_v7  ;;  %v6804_v46 = vmul.f32 %v10214_v29, %v9852_v25  ;;  %v8664_v36 = vld [vmem:[%s11692_s0 + $0x2a4] ss:$784 sps:$4 sm:$0xff]   ;;  %v10421_v4 = vld [vmem:[%s11692_s0 + $0x8c0] ss:$784 sps:$4 sm:$0x1f]  }
 0x14a   :  { %v10393_v27 = vadd.f32 %v10256_v23, %v6850_v63  ;;  %8087 = vmatmul.mubr.msk.bf16.vlgmr.msra.gmra.mrb[160].mxu0 %vm2175_vm2, %v9864_v34  ;;  %v2682_v28 = vand.u32 %v8659_v48, %v8791_v7  ;;  %v10424_v24 = vadd.f32 %v10256_v23, %v6802_v0  ;;  %v10433_v55 = vadd.f32 %v10256_v23, %v6803_v3 }
 0x14b   :  { %11794 = vst [vmem:[#allocation19_spill] sm:$0xff] %v10384_v17  ;;  %8088 = vmatmul.mubr.msk.bf16.vlgmr.msra.gmra.mrb[160].mxu1 %vm2175_vm2, %v9864_v34  ;;  %6134 = vmatpush1.bf16.msra.mxu0 %v8650_v39  ;;  %v8673_v39 = vld [vmem:[%s11692_s0 + $0x8cc] ss:$784 sps:$4 sm:$0x1f]   ;;  %v10436_v20 = vadd.f32 %v10256_v23, %v6805_v62  ;;  %v6806_v0 = vmul.f32 %v10214_v29, %v9854_v26  ;;  %v8662_v62 = vld [vmem:[%s11692_s0 + $0x2a0] ss:$784 sps:$4 sm:$0xff]  }
 0x14c   :  { %11795 = vst [vmem:[#allocation20_spill] sm:$0xff] %v10393_v27  ;;  %6175 = vmatpush1.bf16.msra.mxu1 %v8653_v59  ;;  %6135 = vmatprep.subr.bf16.mxu0 %v2679_v22  ;;  %v8667_v59 = vld [vmem:[%s11692_s0 + $0x2ac] ss:$784 sps:$4 sm:$0xff]   ;;  %v10443_v53 = vadd.f32 %v10256_v23, %v6804_v46  ;;  %v8665_v26 = vld [vmem:[%s11692_s0 + $0x2a8] ss:$784 sps:$4 sm:$0xff]   ;;  %v2691_v63 = vand.u32 %v8670_v21, %v8791_v7 }
 0x14d   :  { %6176 = vmatprep.subr.bf16.mxu1 %v2685_v9  ;;  %11796 = vst [vmem:[#allocation21_spill] sm:$0xff] %v10436_v20  ;;  %v3953_v48 = vpop.f32.mrb[56].mxu0  ;;  %6165 = vmatprep.mubr.bf16.mxu0 %v11787_v52  ;;  %v2688_v57 = vand.u32 %v10421_v4, %v8791_v7 }
 0x14e   :  { %v3994_v22 = vpop.f32.mrb[56].mxu1  ;;  %6206 = vmatprep.mubr.bf16.mxu1 %v11787_v52  ;;  %v6851_v9 = vmul.f32 %v10214_v29, %v3953_v48  ;;  %v3955_v25 = vpop.f32.mrb[57].mxu0 }
 0x14f   :  { %v6853_v3 = vmul.f32 %v10214_v29, %v3994_v22  ;;  %v3996_v47 = vpop.f32.mrb[57].mxu1  ;;  %v6852_v43 = vmul.f32 %v10214_v29, %v3955_v25  ;;  %v3957_v27 = vpop.f32.mrb[58].mxu0  ;;  %6136 = vmatpush1.bf16.msra.mxu0 %v2676_v15  ;;  %v8671_v22 = vld [vmem:[%s11692_s0 + $0x8c8] ss:$784 sps:$4 sm:$0x1f]   ;;  %v6807_v15 = vmul.f32 %v10214_v29, %v9884_v41 }
 0x150   :  { %v6854_v46 = vmul.f32 %v10214_v29, %v3996_v47  ;;  %v3998_v48 = vpop.f32.mrb[58].mxu1  ;;  %6177 = vmatpush1.bf16.msra.mxu1 %v2682_v28  ;;  %v10462_v17 = vadd.f32 %v10256_v23, %v6851_v9  ;;  %v3958_v25 = vpop.f32.mrb[59].mxu0  ;;  %6215 = vmatprep.subr.bf16.mxu0 %v8664_v36  ;;  %v2697_v27 = vand.u32 %v8673_v39, %v8791_v7  ;;  %v8685_v39 = vld [vmem:[%s11692_s0 + $0x8dc] ss:$784 sps:$4 sm:$0x1f]  }
 0x151   :  { %v10465_v21 = vadd.f32 %v10256_v23, %v6853_v3  ;;  %v3999_v1 = vpop.f32.mrb[59].mxu1  ;;  %6256 = vmatprep.subr.bf16.mxu1 %v8667_v59  ;;  %v6809_v47 = vmul.f32 %v10214_v29, %v9886_v44  ;;  %v10473_v28 = vadd.f32 %v10256_v23, %v6852_v43  ;;  %v6808_v9 = vmul.f32 %v10214_v29, %v9896_v49  ;;  %v8676_v43 = vld [vmem:[%s11692_s0 + $0x2b4] ss:$784 sps:$4 sm:$0xff]   ;;  %v10518_v48 = vld [vmem:[%s11692_s0 + $0x8d0] ss:$784 sps:$4 sm:$0x1f]  }
 0x152   :  { %v10476_v4 = vadd.f32 %v10256_v23, %v6854_v46  ;;  %8089 = vmatmul.mubr.msk.bf16.vlgmr.msra.gmra.mrb[164].mxu0 %vm2175_vm2, %v9864_v34  ;;  %v2694_v49 = vand.u32 %v8671_v22, %v8791_v7  ;;  %v8682_v59 = vld [vmem:[%s11692_s0 + $0x8d4] ss:$784 sps:$4 sm:$0x1f]   ;;  %v10506_v3 = vadd.f32 %v10256_v23, %v6806_v0  ;;  %v8674_v44 = vld [vmem:[%s11692_s0 + $0x2b0] ss:$784 sps:$4 sm:$0xff]  }
 0x153   :  { %11797 = vst [vmem:[#allocation22_spill] sm:$0xff] %v10465_v21  ;;  %8090 = vmatmul.mubr.msk.bf16.vlgmr.msra.gmra.mrb[164].mxu1 %vm2175_vm2, %v9864_v34  ;;  %6216 = vmatpush1.bf16.msra.mxu0 %v8662_v62  ;;  %v8679_v34 = vld [vmem:[%s11692_s0 + $0x2bc] ss:$784 sps:$4 sm:$0xff]   ;;  %v10509_v62 = vadd.f32 %v10256_v23, %v6807_v15  ;;  %v10521_v0 = vadd.f32 %v10256_v23, %v6809_v47  ;;  %v8677_v36 = vld [vmem:[%s11692_s0 + $0x2b8] ss:$784 sps:$4 sm:$0xff]  }
 0x154   :  { %11798 = vst [vmem:[#allocation23_spill] sm:$0xff] %v10476_v4  ;;  %6257 = vmatpush1.bf16.msra.mxu1 %v8665_v26  ;;  %6217 = vmatprep.subr.bf16.mxu0 %v2691_v63  ;;  %v6810_v26 = vmul.f32 %v10214_v29, %v9898_v50  ;;  %v10524_v22 = vadd.f32 %v10256_v23, %v6808_v9 }
 0x155   :  { %6258 = vmatprep.subr.bf16.mxu1 %v2697_v27  ;;  %v4035_v46 = vpop.f32.mrb[60].mxu0  ;;  %6247 = vmatprep.mubr.bf16.mxu0 %v11787_v52  ;;  %11799 = vst [vmem:[#allocation24_spill] sm:$0xff] %v10521_v0 }
 0x156   :  { %v4076_v63 = vpop.f32.mrb[60].mxu1  ;;  %6288 = vmatprep.mubr.bf16.mxu1 %v11787_v52  ;;  %v6855_v25 = vmul.f32 %v10214_v29, %v4035_v46  ;;  %v4037_v27 = vpop.f32.mrb[61].mxu0  ;;  %v2703_v46 = vand.u32 %v8682_v59, %v8791_v7 }
 0x157   :  { %v6857_v50 = vmul.f32 %v10214_v29, %v4076_v63  ;;  %v4078_v15 = vpop.f32.mrb[61].mxu1  ;;  %v6856_v47 = vmul.f32 %v10214_v29, %v4037_v27  ;;  %v4039_v9 = vpop.f32.mrb[62].mxu0  ;;  %6218 = vmatpush1.bf16.msra.mxu0 %v2688_v57  ;;  %v8683_v63 = vld [vmem:[%s11692_s0 + $0x8d8] ss:$784 sps:$4 sm:$0x1f]   ;;  %v6811_v57 = vmul.f32 %v10214_v29, %v9926_v5 }
 0x158   :  { %v6858_v41 = vmul.f32 %v10214_v29, %v4078_v15  ;;  %v4080_v1 = vpop.f32.mrb[62].mxu1  ;;  %6259 = vmatpush1.bf16.msra.mxu1 %v2694_v49  ;;  %v10541_v4 = vadd.f32 %v10256_v23, %v6855_v25  ;;  %v4040_v21 = vpop.f32.mrb[63].mxu0  ;;  %6297 = vmatprep.subr.bf16.mxu0 %v8676_v43  ;;  %v2700_v25 = vand.u32 %v10518_v48, %v8791_v7  ;;  %v10566_v5 = vld [vmem:[%s11693_s1] sm:$0xf]  ;;  %v8688_v48 = vld [vmem:[%s11692_s0 + $0x2c4] ss:$784 sps:$4 sm:$0xff]  }
 0x159   :  { %v10544_v20 = vadd.f32 %v10256_v23, %v6857_v50  ;;  %v4081_v27 = vpop.f32.mrb[63].mxu1  ;;  %6338 = vmatprep.subr.bf16.mxu1 %v8679_v34  ;;  %v2709_v1 = vand.u32 %v8685_v39, %v8791_v7  ;;  %v10550_v49 = vadd.f32 %v10256_v23, %v6856_v47  ;;  %v6812_v21 = vmul.f32 %v10214_v29, %v9938_v10  ;;  %v8694_v50 = vld [vmem:[%s11692_s0 + $0x8e4] ss:$784 sps:$4 sm:$0x1f]   ;;  %v8691_v15 = vld [vmem:[%s11692_s0 + $0x2cc] ss:$784 sps:$4 sm:$0xff]  }
 0x15a   :  { %v10553_v59 = vadd.f32 %v10256_v23, %v6858_v41  ;;  %8091 = vmatmul.mubr.msk.bf16.vlgmr.msra.gmra.mrb[168].mxu0 %vm2175_vm2, %v10566_v5  ;;  %v2706_v39 = vand.u32 %v8683_v63, %v8791_v7  ;;  %v6813_v47 = vmul.f32 %v10214_v29, %v9928_v6  ;;  %v6814_v9 = vmul.f32 %v10214_v29, %v9940_v11  ;;  %v10601_v27 = vld [vmem:[%s11692_s0 + $0x8e0] ss:$784 sps:$4 sm:$0x1f]   ;;  %v8695_v10 = vld [vmem:[%s11692_s0 + $0x8e8] ss:$784 sps:$4 sm:$0x1f]  }
 0x15b   :  { %11800 = vst [vmem:[#allocation25_spill] sm:$0xff] %v10544_v20  ;;  %8092 = vmatmul.mubr.msk.bf16.vlgmr.msra.gmra.mrb[168].mxu1 %vm2175_vm2, %v10566_v5  ;;  %6298 = vmatpush1.bf16.msra.mxu0 %v8674_v44  ;;  %v10590_v44 = vadd.f32 %v10256_v23, %v6810_v26  ;;  %v10604_v26 = vadd.f32 %v10256_v23, %v6811_v57 }
 0x15c   :  { %11801 = vst [vmem:[#allocation26_spill] sm:$0xff] %v10553_v59  ;;  %6339 = vmatpush1.bf16.msra.mxu1 %v8677_v36  ;;  %6299 = vmatprep.subr.bf16.mxu0 %v2703_v46  ;;  %v8697_v36 = vld [vmem:[%s11692_s0 + $0x8ec] ss:$784 sps:$4 sm:$0x1f]  }
 0x15d   :  { %6340 = vmatprep.subr.bf16.mxu1 %v2709_v1  ;;  %v4117_v63 = vpop.f32.mrb[64].mxu0  ;;  %6329 = vmatprep.mubr.bf16.mxu0 %v11787_v52  ;;  %11802 = vst [vmem:[#allocation27_spill] sm:$0xff] %v10604_v26  ;;  %v10607_v1 = vadd.f32 %v10256_v23, %v6812_v21  ;;  %v8686_v21 = vld [vmem:[%s11692_s0 + $0x2c0] ss:$784 sps:$4 sm:$0xff]  }
 0x15e   :  { %v4158_v46 = vpop.f32.mrb[64].mxu1  ;;  %6370 = vmatprep.mubr.bf16.mxu1 %v11787_v52  ;;  %v6859_v6 = vmul.f32 %v10214_v29, %v4117_v63  ;;  %v4119_v41 = vpop.f32.mrb[65].mxu0  ;;  %v8689_v63 = vld [vmem:[%s11692_s0 + $0x2c8] ss:$784 sps:$4 sm:$0xff]  }
 0x15f   :  { %11803 = vst [vmem:[#allocation28_spill] sm:$0xff] %v10607_v1  ;;  %v6861_v11 = vmul.f32 %v10214_v29, %v4158_v46  ;;  %v4160_v34 = vpop.f32.mrb[65].mxu1  ;;  %v6860_v43 = vmul.f32 %v10214_v29, %v4119_v41  ;;  %v4121_v0 = vpop.f32.mrb[66].mxu0  ;;  %6300 = vmatpush1.bf16.msra.mxu0 %v2700_v25  ;;  %v2715_v46 = vand.u32 %v8694_v50, %v8791_v7 }
 0x160   :  { %v6862_v59 = vmul.f32 %v10214_v29, %v4160_v34  ;;  %v4162_v57 = vpop.f32.mrb[66].mxu1  ;;  %6341 = vmatpush1.bf16.msra.mxu1 %v2706_v39  ;;  %v10624_v20 = vadd.f32 %v10256_v23, %v6859_v6  ;;  %v4122_v0 = vpop.f32.mrb[67].mxu0  ;;  %6379 = vmatprep.subr.bf16.mxu0 %v8688_v48  ;;  %v2721_v25 = vand.u32 %v8697_v36, %v8791_v7 }
 0x161   :  { %v10627_v41 = vadd.f32 %v10256_v23, %v6861_v11  ;;  %v4163_v34 = vpop.f32.mrb[67].mxu1  ;;  %6420 = vmatprep.subr.bf16.mxu1 %v8691_v15  ;;  %v10631_v39 = vadd.f32 %v10256_v23, %v6813_v47  ;;  %v10634_v57 = vadd.f32 %v10256_v23, %v6860_v43  ;;  %v2712_v6 = vand.u32 %v10601_v27, %v8791_v7  ;;  %v8700_v27 = vld [vmem:[%s11692_s0 + $0x2d4] ss:$784 sps:$4 sm:$0xff]   ;;  %v8704_v11 = vld [vmem:[%s11692_s0 + $0x8f0] ss:$784 sps:$4 sm:$0x1f]  }
 0x162   :  { %v10637_v50 = vadd.f32 %v10256_v23, %v6862_v59  ;;  %8093 = vmatmul.mubr.msk.bf16.vlgmr.msra.gmra.mrb[172].mxu0 %vm2175_vm2, %v10566_v5  ;;  %v2718_v43 = vand.u32 %v8695_v10, %v8791_v7  ;;  %v8706_v59 = vld [vmem:[%s11692_s0 + $0x8f4] ss:$784 sps:$4 sm:$0x1f]   ;;  %v6816_v15 = vmul.f32 %v10214_v29, %v9983_v37  ;;  %v8703_v10 = vld [vmem:[%s11692_s0 + $0x2dc] ss:$784 sps:$4 sm:$0xff]   ;;  %v10669_v0 = vadd.f32 %v10256_v23, %v6814_v9 }
 0x163   :  { %11804 = vst [vmem:[#allocation29_spill] sm:$0xff] %v10627_v41  ;;  %11805 = vst [vmem:[#allocation30_spill] sm:$0xff] %v10631_v39  ;;  %8094 = vmatmul.mubr.msk.bf16.vlgmr.msra.gmra.mrb[172].mxu1 %vm2175_vm2, %v10566_v5  ;;  %6380 = vmatpush1.bf16.msra.mxu0 %v8686_v21  ;;  %v8709_v37 = vld [vmem:[%s11692_s0 + $0x8fc] ss:$784 sps:$4 sm:$0x1f]   ;;  %v6815_v21 = vmul.f32 %v10214_v29, %v9968_v31  ;;  %v6818_v31 = vmul.f32 %v10214_v29, %v9985_v38 }
 0x164   :  { %11806 = vst [vmem:[#allocation31_spill] sm:$0xff] %v10634_v57  ;;  %11807 = vst [vmem:[#allocation32_spill] sm:$0xff] %v10637_v50  ;;  %6421 = vmatpush1.bf16.msra.mxu1 %v8689_v63  ;;  %6381 = vmatprep.subr.bf16.mxu0 %v2715_v46  ;;  %v6817_v63 = vmul.f32 %v10214_v29, %v9970_v32  ;;  %v8701_v9 = vld [vmem:[%s11692_s0 + $0x2d8] ss:$784 sps:$4 sm:$0xff]   ;;  %v2727_v50 = vand.u32 %v8706_v59, %v8791_v7 }
 0x165   :  { %6422 = vmatprep.subr.bf16.mxu1 %v2721_v25  ;;  %v4199_v34 = vpop.f32.mrb[68].mxu0  ;;  %6411 = vmatprep.mubr.bf16.mxu0 %v11787_v52  ;;  %v8698_v25 = vld [vmem:[%s11692_s0 + $0x2d0] ss:$784 sps:$4 sm:$0xff]   ;;  %v10692_v39 = vadd.f32 %v10256_v23, %v6816_v15 }
 0x166   :  { %v4240_v46 = vpop.f32.mrb[68].mxu1  ;;  %6452 = vmatprep.mubr.bf16.mxu1 %v11787_v52  ;;  %v6863_v47 = vmul.f32 %v10214_v29, %v4199_v34  ;;  %v4201_v48 = vpop.f32.mrb[69].mxu0  ;;  %v8707_v34 = vld [vmem:[%s11692_s0 + $0x8f8] ss:$784 sps:$4 sm:$0x1f]  }
 0x167   :  { %v6865_v32 = vmul.f32 %v10214_v29, %v4240_v46  ;;  %v4242_v36 = vpop.f32.mrb[69].mxu1  ;;  %11808 = vst [vmem:[#allocation33_spill] sm:$0xff] %v10692_v39  ;;  %v6864_v41 = vmul.f32 %v10214_v29, %v4201_v48  ;;  %v4203_v38 = vpop.f32.mrb[70].mxu0  ;;  %6382 = vmatpush1.bf16.msra.mxu0 %v2712_v6  ;;  %v2733_v48 = vand.u32 %v8709_v37, %v8791_v7 }
 0x168   :  { %v6866_v1 = vmul.f32 %v10214_v29, %v4242_v36  ;;  %v4244_v57 = vpop.f32.mrb[70].mxu1  ;;  %6423 = vmatpush1.bf16.msra.mxu1 %v2718_v43  ;;  %v10700_v46 = vadd.f32 %v10256_v23, %v6863_v47  ;;  %v4204_v15 = vpop.f32.mrb[71].mxu0  ;;  %6461 = vmatprep.subr.bf16.mxu0 %v8700_v27  ;;  %v10710_v6 = vadd.f32 %v10256_v23, %v6817_v63  ;;  %v8712_v63 = vld [vmem:[%s11692_s0 + $0x2e4] ss:$784 sps:$4 sm:$0xff]  }
 0x169   :  { %v10703_v59 = vadd.f32 %v10256_v23, %v6865_v32  ;;  %v4245_v26 = vpop.f32.mrb[71].mxu1  ;;  %6502 = vmatprep.subr.bf16.mxu1 %v8703_v10  ;;  %v10707_v57 = vadd.f32 %v10256_v23, %v6815_v21  ;;  %v10713_v43 = vadd.f32 %v10256_v23, %v6864_v41  ;;  %v2724_v27 = vand.u32 %v8704_v11, %v8791_v7  ;;  %v8718_v41 = vld [vmem:[%s11692_s0 + $0x904] ss:$784 sps:$4 sm:$0x1f]  }
 0x16a   :  { %11810 = vst [vmem:[#allocation35_spill] sm:$0xff] %v10710_v6  ;;  %v10716_v36 = vadd.f32 %v10256_v23, %v6866_v1  ;;  %8095 = vmatmul.mubr.msk.bf16.vlgmr.msra.gmra.mrb[176].mxu0 %vm2175_vm2, %v10566_v5  ;;  %v2730_v37 = vand.u32 %v8707_v34, %v8791_v7  ;;  %v8721_v21 = vld [vmem:[%s11692_s0 + $0x90c] ss:$784 sps:$4 sm:$0x1f]   ;;  %v6820_v11 = vmul.f32 %v10214_v29, %v10022_v16  ;;  %v8710_v34 = vld [vmem:[%s11692_s0 + $0x2e0] ss:$784 sps:$4 sm:$0xff]  }
 0x16b   :  { %11809 = vst [vmem:[#allocation34_spill] sm:$0xff] %v10703_v59  ;;  %11811 = vst [vmem:[#allocation36_spill] sm:$0xff] %v10713_v43  ;;  %8096 = vmatmul.mubr.msk.bf16.vlgmr.msra.gmra.mrb[176].mxu1 %vm2175_vm2, %v10566_v5  ;;  %6462 = vmatpush1.bf16.msra.mxu0 %v8698_v25  ;;  %v8715_v25 = vld [vmem:[%s11692_s0 + $0x2ec] ss:$784 sps:$4 sm:$0xff]   ;;  %v6819_v32 = vmul.f32 %v10214_v29, %v10010_v60  ;;  %v6821_v38 = vmul.f32 %v10214_v29, %v10012_v61 }
 0x16c   :  { %11812 = vst [vmem:[#allocation37_spill] sm:$0xff] %v10716_v36  ;;  %6503 = vmatpush1.bf16.msra.mxu1 %v8701_v9  ;;  %6463 = vmatprep.subr.bf16.mxu0 %v2727_v50  ;;  %v10747_v9 = vadd.f32 %v10256_v23, %v6818_v31  ;;  %v8713_v31 = vld [vmem:[%s11692_s0 + $0x2e8] ss:$784 sps:$4 sm:$0xff]   ;;  %v6822_v60 = vmul.f32 %v10214_v29, %v10024_v8  ;;  %v8716_v26 = vld [vmem:[%s11692_s0 + $0x900] ss:$784 sps:$4 sm:$0x1f]  }
 0x16d   :  { %6504 = vmatprep.subr.bf16.mxu1 %v2733_v48  ;;  %v4281_v16 = vpop.f32.mrb[72].mxu0  ;;  %6493 = vmatprep.mubr.bf16.mxu0 %v11787_v52  ;;  %v2739_v1 = vand.u32 %v8718_v41, %v8791_v7  ;;  %v8719_v8 = vld [vmem:[%s11692_s0 + $0x908] ss:$784 sps:$4 sm:$0x1f]  }
 0x16e   :  { %11813 = vst [vmem:[#allocation38_spill] sm:$0xff] %v10747_v9  ;;  %v4322_v50 = vpop.f32.mrb[72].mxu1  ;;  %6534 = vmatprep.mubr.bf16.mxu1 %v11787_v52  ;;  %v6867_v15 = vmul.f32 %v10214_v29, %v4281_v16  ;;  %v4283_v48 = vpop.f32.mrb[73].mxu0  ;;  %v2745_v16 = vand.u32 %v8721_v21, %v8791_v7 }
 0x16f   :  { %v6869_v61 = vmul.f32 %v10214_v29, %v4322_v50  ;;  %v4324_v10 = vpop.f32.mrb[73].mxu1  ;;  %v6868_v47 = vmul.f32 %v10214_v29, %v4283_v48  ;;  %v4285_v6 = vpop.f32.mrb[74].mxu0  ;;  %6464 = vmatpush1.bf16.msra.mxu0 %v2724_v27  ;;  %v10776_v50 = vadd.f32 %v10256_v23, %v6820_v11  ;;  %v10788_v27 = vadd.f32 %v10256_v23, %v6821_v38  ;;  %v8724_v48 = vld [vmem:[%s11692_s0 + $0x2f4] ss:$784 sps:$4 sm:$0xff]  }
 0x170   :  { %v6870_v36 = vmul.f32 %v10214_v29, %v4324_v10  ;;  %v4326_v59 = vpop.f32.mrb[74].mxu1  ;;  %6505 = vmatpush1.bf16.msra.mxu1 %v2730_v37  ;;  %v10779_v39 = vadd.f32 %v10256_v23, %v6867_v15  ;;  %v4286_v10 = vpop.f32.mrb[75].mxu0  ;;  %6543 = vmatprep.subr.bf16.mxu0 %v8712_v63  ;;  %v2736_v63 = vand.u32 %v8716_v26, %v8791_v7  ;;  %v8733_v26 = vld [vmem:[%s11692_s0 + $0x91c] ss:$784 sps:$4 sm:$0x1f]  }
 0x171   :  { %11814 = vst [vmem:[#allocation39_spill] sm:$0xff] %v10776_v50  ;;  %v10782_v41 = vadd.f32 %v10256_v23, %v6869_v61  ;;  %v4327_v6 = vpop.f32.mrb[75].mxu1  ;;  %6584 = vmatprep.subr.bf16.mxu1 %v8715_v25  ;;  %v10785_v59 = vadd.f32 %v10256_v23, %v6819_v32  ;;  %11818 = vst [vmem:[#allocation43_spill] sm:$0xff] %v10788_v27  ;;  %v10791_v37 = vadd.f32 %v10256_v23, %v6868_v47  ;;  %v10808_v47 = vld [vmem:[%s11692_s0 + $0x910] ss:$784 sps:$4 sm:$0x1f]  }
 0x172   :  { %11815 = vst [vmem:[#allocation40_spill] sm:$0xff] %v10779_v39  ;;  %v10794_v21 = vadd.f32 %v10256_v23, %v6870_v36  ;;  %8097 = vmatmul.mubr.msk.bf16.vlgmr.msra.gmra.mrb[180].mxu0 %vm2175_vm2, %v10566_v5  ;;  %v8730_v36 = vld [vmem:[%s11692_s0 + $0x914] ss:$784 sps:$4 sm:$0x1f]   ;;  %v2742_v38 = vand.u32 %v8719_v8, %v8791_v7  ;;  %v6824_v61 = vmul.f32 %v10214_v29, %v10067_v40 }
 0x173   :  { %11816 = vst [vmem:[#allocation41_spill] sm:$0xff] %v10782_v41  ;;  %11817 = vst [vmem:[#allocation42_spill] sm:$0xff] %v10785_v59  ;;  %8098 = vmatmul.mubr.msk.bf16.vlgmr.msra.gmra.mrb[180].mxu1 %vm2175_vm2, %v10566_v5  ;;  %6544 = vmatpush1.bf16.msra.mxu0 %v8710_v34  ;;  %v8727_v34 = vld [vmem:[%s11692_s0 + $0x2fc] ss:$784 sps:$4 sm:$0xff]   ;;  %v6823_v8 = vmul.f32 %v10214_v29, %v10052_v30  ;;  %v6825_v10 = vmul.f32 %v10214_v29, %v10054_v33  ;;  %v8725_v30 = vld [vmem:[%s11692_s0 + $0x2f8] ss:$784 sps:$4 sm:$0xff]  }
 0x174   :  { %11819 = vst [vmem:[#allocation44_spill] sm:$0xff] %v10791_v37  ;;  %11820 = vst [vmem:[#allocation45_spill] sm:$0xff] %v10794_v21  ;;  %6585 = vmatpush1.bf16.msra.mxu1 %v8713_v31  ;;  %6545 = vmatprep.subr.bf16.mxu0 %v2739_v1  ;;  %v10830_v31 = vadd.f32 %v10256_v23, %v6822_v60  ;;  %v8722_v60 = vld [vmem:[%s11692_s0 + $0x2f0] ss:$784 sps:$4 sm:$0xff]   ;;  %v2751_v33 = vand.u32 %v8730_v36, %v8791_v7 }
 0x175   :  { %6586 = vmatprep.subr.bf16.mxu1 %v2745_v16  ;;  %v4363_v40 = vpop.f32.mrb[76].mxu0  ;;  %6575 = vmatprep.mubr.bf16.mxu0 %v11787_v52  ;;  %v2748_v25 = vand.u32 %v10808_v47, %v8791_v7  ;;  %v8731_v27 = vld [vmem:[%s11692_s0 + $0x918] ss:$784 sps:$4 sm:$0x1f]   ;;  %v2757_v41 = vand.u32 %v8733_v26, %v8791_v7  ;;  %v10856_v50 = vadd.f32 %v10256_v23, %v6824_v61 }
 0x176   :  { %11821 = vst [vmem:[#allocation46_spill] sm:$0xff] %v10830_v31  ;;  %v4404_v1 = vpop.f32.mrb[76].mxu1  ;;  %6616 = vmatprep.mubr.bf16.mxu1 %v11787_v52  ;;  %v6871_v16 = vmul.f32 %v10214_v29, %v4363_v40  ;;  %v4365_v32 = vpop.f32.mrb[77].mxu0  ;;  %v6826_v61 = vmul.f32 %v10214_v29, %v10069_v45 }
 0x177   :  { %v6873_v6 = vmul.f32 %v10214_v29, %v4404_v1  ;;  %v4406_v15 = vpop.f32.mrb[77].mxu1  ;;  %v6872_v11 = vmul.f32 %v10214_v29, %v4365_v32  ;;  %v4367_v1 = vpop.f32.mrb[78].mxu0  ;;  %6546 = vmatpush1.bf16.msra.mxu0 %v2736_v63  ;;  %11822 = vst [vmem:[#allocation47_spill] sm:$0xff] %v10856_v50  ;;  %v10868_v63 = vadd.f32 %v10256_v23, %v6825_v10  ;;  %v8745_v10 = vld [vmem:[%s11692_s0 + $0x92c] ss:$784 sps:$4 sm:$0x1f]  }
 0x178   :  { %v6874_v40 = vmul.f32 %v10214_v29, %v4406_v15  ;;  %v4408_v21 = vpop.f32.mrb[78].mxu1  ;;  %6587 = vmatpush1.bf16.msra.mxu1 %v2742_v38  ;;  %v10859_v36 = vadd.f32 %v10256_v23, %v6871_v16  ;;  %v4368_v15 = vpop.f32.mrb[79].mxu0  ;;  %6625 = vmatprep.subr.bf16.mxu0 %v8724_v48  ;;  %v8740_v48 = vld [vmem:[%s11692_s0 + $0x920] ss:$784 sps:$4 sm:$0x1f]  }
 0x179   :  { %v10862_v47 = vadd.f32 %v10256_v23, %v6873_v6  ;;  %v4409_v32 = vpop.f32.mrb[79].mxu1  ;;  %6666 = vmatprep.subr.bf16.mxu1 %v8727_v34  ;;  %v10865_v21 = vadd.f32 %v10256_v23, %v6823_v8  ;;  %11826 = vst [vmem:[#allocation51_spill] sm:$0xff] %v10868_v63  ;;  %v10871_v38 = vadd.f32 %v10256_v23, %v6872_v11  ;;  %v8742_v11 = vld [vmem:[%s11692_s0 + $0x924] ss:$784 sps:$4 sm:$0x1f]  }
 0x17a   :  { %11823 = vst [vmem:[#allocation48_spill] sm:$0xff] %v10859_v36  ;;  %v10874_v26 = vadd.f32 %v10256_v23, %v6874_v40  ;;  %8099 = vmatmul.mubr.msk.bf16.vlgmr.msra.gmra.mrb[184].mxu0 %vm2175_vm2, %v10566_v5  ;;  %v2754_v8 = vand.u32 %v8731_v27, %v8791_v7  ;;  %v6828_v6 = vmul.f32 %v10214_v29, %v10106_v18  ;;  %v8736_v40 = vld [vmem:[%s11692_s0 + $0x304] ss:$784 sps:$4 sm:$0xff]   ;;  %v8734_v18 = vld [vmem:[%s11692_s0 + $0x300] ss:$784 sps:$4 sm:$0xff]  }
 0x17b   :  { %11824 = vst [vmem:[#allocation49_spill] sm:$0xff] %v10862_v47  ;;  %11825 = vst [vmem:[#allocation50_spill] sm:$0xff] %v10865_v21  ;;  %8100 = vmatmul.mubr.msk.bf16.vlgmr.msra.gmra.mrb[184].mxu1 %vm2175_vm2, %v10566_v5  ;;  %6626 = vmatpush1.bf16.msra.mxu0 %v8722_v60  ;;  %v8739_v60 = vld [vmem:[%s11692_s0 + $0x30c] ss:$784 sps:$4 sm:$0xff]   ;;  %v6827_v27 = vmul.f32 %v10214_v29, %v10094_v13  ;;  %v2763_v34 = vand.u32 %v8742_v11, %v8791_v7 }
 0x17c   :  { %11827 = vst [vmem:[#allocation52_spill] sm:$0xff] %v10871_v38  ;;  %11828 = vst [vmem:[#allocation53_spill] sm:$0xff] %v10874_v26  ;;  %6667 = vmatpush1.bf16.msra.mxu1 %v8725_v30  ;;  %6627 = vmatprep.subr.bf16.mxu0 %v2751_v33  ;;  %v6829_v30 = vmul.f32 %v10214_v29, %v10096_v14  ;;  %v10918_v33 = vadd.f32 %v10256_v23, %v6826_v61  ;;  %v8743_v61 = vld [vmem:[%s11692_s0 + $0x928] ss:$784 sps:$4 sm:$0x1f]  }
 0x17d   :  { %6668 = vmatprep.subr.bf16.mxu1 %v2757_v41  ;;  %v4445_v1 = vpop.f32.mrb[80].mxu0  ;;  %6657 = vmatprep.mubr.bf16.mxu0 %v11787_v52  ;;  %v8737_v41 = vld [vmem:[%s11692_s0 + $0x308] ss:$784 sps:$4 sm:$0xff]  }
 0x17e   :  { %v4486_v15 = vpop.f32.mrb[80].mxu1  ;;  %6698 = vmatprep.mubr.bf16.mxu1 %v11787_v52  ;;  %11829 = vst [vmem:[#allocation54_spill] sm:$0xff] %v10918_v33  ;;  %v6875_v13 = vmul.f32 %v10214_v29, %v4445_v1  ;;  %v4447_v32 = vpop.f32.mrb[81].mxu0  ;;  %v2769_v1 = vand.u32 %v8745_v10, %v8791_v7 }
 0x17f   :  { %v6877_v14 = vmul.f32 %v10214_v29, %v4486_v15  ;;  %v4488_v45 = vpop.f32.mrb[81].mxu1  ;;  %v6876_v16 = vmul.f32 %v10214_v29, %v4447_v32  ;;  %v4449_v63 = vpop.f32.mrb[82].mxu0  ;;  %6628 = vmatpush1.bf16.msra.mxu0 %v2748_v25  ;;  %v10933_v15 = vadd.f32 %v10256_v23, %v6828_v6  ;;  %v10942_v25 = vadd.f32 %v10256_v23, %v6827_v27 }
 0x180   :  { %v6878_v26 = vmul.f32 %v10214_v29, %v4488_v45  ;;  %v4490_v47 = vpop.f32.mrb[82].mxu1  ;;  %6669 = vmatpush1.bf16.msra.mxu1 %v2754_v8  ;;  %v10936_v50 = vadd.f32 %v10256_v23, %v6875_v13  ;;  %v4450_v45 = vpop.f32.mrb[83].mxu0  ;;  %6707 = vmatprep.subr.bf16.mxu0 %v8736_v40  ;;  %v2760_v40 = vand.u32 %v8740_v48, %v8791_v7 }
 0x181   :  { %11830 = vst [vmem:[#allocation55_spill] sm:$0xff] %v10933_v15  ;;  %v10939_v11 = vadd.f32 %v10256_v23, %v6877_v14  ;;  %v4491_v63 = vpop.f32.mrb[83].mxu1  ;;  %6748 = vmatprep.subr.bf16.mxu1 %v8739_v60  ;;  %11833 = vst [vmem:[#allocation58_spill] sm:$0xff] %v10942_v25  ;;  %v10945_v47 = vadd.f32 %v10256_v23, %v6829_v30  ;;  %v10948_v8 = vadd.f32 %v10256_v23, %v6876_v16  ;;  %v11837_v14 = vld [vmem:[#allocation2_spill] sm:$0xff] }
 0x182   :  { %11831 = vst [vmem:[#allocation56_spill] sm:$0xff] %v10936_v50  ;;  %v10951_v10 = vadd.f32 %v10256_v23, %v6878_v26  ;;  %8101 = vmatmul.mubr.msk.bf16.vlgmr.msra.gmra.mrb[188].mxu0 %vm2175_vm2, %v10566_v5  ;;  %v2766_v60 = vand.u32 %v8743_v61, %v8791_v7  ;;  %v6830_v27 = vmul.f32 %v10214_v29, %v10108_v19 }
 0x183   :  { %11832 = vst [vmem:[#allocation57_spill] sm:$0xff] %v10939_v11  ;;  %11834 = vst [vmem:[#allocation59_spill] sm:$0xff] %v10945_v47  ;;  %8102 = vmatmul.mubr.msk.bf16.vlgmr.msra.gmra.mrb[188].mxu1 %vm2175_vm2, %v10566_v5  ;;  %6708 = vmatpush1.bf16.msra.mxu0 %v8734_v18  ;;  %v6832_v30 = vmul.f32 %v10214_v29, %v10148_v58  ;;  %v6831_v48 = vmul.f32 %v10214_v29, %v10136_v54 }
 0x184   :  { %11835 = vst [vmem:[#allocation60_spill] sm:$0xff] %v10948_v8  ;;  %11836 = vst [vmem:[#allocation61_spill] sm:$0xff] %v10951_v10  ;;  %6749 = vmatpush1.bf16.msra.mxu1 %v8737_v41  ;;  %6709 = vmatprep.subr.bf16.mxu0 %v2763_v34  ;;  %v6833_v32 = vmul.f32 %v10214_v29, %v11837_v14 }
 0x185   :  { %6750 = vmatprep.subr.bf16.mxu1 %v2769_v1  ;;  %v4527_v45 = vpop.f32.mrb[84].mxu0  ;;  %6739 = vmatprep.mubr.bf16.mxu0 %v11787_v52  ;;  %v10982_v1 = vadd.f32 %v10256_v23, %v6830_v27  ;;  %v10985_v14 = vadd.f32 %v10256_v23, %v6832_v30 }
 0x186   :  { %v4568_v63 = vpop.f32.mrb[84].mxu1  ;;  %6780 = vmatprep.mubr.bf16.mxu1 %v11787_v52  ;;  %v6879_v7 = vmul.f32 %v10214_v29, %v4527_v45  ;;  %v4529_v18 = vpop.f32.mrb[85].mxu0 }
 0x187   :  { %v6881_v19 = vmul.f32 %v10214_v29, %v4568_v63  ;;  %v4570_v58 = vpop.f32.mrb[85].mxu1  ;;  %v6880_v34 = vmul.f32 %v10214_v29, %v4529_v18  ;;  %v4531_v54 = vpop.f32.mrb[86].mxu0  ;;  %6710 = vmatpush1.bf16.msra.mxu0 %v2760_v40  ;;  %11838 = vst [vmem:[#allocation2_spill] sm:$0xff] %v10982_v1  ;;  %11839 = vst [vmem:[#allocation62_spill] sm:$0xff] %v10985_v14  ;;  %v10997_v40 = vadd.f32 %v10256_v23, %v6833_v32 }
 0x188   :  { %v6882_v41 = vmul.f32 %v10214_v29, %v4570_v58  ;;  %v4572_v61 = vpop.f32.mrb[86].mxu1  ;;  %6751 = vmatpush1.bf16.msra.mxu1 %v2766_v60  ;;  %v10988_v52 = vadd.f32 %v10256_v23, %v6879_v7  ;;  %v4532_v63 = vpop.f32.mrb[87].mxu0  ;;  %v10994_v58 = vadd.f32 %v10256_v23, %v6831_v48 }
 0x189   :  { %v10991_v45 = vadd.f32 %v10256_v23, %v6881_v19  ;;  %v4573_v18 = vpop.f32.mrb[87].mxu1  ;;  %11843 = vst [vmem:[#allocation66_spill] sm:$0xff] %v10997_v40  ;;  %v11000_v60 = vadd.f32 %v10256_v23, %v6880_v34  ;;  %v11846_v19 = vld [vmem:[#allocation3_spill] sm:$0xff]  ;;  %v11848_v61 = vld [vmem:[#allocation4_spill] sm:$0xff] }
 0x18a   :  { %11840 = vst [vmem:[#allocation63_spill] sm:$0xff] %v10988_v52  ;;  %11842 = vst [vmem:[#allocation65_spill] sm:$0xff] %v10994_v58  ;;  %v11003_v27 = vadd.f32 %v10256_v23, %v6882_v41  ;;  %8103 = vmatmul.mubr.msk.bf16.vlgmr.msra.gmra.mrb[192].mxu0 %vm2175_vm2, %v10566_v5  ;;  %v6834_v34 = vmul.f32 %v10214_v29, %v11846_v19  ;;  %v11847_v41 = vld [vmem:[#allocation6_spill] sm:$0xff]  ;;  %v6835_v63 = vmul.f32 %v10214_v29, %v11848_v61  ;;  %v11849_v18 = vld [vmem:[#allocation5_spill] sm:$0xff] }
 0x18b   :  { %11841 = vst [vmem:[#allocation64_spill] sm:$0xff] %v10991_v45  ;;  %11844 = vst [vmem:[#allocation67_spill] sm:$0xff] %v11000_v60  ;;  %8104 = vmatmul.mubr.msk.bf16.vlgmr.msra.gmra.mrb[192].mxu1 %vm2175_vm2, %v10566_v5  ;;  %v6836_v54 = vmul.f32 %v10214_v29, %v11847_v41  ;;  %v6837_v7 = vmul.f32 %v10214_v29, %v11849_v18  ;;  %v11861_v45 = vld [vmem:[#allocation9_spill] sm:$0xff] }
 0x18c   :  { %11845 = vst [vmem:[#allocation68_spill] sm:$0xff] %v11003_v27  ;;  %v11030_v27 = vadd.f32 %v10256_v23, %v6834_v34 }
 0x18d   :  { %v4609_v26 = vpop.f32.mrb[88].mxu0  ;;  %v11033_v61 = vadd.f32 %v10256_v23, %v6836_v54 }
 0x18e   :  { %v4650_v5 = vpop.f32.mrb[88].mxu1  ;;  %v6883_v30 = vmul.f32 %v10214_v29, %v4609_v26  ;;  %v4611_v13 = vpop.f32.mrb[89].mxu0  ;;  %11850 = vst [vmem:[#allocation3_spill] sm:$0xff] %v11030_v27 }
 0x18f   :  { %v6885_v48 = vmul.f32 %v10214_v29, %v4650_v5  ;;  %v4652_v32 = vpop.f32.mrb[89].mxu1  ;;  %v6884_v16 = vmul.f32 %v10214_v29, %v4611_v13  ;;  %v4613_v6 = vpop.f32.mrb[90].mxu0  ;;  %11851 = vst [vmem:[#allocation6_spill] sm:$0xff] %v11033_v61  ;;  %v11042_v13 = vadd.f32 %v10256_v23, %v6835_v63 }
 0x190   :  { %v6886_v19 = vmul.f32 %v10214_v29, %v4652_v32  ;;  %v4654_v41 = vpop.f32.mrb[90].mxu1  ;;  %v11036_v18 = vadd.f32 %v10256_v23, %v6883_v30  ;;  %v4614_v5 = vpop.f32.mrb[91].mxu0  ;;  %v11045_v6 = vadd.f32 %v10256_v23, %v6837_v7  ;;  %v11858_v7 = vld [vmem:[#allocation7_spill] sm:$0xff]  ;;  %v6841_v30 = vmul.f32 %v10214_v29, %v11861_v45 }
 0x191   :  { %v11039_v26 = vadd.f32 %v10256_v23, %v6885_v48  ;;  %v4655_v40 = vpop.f32.mrb[91].mxu1  ;;  %11854 = vst [vmem:[#allocation69_spill] sm:$0xff] %v11042_v13  ;;  %v11048_v32 = vadd.f32 %v10256_v23, %v6884_v16  ;;  %v6838_v63 = vmul.f32 %v10214_v29, %v11858_v7  ;;  %v11859_v16 = vld [vmem:[#allocation10_spill] sm:$0xff] }
 0x192   :  { %11852 = vst [vmem:[#allocation4_spill] sm:$0xff] %v11036_v18  ;;  %11855 = vst [vmem:[#allocation70_spill] sm:$0xff] %v11045_v6  ;;  %v11051_v34 = vadd.f32 %v10256_v23, %v6886_v19  ;;  %v6840_v41 = vmul.f32 %v10214_v29, %v11859_v16  ;;  %v11860_v19 = vld [vmem:[#allocation8_spill] sm:$0xff] }
 0x193   :  { %11853 = vst [vmem:[#allocation5_spill] sm:$0xff] %v11039_v26  ;;  %11856 = vst [vmem:[#allocation71_spill] sm:$0xff] %v11048_v32  ;;  %v6839_v5 = vmul.f32 %v10214_v29, %v11860_v19  ;;  %v11074_v32 = vadd.f32 %v10256_v23, %v6838_v63 }
 0x194   :  { %11857 = vst [vmem:[#allocation72_spill] sm:$0xff] %v11051_v34  ;;  %v11077_v19 = vadd.f32 %v10256_v23, %v6840_v41 }
 0x195   :  { %v4691_v18 = vpop.f32.mrb[92].mxu0  ;;  %11862 = vst [vmem:[#allocation7_spill] sm:$0xff] %v11074_v32 }
 0x196   :  { %v4732_v48 = vpop.f32.mrb[92].mxu1  ;;  %v6887_v26 = vmul.f32 %v10214_v29, %v4691_v18  ;;  %v4693_v61 = vpop.f32.mrb[93].mxu0  ;;  %11863 = vst [vmem:[#allocation10_spill] sm:$0xff] %v11077_v19 }
 0x197   :  { %v6889_v40 = vmul.f32 %v10214_v29, %v4732_v48  ;;  %v4734_v54 = vpop.f32.mrb[93].mxu1  ;;  %v6888_v34 = vmul.f32 %v10214_v29, %v4693_v61  ;;  %v4695_v6 = vpop.f32.mrb[94].mxu0  ;;  %v11086_v61 = vadd.f32 %v10256_v23, %v6839_v5 }
 0x198   :  { %v6890_v7 = vmul.f32 %v10214_v29, %v4734_v54  ;;  %v4736_v16 = vpop.f32.mrb[94].mxu1  ;;  %v11080_v45 = vadd.f32 %v10256_v23, %v6887_v26  ;;  %v4696_v48 = vpop.f32.mrb[95].mxu0  ;;  %v11089_v6 = vadd.f32 %v10256_v23, %v6841_v30  ;;  %v11870_v30 = vld [vmem:[#allocation11_spill] sm:$0xff] }
 0x199   :  { %v11083_v18 = vadd.f32 %v10256_v23, %v6889_v40  ;;  %v4737_v13 = vpop.f32.mrb[95].mxu1  ;;  %11866 = vst [vmem:[#allocation73_spill] sm:$0xff] %v11086_v61  ;;  %v11092_v54 = vadd.f32 %v10256_v23, %v6888_v34  ;;  %v6842_v5 = vmul.f32 %v10214_v29, %v11870_v30  ;;  %v11871_v34 = vld [vmem:[#allocation12_spill] sm:$0xff] }
 0x19a   :  { %11864 = vst [vmem:[#allocation8_spill] sm:$0xff] %v11080_v45  ;;  %11867 = vst [vmem:[#allocation74_spill] sm:$0xff] %v11089_v6  ;;  %v11095_v63 = vadd.f32 %v10256_v23, %v6890_v7  ;;  %v6843_v16 = vmul.f32 %v10214_v29, %v11871_v34 }
 0x19b   :  { %11865 = vst [vmem:[#allocation9_spill] sm:$0xff] %v11083_v18  ;;  %11868 = vst [vmem:[#allocation75_spill] sm:$0xff] %v11092_v54  ;;  %v11116_v41 = vadd.f32 %v10256_v23, %v6842_v5 }
 0x19c   :  { %11869 = vst [vmem:[#allocation76_spill] sm:$0xff] %v11095_v63  ;;  %v11122_v6 = vadd.f32 %v10256_v23, %v6843_v16 }
 0x19d   :  { %v4773_v7 = vpop.f32.mrb[96].mxu0  ;;  %11872 = vst [vmem:[#allocation11_spill] sm:$0xff] %v11116_v41 }
 0x19e   :  { %v11109_v48 = vpop.f32.mrb[96].mxu1  ;;  %v6891_v26 = vmul.f32 %v10214_v29, %v4773_v7  ;;  %v4775_v45 = vpop.f32.mrb[97].mxu0  ;;  %11874 = vst [vmem:[#allocation77_spill] sm:$0xff] %v11122_v6 }
 0x19f   :  { %v11112_v32 = vpop.f32.mrb[97].mxu1  ;;  %v6892_v40 = vmul.f32 %v10214_v29, %v4775_v45  ;;  %v4777_v13 = vpop.f32.mrb[98].mxu0 }
 0x1a0   :  { %v4818_v18 = vpop.f32.mrb[98].mxu1  ;;  %v11119_v30 = vadd.f32 %v10256_v23, %v6891_v26  ;;  %v4778_v63 = vpop.f32.mrb[99].mxu0 }
 0x1a1   :  { %v4819_v34 = vpop.f32.mrb[99].mxu1  ;;  %v11125_v7 = vadd.f32 %v10256_v23, %v6892_v40 }
 0x1a2   :  { %11873 = vst [vmem:[#allocation12_spill] sm:$0xff] %v11119_v30 }
 0x1a3   :  { %11875 = vst [vmem:[#allocation78_spill] sm:$0xff] %v11125_v7 }
 0x1a5   :  { %v11131_v18 = vpop.f32.mrb[100].mxu0 }
 0x1a6   :  { %v11133_v13 = vpop.f32.mrb[100].mxu1  ;;  %v11135_v26 = vpop.f32.mrb[101].mxu0 }
 0x1a7   :  { %v11137_v63 = vpop.f32.mrb[101].mxu1  ;;  %v4859_v5 = vpop.f32.mrb[102].mxu0 }
 0x1a8   :  { %v4900_v16 = vpop.f32.mrb[102].mxu1  ;;  %v4860_v34 = vpop.f32.mrb[103].mxu0 }
 0x1a9   :  { %v4901_v54 = vpop.f32.mrb[103].mxu1 }
 0x1ad   :  { %v11139_v40 = vpop.f32.mrb[104].mxu0 }
 0x1ae   :  { %v11141_v61 = vpop.f32.mrb[104].mxu1  ;;  %v11143_v19 = vpop.f32.mrb[105].mxu0 }
 0x1af   :  { %v11145_v30 = vpop.f32.mrb[105].mxu1  ;;  %v4941_v45 = vpop.f32.mrb[106].mxu0 }
 0x1b0   :  { %v4982_v7 = vpop.f32.mrb[106].mxu1  ;;  %v4942_v6 = vpop.f32.mrb[107].mxu0 }
 0x1b1   :  { %v4983_v41 = vpop.f32.mrb[107].mxu1 }
 0x1b5   :  { %v11147_v27 = vpop.f32.mrb[108].mxu0 }
 0x1b6   :  { %v11149_v14 = vpop.f32.mrb[108].mxu1  ;;  %v11151_v5 = vpop.f32.mrb[109].mxu0 }
 0x1b7   :  { %v11153_v16 = vpop.f32.mrb[109].mxu1  ;;  %v5023_v54 = vpop.f32.mrb[110].mxu0 }
 0x1b8   :  { %v5064_v34 = vpop.f32.mrb[110].mxu1  ;;  %v5024_v60 = vpop.f32.mrb[111].mxu0 }
 0x1b9   :  { %v5065_v58 = vpop.f32.mrb[111].mxu1 }
 0x1bd   :  { %v11155_v10 = vpop.f32.mrb[112].mxu0 }
 0x1be   :  { %v11157_v47 = vpop.f32.mrb[112].mxu1  ;;  %v11159_v45 = vpop.f32.mrb[113].mxu0 }
 0x1bf   :  { %v11161_v6 = vpop.f32.mrb[113].mxu1  ;;  %v5105_v41 = vpop.f32.mrb[114].mxu0 }
 0x1c0   :  { %v5146_v7 = vpop.f32.mrb[114].mxu1  ;;  %v5106_v52 = vpop.f32.mrb[115].mxu0 }
 0x1c1   :  { %v5147_v1 = vpop.f32.mrb[115].mxu1 }
 0x1c5   :  { %v11163_v11 = vpop.f32.mrb[116].mxu0 }
 0x1c6   :  { %v11165_v15 = vpop.f32.mrb[116].mxu1  ;;  %v11167_v54 = vpop.f32.mrb[117].mxu0 }
 0x1c7   :  { %v11169_v60 = vpop.f32.mrb[117].mxu1  ;;  %v5187_v58 = vpop.f32.mrb[118].mxu0 }
 0x1c8   :  { %v5228_v34 = vpop.f32.mrb[118].mxu1  ;;  %v5188_v8 = vpop.f32.mrb[119].mxu0 }
 0x1c9   :  { %v5229_v25 = vpop.f32.mrb[119].mxu1 }
 0x1cd   :  { %v11171_v50 = vpop.f32.mrb[120].mxu0 }
 0x1ce   :  { %v11173_v33 = vpop.f32.mrb[120].mxu1  ;;  %v11175_v41 = vpop.f32.mrb[121].mxu0 }
 0x1cf   :  { %v11177_v52 = vpop.f32.mrb[121].mxu1  ;;  %v5269_v1 = vpop.f32.mrb[122].mxu0 }
 0x1d0   :  { %v5310_v7 = vpop.f32.mrb[122].mxu1  ;;  %v5270_v38 = vpop.f32.mrb[123].mxu0 }
 0x1d1   :  { %v5311_v21 = vpop.f32.mrb[123].mxu1 }
 0x1d5   :  { %v11179_v36 = vpop.f32.mrb[124].mxu0 }
 0x1d6   :  { %11876 = vst [vmem:[#allocation79_spill] sm:$0xff] %v11179_v36  ;;  %v11181_v31 = vpop.f32.mrb[124].mxu1  ;;  %v11183_v58 = vpop.f32.mrb[125].mxu0 }
 0x1d7   :  { %11877 = vst [vmem:[#allocation80_spill] sm:$0xff] %v11181_v31  ;;  %11878 = vst [vmem:[#allocation81_spill] sm:$0xff] %v11183_v58  ;;  %v11185_v8 = vpop.f32.mrb[125].mxu1  ;;  %v5351_v25 = vpop.f32.mrb[126].mxu0 }
 0x1d8   :  { %11879 = vst [vmem:[#allocation82_spill] sm:$0xff] %v11185_v8  ;;  %v5392_v34 = vpop.f32.mrb[126].mxu1  ;;  %v5352_v37 = vpop.f32.mrb[127].mxu0 }
 0x1d9   :  { %v5393_v59 = vpop.f32.mrb[127].mxu1 }
 0x1dd   :  { %v11187_v39 = vpop.f32.mrb[128].mxu0 }
 0x1de   :  { %11880 = vst [vmem:[#allocation83_spill] sm:$0xff] %v11187_v39  ;;  %v11189_v9 = vpop.f32.mrb[128].mxu1  ;;  %v11191_v1 = vpop.f32.mrb[129].mxu0 }
 0x1df   :  { %11881 = vst [vmem:[#allocation84_spill] sm:$0xff] %v11189_v9  ;;  %11882 = vst [vmem:[#allocation85_spill] sm:$0xff] %v11191_v1  ;;  %v11193_v38 = vpop.f32.mrb[129].mxu1  ;;  %v5433_v21 = vpop.f32.mrb[130].mxu0 }
 0x1e0   :  { %11883 = vst [vmem:[#allocation86_spill] sm:$0xff] %v11193_v38  ;;  %v5474_v7 = vpop.f32.mrb[130].mxu1  ;;  %v5434_v36 = vpop.f32.mrb[131].mxu0 }
 0x1e1   :  { %v5475_v31 = vpop.f32.mrb[131].mxu1 }
 0x1e5   :  { %v11195_v43 = vpop.f32.mrb[132].mxu0 }
 0x1e6   :  { %11884 = vst [vmem:[#allocation87_spill] sm:$0xff] %v11195_v43  ;;  %v11197_v58 = vpop.f32.mrb[132].mxu1  ;;  %v11199_v25 = vpop.f32.mrb[133].mxu0 }
 0x1e7   :  { %11885 = vst [vmem:[#allocation88_spill] sm:$0xff] %v11197_v58  ;;  %11886 = vst [vmem:[#allocation89_spill] sm:$0xff] %v11199_v25  ;;  %v11201_v37 = vpop.f32.mrb[133].mxu1  ;;  %v5515_v59 = vpop.f32.mrb[134].mxu0 }
 0x1e8   :  { %11887 = vst [vmem:[#allocation90_spill] sm:$0xff] %v11201_v37  ;;  %v5556_v34 = vpop.f32.mrb[134].mxu1  ;;  %v5516_v39 = vpop.f32.mrb[135].mxu0 }
 0x1e9   :  { %v5557_v9 = vpop.f32.mrb[135].mxu1 }
 0x1ed   :  { %v11203_v8 = vpop.f32.mrb[136].mxu0 }
 0x1ee   :  { %11888 = vst [vmem:[#allocation91_spill] sm:$0xff] %v11203_v8  ;;  %v11205_v1 = vpop.f32.mrb[136].mxu1  ;;  %v11207_v21 = vpop.f32.mrb[137].mxu0 }
 0x1ef   :  { %11889 = vst [vmem:[#allocation92_spill] sm:$0xff] %v11205_v1  ;;  %11890 = vst [vmem:[#allocation93_spill] sm:$0xff] %v11207_v21  ;;  %v11209_v36 = vpop.f32.mrb[137].mxu1  ;;  %v5597_v31 = vpop.f32.mrb[138].mxu0  ;;  %v6893_v21 = vmul.f32 %v10214_v29, %v11109_v48  ;;  %v6894_v48 = vmul.f32 %v10214_v29, %v11112_v32 }
 0x1f0   :  { %11891 = vst [vmem:[#allocation94_spill] sm:$0xff] %v11209_v36  ;;  %v5638_v7 = vpop.f32.mrb[138].mxu1  ;;  %v5598_v43 = vpop.f32.mrb[139].mxu0 }
 0x1f1   :  { %v5639_v58 = vpop.f32.mrb[139].mxu1 }
 0x1f5   :  { %v11211_v38 = vpop.f32.mrb[140].mxu0 }
 0x1f6   :  { %11892 = vst [vmem:[#allocation95_spill] sm:$0xff] %v11211_v38  ;;  %v11213_v25 = vpop.f32.mrb[140].mxu1  ;;  %v11215_v59 = vpop.f32.mrb[141].mxu0 }
 0x1f7   :  { %11893 = vst [vmem:[#allocation96_spill] sm:$0xff] %v11213_v25  ;;  %11894 = vst [vmem:[#allocation97_spill] sm:$0xff] %v11215_v59  ;;  %v11217_v39 = vpop.f32.mrb[141].mxu1  ;;  %v5679_v9 = vpop.f32.mrb[142].mxu0 }
 0x1f8   :  { %11895 = vst [vmem:[#allocation98_spill] sm:$0xff] %v11217_v39  ;;  %v5720_v34 = vpop.f32.mrb[142].mxu1  ;;  %v5680_v8 = vpop.f32.mrb[143].mxu0  ;;  %v7095_v9 = vadd.f32 %v10256_v23, %v6893_v21 }
 0x1f9   :  { %v5721_v1 = vpop.f32.mrb[143].mxu1  ;;  %v6896_v34 = vmul.f32 %v10214_v29, %v11135_v26  ;;  %v6898_v26 = vmul.f32 %v10214_v29, %v11137_v63 }
 0x1fd   :  { %v11221_v36 = vpop.f32.mrb[144].mxu0 }
 0x1fe   :  { %11896 = vst [vmem:[#allocation99_spill] sm:$0xff] %v11221_v36  ;;  %v11223_v31 = vpop.f32.mrb[144].mxu1  ;;  %v11225_v43 = vpop.f32.mrb[145].mxu0 }
 0x1ff   :  { %11897 = vst [vmem:[#allocation100_spill] sm:$0xff] %v11223_v31  ;;  %11898 = vst [vmem:[#allocation101_spill] sm:$0xff] %v11225_v43  ;;  %v5800_v58 = vpop.f32.mrb[145].mxu1  ;;  %v5761_v25 = vpop.f32.mrb[146].mxu0  ;;  %v6895_v31 = vmul.f32 %v10214_v29, %v11131_v18 }
 0x200   :  { %v6942_v7 = vmul.f32 %v10214_v29, %v5800_v58  ;;  %v5802_v59 = vpop.f32.mrb[146].mxu1  ;;  %v5762_v38 = vpop.f32.mrb[147].mxu0  ;;  %v6897_v25 = vmul.f32 %v10214_v29, %v11133_v13 }
 0x201   :  { %v5803_v39 = vpop.f32.mrb[147].mxu1  ;;  %v11899_v38 = vmax.f32 %v10286_v12, %v10312_v42  ;;  %v7096_v12 = vadd.f32 %v10256_v23, %v6894_v48  ;;  %v7098_v42 = vadd.f32 %v10256_v23, %v6896_v34  ;;  %v7097_v36 = vadd.f32 %v10256_v23, %v6895_v31 }
 0x202   :  { %v7144_v8 = vadd.f32 %v10256_v23, %v6942_v7  ;;  %v7099_v63 = vadd.f32 %v10256_v23, %v6897_v25  ;;  %v7100_v48 = vadd.f32 %v10256_v23, %v6898_v26  ;;  %v6899_v34 = vmul.f32 %v10214_v29, %v11139_v40  ;;  %v11900_v25 = vld [vmem:[#allocation14_spill] sm:$0xff] }
 0x203   :  { %v6900_v31 = vmul.f32 %v10214_v29, %v11143_v19  ;;  %v6902_v26 = vmul.f32 %v10214_v29, %v11145_v30 }
 0x204   :  { %v7242_v1 = vmax.f32 %v7095_v9, %v7144_v8  ;;  %v7101_v30 = vadd.f32 %v10256_v23, %v6899_v34 }
 0x205   :  { %v5839_v21 = vpop.f32.mrb[148].mxu0 }
 0x206   :  { %v7291_v59 = vmax.f32 %v11899_v38, %v7242_v1  ;;  %v5880_v39 = vpop.f32.mrb[148].mxu1  ;;  %v6943_v58 = vmul.f32 %v10214_v29, %v5839_v21  ;;  %v5841_v32 = vpop.f32.mrb[149].mxu0 }
 0x207   :  { %v6945_v7 = vmul.f32 %v10214_v29, %v5880_v39  ;;  %v5882_v9 = vpop.f32.mrb[149].mxu1  ;;  %v6944_v18 = vmul.f32 %v10214_v29, %v5841_v32  ;;  %v5843_v13 = vpop.f32.mrb[150].mxu0 }
 0x208   :  { %v6946_v8 = vmul.f32 %v10214_v29, %v5882_v9  ;;  %v5884_v43 = vpop.f32.mrb[150].mxu1  ;;  %v7145_v1 = vadd.f32 %v10256_v23, %v6943_v58  ;;  %v5844_v21 = vpop.f32.mrb[151].mxu0  ;;  %v7340_v40 = vmax.f32 %v7291_v59, 0.0 }
 0x209   :  { %v7147_v38 = vadd.f32 %v10256_v23, %v6945_v7  ;;  %v5885_v39 = vpop.f32.mrb[151].mxu1  ;;  %v7146_v32 = vadd.f32 %v10256_v23, %v6944_v18  ;;  %v6901_v7 = vmul.f32 %v10214_v29, %v11141_v61  ;;  %v11901_v21 = vld [vmem:[#allocation15_spill] sm:$0xff]  ;;  %v11907_v61 = vmax.f32 %v10347_v51, %v10390_v2 }
 0x20a   :  { %v7148_v9 = vadd.f32 %v10256_v23, %v6946_v8  ;;  %v7243_v13 = vmax.f32 %v7096_v12, %v7145_v1  ;;  %v11902_v18 = vmax.f32 %v11900_v25, %v11901_v21  ;;  %v11903_v8 = vmax.f32 %v10338_v56, %v10381_v35 }
 0x20b   :  { %v7245_v43 = vmax.f32 %v7098_v42, %v7147_v38  ;;  %v7244_v58 = vmax.f32 %v7097_v36, %v7146_v32  ;;  %v11904_v36 = vld [vmem:[#allocation13_spill] sm:$0xff]  ;;  %v11905_v42 = vld [vmem:[#allocation16_spill] sm:$0xff]  ;;  %v7102_v2 = vadd.f32 %v10256_v23, %v6900_v31 }
 0x20c   :  { %v7246_v37 = vmax.f32 %v7099_v63, %v7148_v9  ;;  %v7292_v39 = vmax.f32 %v11902_v18, %v7243_v13  ;;  %v11906_v1 = vmax.f32 %v11904_v36, %v11905_v42  ;;  %v7103_v42 = vadd.f32 %v10256_v23, %v6901_v7 }
 0x20d   :  { %v7294_v12 = vmax.f32 %v11903_v8, %v7245_v43  ;;  %v5921_v63 = vpop.f32.mrb[152].mxu0 }
 0x20e   :  { %v7293_v38 = vmax.f32 %v11906_v1, %v7244_v58  ;;  %v7295_v19 = vmax.f32 %v11907_v61, %v7246_v37  ;;  %v5962_v32 = vpop.f32.mrb[152].mxu1  ;;  %v7341_v9 = vmax.f32 %v7292_v39, 0.0  ;;  %v6947_v25 = vmul.f32 %v10214_v29, %v5921_v63  ;;  %v5923_v56 = vpop.f32.mrb[153].mxu0 }
 0x20f   :  { %v7343_v13 = vmax.f32 %v7294_v12, 0.0  ;;  %v6949_v35 = vmul.f32 %v10214_v29, %v5962_v32  ;;  %v5964_v43 = vpop.f32.mrb[153].mxu1  ;;  %v6948_v21 = vmul.f32 %v10214_v29, %v5923_v56  ;;  %v5925_v18 = vpop.f32.mrb[154].mxu0  ;;  %v6903_v63 = vmul.f32 %v10214_v29, %v11147_v27 }
 0x210   :  { %v7342_v59 = vmax.f32 %v7293_v38, 0.0  ;;  %v6950_v58 = vmul.f32 %v10214_v29, %v5964_v43  ;;  %v5966_v51 = vpop.f32.mrb[154].mxu1  ;;  %v8130_v37 = vpack.c.bf16 %v7341_v9, %v7340_v40  ;;  %v7149_v39 = vadd.f32 %v10256_v23, %v6947_v25  ;;  %v5926_v12 = vpop.f32.mrb[155].mxu0  ;;  %v11908_v25 = vld [vmem:[#allocation18_spill] sm:$0xff] }
 0x211   :  { %v7151_v8 = vadd.f32 %v10256_v23, %v6949_v35  ;;  %v5967_v36 = vpop.f32.mrb[155].mxu1  ;;  %v7150_v34 = vadd.f32 %v10256_v23, %v6948_v21  ;;  %v7104_v40 = vadd.f32 %v10256_v23, %v6902_v26  ;;  %v6905_v9 = vmul.f32 %v10214_v29, %v11149_v14  ;;  %v11913_v21 = vld [vmem:[#allocation20_spill] sm:$0xff] }
 0x212   :  { %v8131_v1 = vpack.c.bf16 %v7343_v13, %v7342_v59  ;;  %v7152_v38 = vadd.f32 %v10256_v23, %v6950_v58  ;;  %7586 = vst [vmem:[%s11696_s4] sm:$0xff] %v8130_v37  ;;  %v7247_v61 = vmax.f32 %v7100_v48, %v7149_v39  ;;  %v6904_v13 = vmul.f32 %v10214_v29, %v11151_v5  ;;  %v11909_v48 = vld [vmem:[#allocation19_spill] sm:$0xff] }
 0x213   :  { %v7249_v31 = vmax.f32 %v7102_v2, %v7151_v8  ;;  %v7248_v7 = vmax.f32 %v7101_v30, %v7150_v34  ;;  %v11910_v35 = vmax.f32 %v11908_v25, %v11909_v48  ;;  %v11911_v26 = vmax.f32 %v10424_v24, %v10462_v17  ;;  %v11912_v30 = vld [vmem:[#allocation17_spill] sm:$0xff] }
 0x214   :  { %7587 = vst [vmem:[%s11696_s4 + $0x8] sm:$0xff] %v8131_v1  ;;  %v7250_v32 = vmax.f32 %v7103_v42, %v7152_v38  ;;  %v6906_v43 = vmul.f32 %v10214_v29, %v11153_v16  ;;  %v7344_v59 = vmax.f32 %v7295_v19, 0.0  ;;  %v11914_v58 = vmax.f32 %v11912_v30, %v11913_v21 }
 0x215   :  { %v7296_v56 = vmax.f32 %v11910_v35, %v7247_v61  ;;  %v7298_v27 = vmax.f32 %v11911_v26, %v7249_v31  ;;  %v11915_v14 = vmax.f32 %v10433_v55, %v10473_v28  ;;  %v6003_v51 = vpop.f32.mrb[156].mxu0  ;;  %v7105_v16 = vadd.f32 %v10256_v23, %v6903_v63 }
 0x216   :  { %v7297_v18 = vmax.f32 %v11914_v58, %v7248_v7  ;;  %v6044_v2 = vpop.f32.mrb[156].mxu1  ;;  %v6951_v8 = vmul.f32 %v10214_v29, %v6003_v51  ;;  %v6005_v24 = vpop.f32.mrb[157].mxu0  ;;  %v7106_v28 = vadd.f32 %v10256_v23, %v6904_v13  ;;  %v6907_v26 = vmul.f32 %v10214_v29, %v11155_v10  ;;  %v11919_v51 = vld [vmem:[#allocation21_spill] sm:$0xff] }
 0x217   :  { %v7299_v5 = vmax.f32 %v11915_v14, %v7250_v32  ;;  %v7345_v37 = vmax.f32 %v7296_v56, 0.0  ;;  %v7347_v39 = vmax.f32 %v7298_v27, 0.0  ;;  %v6953_v17 = vmul.f32 %v10214_v29, %v6044_v2  ;;  %v6046_v12 = vpop.f32.mrb[157].mxu1  ;;  %v6007_v1 = vpop.f32.mrb[158].mxu0  ;;  %v11920_v2 = vld [vmem:[#allocation23_spill] sm:$0xff] }
 0x218   :  { %v7346_v19 = vmax.f32 %v7297_v18, 0.0  ;;  %v6952_v36 = vmul.f32 %v10214_v29, %v6005_v24  ;;  %v6954_v42 = vmul.f32 %v10214_v29, %v6046_v12  ;;  %v6048_v55 = vpop.f32.mrb[158].mxu1  ;;  %v7153_v38 = vadd.f32 %v10256_v23, %v6951_v8  ;;  %v6008_v31 = vpop.f32.mrb[159].mxu0 }
 0x219   :  { %v8132_v34 = vpack.c.bf16 %v7345_v37, %v7344_v59  ;;  %v7155_v61 = vadd.f32 %v10256_v23, %v6953_v17  ;;  %v6049_v7 = vpop.f32.mrb[159].mxu1  ;;  %v7107_v32 = vadd.f32 %v10256_v23, %v6905_v9  ;;  %v7108_v56 = vadd.f32 %v10256_v23, %v6906_v43 }
 0x21a   :  { %v8133_v25 = vpack.c.bf16 %v7347_v39, %v7346_v19  ;;  %v7154_v63 = vadd.f32 %v10256_v23, %v6952_v36  ;;  %v7156_v48 = vadd.f32 %v10256_v23, %v6954_v42  ;;  %v7251_v35 = vmax.f32 %v7104_v40, %v7153_v38  ;;  %v11916_v40 = vld [vmem:[#allocation22_spill] sm:$0xff] }
 0x21b   :  { %7588 = vst [vmem:[%s11696_s4 + $0x10] sm:$0xff] %v8132_v34  ;;  %v7253_v13 = vmax.f32 %v7106_v28, %v7155_v61  ;;  %v6909_v59 = vmul.f32 %v10214_v29, %v11157_v47  ;;  %v6908_v30 = vmul.f32 %v10214_v29, %v11159_v45  ;;  %v11917_v21 = vmax.f32 %v10443_v53, %v11916_v40 }
 0x21c   :  { %7589 = vst [vmem:[%s11696_s4 + $0x18] sm:$0xff] %v8133_v25  ;;  %v7252_v9 = vmax.f32 %v7105_v16, %v7154_v63  ;;  %v7254_v27 = vmax.f32 %v7107_v32, %v7156_v48  ;;  %v11918_v43 = vmax.f32 %v10506_v3, %v10541_v4  ;;  %v6910_v18 = vmul.f32 %v10214_v29, %v11161_v6 }
 0x21d   :  { %v7300_v58 = vmax.f32 %v11917_v21, %v7251_v35  ;;  %v7348_v14 = vmax.f32 %v7299_v5, 0.0  ;;  %v11921_v37 = vmax.f32 %v11919_v51, %v11920_v2  ;;  %v11922_v47 = vmax.f32 %v10509_v62, %v10550_v49  ;;  %v6085_v8 = vpop.f32.mrb[160].mxu0  ;;  %v11930_v51 = vld [vmem:[#allocation31_spill] sm:$0xff] }
 0x21e   :  { %v7302_v10 = vmax.f32 %v11918_v43, %v7253_v13  ;;  %v6126_v17 = vpop.f32.mrb[160].mxu1  ;;  %v6955_v12 = vmul.f32 %v10214_v29, %v6085_v8  ;;  %v6087_v3 = vpop.f32.mrb[161].mxu0  ;;  %v7109_v6 = vadd.f32 %v10256_v23, %v6907_v26  ;;  %v7110_v49 = vadd.f32 %v10256_v23, %v6908_v30  ;;  %v11926_v43 = vld [vmem:[#allocation24_spill] sm:$0xff] }
 0x21f   :  { %v7301_v39 = vmax.f32 %v11921_v37, %v7252_v9  ;;  %v7303_v45 = vmax.f32 %v11922_v47, %v7254_v27  ;;  %v7349_v53 = vmax.f32 %v7300_v58, 0.0  ;;  %v6957_v4 = vmul.f32 %v10214_v29, %v6126_v17  ;;  %v6128_v16 = vpop.f32.mrb[161].mxu1  ;;  %v6089_v42 = vpop.f32.mrb[162].mxu0 }
 0x220   :  { %v7351_v24 = vmax.f32 %v7302_v10, 0.0  ;;  %v6956_v19 = vmul.f32 %v10214_v29, %v6087_v3  ;;  %v6958_v36 = vmul.f32 %v10214_v29, %v6128_v16  ;;  %v6130_v62 = vpop.f32.mrb[162].mxu1  ;;  %v7157_v55 = vadd.f32 %v10256_v23, %v6955_v12  ;;  %v6090_v34 = vpop.f32.mrb[163].mxu0  ;;  %v11927_v10 = vld [vmem:[#allocation26_spill] sm:$0xff] }
 0x221   :  { %v7350_v5 = vmax.f32 %v7301_v39, 0.0  ;;  %v8134_v1 = vpack.c.bf16 %v7349_v53, %v7348_v14  ;;  %v7159_v28 = vadd.f32 %v10256_v23, %v6957_v4  ;;  %v6131_v38 = vpop.f32.mrb[163].mxu1  ;;  %v7111_v61 = vadd.f32 %v10256_v23, %v6909_v59 }
 0x222   :  { %v7158_v7 = vadd.f32 %v10256_v23, %v6956_v19  ;;  %v7160_v32 = vadd.f32 %v10256_v23, %v6958_v36  ;;  %v7255_v25 = vmax.f32 %v7108_v56, %v7157_v55  ;;  %v7112_v48 = vadd.f32 %v10256_v23, %v6910_v18  ;;  %v11923_v56 = vld [vmem:[#allocation25_spill] sm:$0xff] }
 0x223   :  { %v8135_v31 = vpack.c.bf16 %v7351_v24, %v7350_v5  ;;  %7590 = vst [vmem:[%s11696_s4 + $0x20] sm:$0xff] %v8134_v1  ;;  %v7257_v63 = vmax.f32 %v7110_v49, %v7159_v28  ;;  %v6911_v35 = vmul.f32 %v10214_v29, %v11163_v11  ;;  %v6913_v9 = vmul.f32 %v10214_v29, %v11165_v15  ;;  %v11929_v15 = vld [vmem:[#allocation27_spill] sm:$0xff] }
 0x224   :  { %v7256_v13 = vmax.f32 %v7109_v6, %v7158_v7  ;;  %v7258_v26 = vmax.f32 %v7111_v61, %v7160_v32  ;;  %v6912_v27 = vmul.f32 %v10214_v29, %v11167_v54  ;;  %v11924_v59 = vmax.f32 %v10524_v22, %v11923_v56  ;;  %v11937_v56 = vld [vmem:[#allocation32_spill] sm:$0xff] }
 0x225   :  { %7591 = vst [vmem:[%s11696_s4 + $0x28] sm:$0xff] %v8135_v31  ;;  %v11925_v40 = vmax.f32 %v10590_v44, %v10624_v20  ;;  %v6914_v21 = vmul.f32 %v10214_v29, %v11169_v60  ;;  %v7352_v58 = vmax.f32 %v7303_v45, 0.0  ;;  %v11928_v18 = vmax.f32 %v11926_v43, %v11927_v10  ;;  %v6167_v37 = vpop.f32.mrb[164].mxu0 }
 0x226   :  { %v7304_v30 = vmax.f32 %v11924_v59, %v7255_v25  ;;  %v11931_v2 = vmax.f32 %v11929_v15, %v11930_v51  ;;  %v6208_v39 = vpop.f32.mrb[164].mxu1  ;;  %v6959_v8 = vmul.f32 %v10214_v29, %v6167_v37  ;;  %v6169_v44 = vpop.f32.mrb[165].mxu0  ;;  %v7113_v60 = vadd.f32 %v10256_v23, %v6911_v35  ;;  %v11932_v25 = vld [vmem:[#allocation28_spill] sm:$0xff] }
 0x227   :  { %v7306_v11 = vmax.f32 %v11925_v40, %v7257_v63  ;;  %v7305_v14 = vmax.f32 %v11928_v18, %v7256_v13  ;;  %v6961_v20 = vmul.f32 %v10214_v29, %v6208_v39  ;;  %v6210_v17 = vpop.f32.mrb[165].mxu1  ;;  %v6960_v53 = vmul.f32 %v10214_v29, %v6169_v44  ;;  %v6171_v12 = vpop.f32.mrb[166].mxu0  ;;  %v11933_v63 = vld [vmem:[#allocation29_spill] sm:$0xff] }
 0x228   :  { %v7307_v54 = vmax.f32 %v11931_v2, %v7258_v26  ;;  %v7353_v22 = vmax.f32 %v7304_v30, 0.0  ;;  %v6962_v24 = vmul.f32 %v10214_v29, %v6210_v17  ;;  %v6212_v4 = vpop.f32.mrb[166].mxu1  ;;  %v7114_v3 = vadd.f32 %v10256_v23, %v6912_v27  ;;  %v6172_v19 = vpop.f32.mrb[167].mxu0  ;;  %v11936_v27 = vld [vmem:[#allocation30_spill] sm:$0xff]  ;;  %v11941_v12 = vld [vmem:[#allocation79_spill] sm:$0xff] }
 0x229   :  { %v7355_v47 = vmax.f32 %v7306_v11, 0.0  ;;  %v7354_v45 = vmax.f32 %v7305_v14, 0.0  ;;  %v7161_v6 = vadd.f32 %v10256_v23, %v6959_v8  ;;  %v7163_v5 = vadd.f32 %v10256_v23, %v6961_v20  ;;  %v6213_v36 = vpop.f32.mrb[167].mxu1  ;;  %v11943_v19 = vld [vmem:[#allocation81_spill] sm:$0xff] }
 0x22a   :  { %v8136_v16 = vpack.c.bf16 %v7353_v22, %v7352_v58  ;;  %v7115_v42 = vadd.f32 %v10256_v23, %v6913_v9  ;;  %v7162_v49 = vadd.f32 %v10256_v23, %v6960_v53  ;;  %v7164_v1 = vadd.f32 %v10256_v23, %v6962_v24 }
 0x22b   :  { %v8137_v62 = vpack.c.bf16 %v7355_v47, %v7354_v45  ;;  %v7259_v55 = vmax.f32 %v7112_v48, %v7161_v6  ;;  %v7261_v28 = vmax.f32 %v7114_v3, %v7163_v5  ;;  %v7116_v34 = vadd.f32 %v10256_v23, %v6914_v21  ;;  %v11942_v6 = vld [vmem:[#allocation80_spill] sm:$0xff] }
 0x22c   :  { %7592 = vst [vmem:[%s11696_s4 + $0x30] sm:$0xff] %v8136_v16  ;;  %v6915_v38 = vmul.f32 %v10214_v29, %v11171_v50  ;;  %v7260_v61 = vmax.f32 %v7113_v60, %v7162_v49  ;;  %v7262_v31 = vmax.f32 %v7115_v42, %v7164_v1  ;;  %v6917_v7 = vmul.f32 %v10214_v29, %v11173_v33  ;;  %v11939_v33 = vld [vmem:[#allocation36_spill] sm:$0xff]  ;;  %v11944_v42 = vld [vmem:[#allocation33_spill] sm:$0xff] }
 0x22d   :  { %7593 = vst [vmem:[%s11696_s4 + $0x38] sm:$0xff] %v8137_v62  ;;  %v6916_v32 = vmul.f32 %v10214_v29, %v11175_v41  ;;  %v11934_v48 = vmax.f32 %v11932_v25, %v11933_v63  ;;  %v11935_v13 = vmax.f32 %v10669_v0, %v10700_v46  ;;  %v6918_v26 = vmul.f32 %v10214_v29, %v11177_v52  ;;  %v6249_v11 = vpop.f32.mrb[168].mxu0  ;;  %v11945_v62 = vld [vmem:[#allocation34_spill] sm:$0xff]  ;;  %v11952_v25 = vld [vmem:[#allocation37_spill] sm:$0xff] }
 0x22e   :  { %v7356_v9 = vmax.f32 %v7307_v54, 0.0  ;;  %v11938_v59 = vmax.f32 %v11936_v27, %v11937_v56  ;;  %v11940_v40 = vmax.f32 %v10707_v57, %v11939_v33  ;;  %v6290_v21 = vpop.f32.mrb[168].mxu1  ;;  %v6963_v10 = vmul.f32 %v10214_v29, %v6249_v11  ;;  %v6251_v46 = vpop.f32.mrb[169].mxu0 }
 0x22f   :  { %v7308_v35 = vmax.f32 %v11934_v48, %v7259_v55  ;;  %v7310_v50 = vmax.f32 %v11935_v13, %v7261_v28  ;;  %v6965_v0 = vmul.f32 %v10214_v29, %v6290_v21  ;;  %v6292_v18 = vpop.f32.mrb[169].mxu1  ;;  %v7117_v52 = vadd.f32 %v10256_v23, %v6915_v38  ;;  %v6253_v2 = vpop.f32.mrb[170].mxu0  ;;  %v11947_v55 = vld [vmem:[#allocation38_spill] sm:$0xff]  ;;  %v11948_v28 = vld [vmem:[#allocation40_spill] sm:$0xff] }
 0x230   :  { %v7309_v30 = vmax.f32 %v11938_v59, %v7260_v61  ;;  %v7311_v41 = vmax.f32 %v11940_v40, %v7262_v31  ;;  %v6964_v15 = vmul.f32 %v10214_v29, %v6251_v46  ;;  %v6966_v51 = vmul.f32 %v10214_v29, %v6292_v18  ;;  %v6294_v57 = vpop.f32.mrb[170].mxu1  ;;  %v6254_v47 = vpop.f32.mrb[171].mxu0  ;;  %v11950_v61 = vld [vmem:[#allocation82_spill] sm:$0xff]  ;;  %v11955_v13 = vld [vmem:[#allocation44_spill] sm:$0xff] }
 0x231   :  { %v7357_v58 = vmax.f32 %v7308_v35, 0.0  ;;  %v7359_v43 = vmax.f32 %v7310_v50, 0.0  ;;  %v7118_v54 = vadd.f32 %v10256_v23, %v6916_v32  ;;  %v7165_v39 = vadd.f32 %v10256_v23, %v6963_v10  ;;  %v6295_v8 = vpop.f32.mrb[171].mxu1  ;;  %v11951_v32 = vld [vmem:[#allocation35_spill] sm:$0xff]  ;;  %v11954_v35 = vld [vmem:[#allocation42_spill] sm:$0xff] }
 0x232   :  { %v7358_v14 = vmax.f32 %v7309_v30, 0.0  ;;  %v7167_v22 = vadd.f32 %v10256_v23, %v6965_v0  ;;  %v7119_v20 = vadd.f32 %v10256_v23, %v6917_v7  ;;  %v7166_v17 = vadd.f32 %v10256_v23, %v6964_v15  ;;  %v11957_v8 = vld [vmem:[#allocation83_spill] sm:$0xff] }
 0x233   :  { %v8138_v37 = vpack.c.bf16 %v7357_v58, %v7356_v9  ;;  %v7168_v60 = vadd.f32 %v10256_v23, %v6966_v51  ;;  %v7263_v45 = vmax.f32 %v7116_v34, %v7165_v39  ;;  %v7120_v24 = vadd.f32 %v10256_v23, %v6918_v26 }
 0x234   :  { %v8139_v44 = vpack.c.bf16 %v7359_v43, %v7358_v14  ;;  %v7265_v53 = vmax.f32 %v7118_v54, %v7167_v22  ;;  %v6919_v4 = vmul.f32 %v10214_v29, %v11941_v12  ;;  %v7264_v3 = vmax.f32 %v7117_v52, %v7166_v17 }
 0x235   :  { %7594 = vst [vmem:[%s11696_s4 + $0x40] sm:$0xff] %v8138_v37  ;;  %v7266_v16 = vmax.f32 %v7119_v20, %v7168_v60  ;;  %v6921_v5 = vmul.f32 %v10214_v29, %v11942_v6  ;;  %v6920_v36 = vmul.f32 %v10214_v29, %v11943_v19  ;;  %v11946_v49 = vmax.f32 %v11944_v42, %v11945_v62  ;;  %v6331_v9 = vpop.f32.mrb[172].mxu0  ;;  %v11958_v60 = vld [vmem:[#allocation84_spill] sm:$0xff]  ;;  %v11963_v6 = vld [vmem:[#allocation46_spill] sm:$0xff] }
 0x236   :  { %7595 = vst [vmem:[%s11696_s4 + $0x48] sm:$0xff] %v8139_v44  ;;  %v11949_v34 = vmax.f32 %v11947_v55, %v11948_v28  ;;  %v6922_v31 = vmul.f32 %v10214_v29, %v11950_v61  ;;  %v7360_v7 = vmax.f32 %v7311_v41, 0.0  ;;  %v11953_v63 = vmax.f32 %v11951_v32, %v11952_v25  ;;  %v6372_v27 = vpop.f32.mrb[172].mxu1  ;;  %v6333_v40 = vpop.f32.mrb[173].mxu0  ;;  %v11966_v42 = vld [vmem:[#allocation86_spill] sm:$0xff]  ;;  %v11968_v55 = vld [vmem:[#allocation45_spill] sm:$0xff] }
 0x237   :  { %v7312_v1 = vmax.f32 %v11946_v49, %v7263_v45  ;;  %v11956_v50 = vmax.f32 %v11954_v35, %v11955_v13  ;;  %v6967_v30 = vmul.f32 %v10214_v29, %v6331_v9  ;;  %v6969_v33 = vmul.f32 %v10214_v29, %v6372_v27  ;;  %v6374_v11 = vpop.f32.mrb[173].mxu1  ;;  %v6335_v10 = vpop.f32.mrb[174].mxu0  ;;  %v11971_v61 = vld [vmem:[#allocation52_spill] sm:$0xff] }
 0x238   :  { %v7314_v38 = vmax.f32 %v11949_v34, %v7265_v53  ;;  %v7313_v48 = vmax.f32 %v11953_v63, %v7264_v3  ;;  %v7121_v41 = vadd.f32 %v10256_v23, %v6919_v4  ;;  %v6968_v58 = vmul.f32 %v10214_v29, %v6333_v40  ;;  %v6376_v0 = vpop.f32.mrb[174].mxu1  ;;  %v6336_v15 = vpop.f32.mrb[175].mxu0  ;;  %v11959_v53 = vld [vmem:[#allocation85_spill] sm:$0xff]  ;;  %v11960_v4 = vld [vmem:[#allocation39_spill] sm:$0xff] }
 0x239   :  { %v7315_v26 = vmax.f32 %v11956_v50, %v7266_v16  ;;  %v7361_v56 = vmax.f32 %v7312_v1, 0.0  ;;  %v6970_v43 = vmul.f32 %v10214_v29, %v6374_v11  ;;  %v7122_v46 = vadd.f32 %v10256_v23, %v6920_v36  ;;  %v6377_v51 = vpop.f32.mrb[175].mxu1  ;;  %v11967_v1 = vld [vmem:[#allocation43_spill] sm:$0xff] }
 0x23a   :  { %v7363_v59 = vmax.f32 %v7314_v38, 0.0  ;;  %v7362_v21 = vmax.f32 %v7313_v48, 0.0  ;;  %v7169_v52 = vadd.f32 %v10256_v23, %v6967_v30  ;;  %v7171_v14 = vadd.f32 %v10256_v23, %v6969_v33  ;;  %v11970_v38 = vld [vmem:[#allocation50_spill] sm:$0xff]  ;;  %v11973_v51 = vld [vmem:[#allocation87_spill] sm:$0xff] }
 0x23b   :  { %v8140_v18 = vpack.c.bf16 %v7361_v56, %v7360_v7  ;;  %v7123_v2 = vadd.f32 %v10256_v23, %v6921_v5  ;;  %v7170_v54 = vadd.f32 %v10256_v23, %v6968_v58  ;;  %v7172_v37 = vadd.f32 %v10256_v23, %v6970_v43  ;;  %v11964_v5 = vld [vmem:[#allocation48_spill] sm:$0xff] }
 0x23c   :  { %v8141_v57 = vpack.c.bf16 %v7363_v59, %v7362_v21  ;;  %v7267_v39 = vmax.f32 %v7120_v24, %v7169_v52  ;;  %v7269_v22 = vmax.f32 %v7122_v46, %v7171_v14  ;;  %v7124_v47 = vadd.f32 %v10256_v23, %v6922_v31  ;;  %v11961_v24 = vld [vmem:[#allocation41_spill] sm:$0xff] }
 0x23d   :  { %7596 = vst [vmem:[%s11696_s4 + $0x50] sm:$0xff] %v8140_v18  ;;  %v6923_v20 = vmul.f32 %v10214_v29, %v11957_v8  ;;  %v7268_v44 = vmax.f32 %v7121_v41, %v7170_v54  ;;  %v7270_v17 = vmax.f32 %v7123_v2, %v7172_v37  ;;  %v6925_v45 = vmul.f32 %v10214_v29, %v11958_v60  ;;  %v6413_v32 = vpop.f32.mrb[176].mxu0  ;;  %v11974_v37 = vld [vmem:[#allocation88_spill] sm:$0xff]  ;;  %v11979_v60 = vld [vmem:[#allocation54_spill] sm:$0xff] }
 0x23e   :  { %7597 = vst [vmem:[%s11696_s4 + $0x58] sm:$0xff] %v8141_v57  ;;  %v6924_v12 = vmul.f32 %v10214_v29, %v11959_v53  ;;  %v11962_v3 = vmax.f32 %v11960_v4, %v11961_v24  ;;  %v11965_v19 = vmax.f32 %v11963_v6, %v11964_v5  ;;  %v6926_v62 = vmul.f32 %v10214_v29, %v11966_v42  ;;  %v6454_v25 = vpop.f32.mrb[176].mxu1  ;;  %v6415_v50 = vpop.f32.mrb[177].mxu0  ;;  %v11982_v4 = vld [vmem:[#allocation90_spill] sm:$0xff]  ;;  %v11984_v6 = vld [vmem:[#allocation53_spill] sm:$0xff]  ;;  %v11987_v42 = vld [vmem:[#allocation60_spill] sm:$0xff] }
 0x23f   :  { %v7364_v49 = vmax.f32 %v7315_v26, 0.0  ;;  %v11969_v28 = vmax.f32 %v11967_v1, %v11968_v55  ;;  %v11972_v31 = vmax.f32 %v11970_v38, %v11971_v61  ;;  %v6971_v35 = vmul.f32 %v10214_v29, %v6413_v32  ;;  %v6456_v9 = vpop.f32.mrb[177].mxu1  ;;  %v6417_v30 = vpop.f32.mrb[178].mxu0 }
 0x240   :  { %v7316_v16 = vmax.f32 %v11962_v3, %v7267_v39  ;;  %v7318_v36 = vmax.f32 %v11965_v19, %v7269_v22  ;;  %v6973_v13 = vmul.f32 %v10214_v29, %v6454_v25  ;;  %v7125_v26 = vadd.f32 %v10256_v23, %v6923_v20  ;;  %v6458_v33 = vpop.f32.mrb[178].mxu1  ;;  %v6418_v58 = vpop.f32.mrb[179].mxu0  ;;  %v11975_v22 = vld [vmem:[#allocation89_spill] sm:$0xff]  ;;  %v11976_v20 = vld [vmem:[#allocation47_spill] sm:$0xff] }
 0x241   :  { %v7317_v34 = vmax.f32 %v11969_v28, %v7268_v44  ;;  %v7319_v7 = vmax.f32 %v11972_v31, %v7270_v17  ;;  %v6972_v56 = vmul.f32 %v10214_v29, %v6415_v50  ;;  %v6974_v59 = vmul.f32 %v10214_v29, %v6456_v9  ;;  %v6459_v43 = vpop.f32.mrb[179].mxu1 }
 0x242   :  { %v7365_v63 = vmax.f32 %v7316_v16, 0.0  ;;  %v7367_v48 = vmax.f32 %v7318_v36, 0.0  ;;  %v7126_v40 = vadd.f32 %v10256_v23, %v6924_v12  ;;  %v7173_v41 = vadd.f32 %v10256_v23, %v6971_v35  ;;  %v11983_v16 = vld [vmem:[#allocation51_spill] sm:$0xff]  ;;  %v11986_v36 = vld [vmem:[#allocation58_spill] sm:$0xff] }
 0x243   :  { %v7366_v27 = vmax.f32 %v7317_v34, 0.0  ;;  %v7175_v21 = vadd.f32 %v10256_v23, %v6973_v13  ;;  %v7127_v10 = vadd.f32 %v10256_v23, %v6925_v45  ;;  %v7174_v46 = vadd.f32 %v10256_v23, %v6972_v56  ;;  %v11980_v45 = vld [vmem:[#allocation56_spill] sm:$0xff]  ;;  %v11989_v43 = vld [vmem:[#allocation91_spill] sm:$0xff] }
 0x244   :  { %v8142_v11 = vpack.c.bf16 %v7365_v63, %v7364_v49  ;;  %v7176_v18 = vadd.f32 %v10256_v23, %v6974_v59  ;;  %v7271_v52 = vmax.f32 %v7124_v47, %v7173_v41  ;;  %v7128_v15 = vadd.f32 %v10256_v23, %v6926_v62  ;;  %v11977_v47 = vld [vmem:[#allocation49_spill] sm:$0xff] }
 0x245   :  { %v8143_v0 = vpack.c.bf16 %v7367_v48, %v7366_v27  ;;  %v7273_v14 = vmax.f32 %v7126_v40, %v7175_v21  ;;  %v6927_v2 = vmul.f32 %v10214_v29, %v11973_v51  ;;  %v7272_v57 = vmax.f32 %v7125_v26, %v7174_v46  ;;  %v6495_v1 = vpop.f32.mrb[180].mxu0 }
 0x246   :  { %7598 = vst [vmem:[%s11696_s4 + $0x60] sm:$0xff] %v8142_v11  ;;  %v7274_v54 = vmax.f32 %v7127_v10, %v7176_v18  ;;  %v6929_v39 = vmul.f32 %v10214_v29, %v11974_v37  ;;  %v6928_v8 = vmul.f32 %v10214_v29, %v11975_v22  ;;  %v11978_v44 = vmax.f32 %v11976_v20, %v11977_v47  ;;  %v6536_v55 = vpop.f32.mrb[180].mxu1  ;;  %v6497_v31 = vpop.f32.mrb[181].mxu0  ;;  %v11990_v18 = vld [vmem:[#allocation92_spill] sm:$0xff]  ;;  %v11995_v37 = vld [vmem:[#allocation2_spill] sm:$0xff] }
 0x247   :  { %7599 = vst [vmem:[%s11696_s4 + $0x68] sm:$0xff] %v8143_v0  ;;  %v11981_v53 = vmax.f32 %v11979_v60, %v11980_v45  ;;  %v6930_v24 = vmul.f32 %v10214_v29, %v11982_v4  ;;  %v7368_v3 = vmax.f32 %v7319_v7, 0.0  ;;  %v11985_v5 = vmax.f32 %v11983_v16, %v11984_v6  ;;  %v6538_v32 = vpop.f32.mrb[181].mxu1  ;;  %v6499_v35 = vpop.f32.mrb[182].mxu0  ;;  %v11998_v20 = vld [vmem:[#allocation94_spill] sm:$0xff]  ;;  %v12000_v60 = vld [vmem:[#allocation61_spill] sm:$0xff] }
 0x248   :  { %v7320_v17 = vmax.f32 %v11978_v44, %v7271_v52  ;;  %v11988_v62 = vmax.f32 %v11986_v36, %v11987_v42  ;;  %v6975_v38 = vmul.f32 %v10214_v29, %v6495_v1  ;;  %v6977_v61 = vmul.f32 %v10214_v29, %v6536_v55  ;;  %v6540_v13 = vpop.f32.mrb[182].mxu1  ;;  %v6500_v56 = vpop.f32.mrb[183].mxu0  ;;  %v12003_v4 = vld [vmem:[#allocation67_spill] sm:$0xff] }
 0x249   :  { %v7322_v12 = vmax.f32 %v11981_v53, %v7273_v14  ;;  %v7321_v19 = vmax.f32 %v11985_v5, %v7272_v57  ;;  %v7129_v7 = vadd.f32 %v10256_v23, %v6927_v2  ;;  %v6976_v63 = vmul.f32 %v10214_v29, %v6497_v31  ;;  %v6541_v59 = vpop.f32.mrb[183].mxu1  ;;  %v11991_v14 = vld [vmem:[#allocation93_spill] sm:$0xff]  ;;  %v11992_v2 = vld [vmem:[#allocation55_spill] sm:$0xff] }
 0x24a   :  { %v7323_v49 = vmax.f32 %v11988_v62, %v7274_v54  ;;  %v7369_v28 = vmax.f32 %v7320_v17, 0.0  ;;  %v6978_v48 = vmul.f32 %v10214_v29, %v6538_v32  ;;  %v7130_v50 = vadd.f32 %v10256_v23, %v6928_v8  ;;  %v11999_v17 = vld [vmem:[#allocation59_spill] sm:$0xff] }
 0x24b   :  { %v7371_v34 = vmax.f32 %v7322_v12, 0.0  ;;  %v7370_v25 = vmax.f32 %v7321_v19, 0.0  ;;  %v7177_v26 = vadd.f32 %v10256_v23, %v6975_v38  ;;  %v7179_v27 = vadd.f32 %v10256_v23, %v6977_v61  ;;  %v12002_v12 = vld [vmem:[#allocation65_spill] sm:$0xff]  ;;  %v12005_v59 = vld [vmem:[#allocation95_spill] sm:$0xff] }
 0x24c   :  { %v8144_v9 = vpack.c.bf16 %v7369_v28, %v7368_v3  ;;  %v7131_v30 = vadd.f32 %v10256_v23, %v6929_v39  ;;  %v7178_v40 = vadd.f32 %v10256_v23, %v6976_v63  ;;  %v7180_v11 = vadd.f32 %v10256_v23, %v6978_v48  ;;  %v11996_v39 = vld [vmem:[#allocation63_spill] sm:$0xff] }
 0x24d   :  { %v8145_v33 = vpack.c.bf16 %v7371_v34, %v7370_v25  ;;  %v7275_v41 = vmax.f32 %v7128_v15, %v7177_v26  ;;  %v7277_v21 = vmax.f32 %v7130_v50, %v7179_v27  ;;  %v7132_v58 = vadd.f32 %v10256_v23, %v6930_v24  ;;  %v11993_v15 = vld [vmem:[#allocation57_spill] sm:$0xff]  ;;  %v6577_v16 = vpop.f32.mrb[184].mxu0 }
 0x24e   :  { %7600 = vst [vmem:[%s11696_s4 + $0x70] sm:$0xff] %v8144_v9  ;;  %v6931_v10 = vmul.f32 %v10214_v29, %v11989_v43  ;;  %v7276_v0 = vmax.f32 %v7129_v7, %v7178_v40  ;;  %v7278_v46 = vmax.f32 %v7131_v30, %v7180_v11  ;;  %v6933_v52 = vmul.f32 %v10214_v29, %v11990_v18  ;;  %v6618_v6 = vpop.f32.mrb[184].mxu1  ;;  %v6579_v62 = vpop.f32.mrb[185].mxu0  ;;  %v12006_v11 = vld [vmem:[#allocation96_spill] sm:$0xff]  ;;  %v12011_v18 = vld [vmem:[#allocation3_spill] sm:$0xff] }
 0x24f   :  { %7601 = vst [vmem:[%s11696_s4 + $0x78] sm:$0xff] %v8145_v33  ;;  %v6932_v51 = vmul.f32 %v10214_v29, %v11991_v14  ;;  %v11994_v57 = vmax.f32 %v11992_v2, %v11993_v15  ;;  %v11997_v22 = vmax.f32 %v11995_v37, %v11996_v39  ;;  %v6934_v47 = vmul.f32 %v10214_v29, %v11998_v20  ;;  %v6620_v1 = vpop.f32.mrb[185].mxu1  ;;  %v6581_v38 = vpop.f32.mrb[186].mxu0  ;;  %v12014_v2 = vld [vmem:[#allocation98_spill] sm:$0xff]  ;;  %v12016_v37 = vld [vmem:[#allocation68_spill] sm:$0xff]  ;;  %v12019_v20 = vld [vmem:[#allocation71_spill] sm:$0xff] }
 0x250   :  { %v7372_v44 = vmax.f32 %v7323_v49, 0.0  ;;  %v12001_v45 = vmax.f32 %v11999_v17, %v12000_v60  ;;  %v12004_v24 = vmax.f32 %v12002_v12, %v12003_v4  ;;  %v6979_v36 = vmul.f32 %v10214_v29, %v6577_v16  ;;  %v6622_v61 = vpop.f32.mrb[186].mxu1  ;;  %v6582_v63 = vpop.f32.mrb[187].mxu0 }
 0x251   :  { %v7324_v54 = vmax.f32 %v11994_v57, %v7275_v41  ;;  %v7326_v8 = vmax.f32 %v11997_v22, %v7277_v21  ;;  %v6981_v42 = vmul.f32 %v10214_v29, %v6618_v6  ;;  %v7133_v49 = vadd.f32 %v10256_v23, %v6931_v10  ;;  %v6623_v48 = vpop.f32.mrb[187].mxu1  ;;  %v12007_v21 = vld [vmem:[#allocation97_spill] sm:$0xff]  ;;  %v12008_v10 = vld [vmem:[#allocation62_spill] sm:$0xff]  ;;  %v12021_v63 = vld [vmem:[#allocation99_spill] sm:$0xff] }
 0x252   :  { %v7325_v53 = vmax.f32 %v12001_v45, %v7276_v0  ;;  %v7327_v3 = vmax.f32 %v12004_v24, %v7278_v46  ;;  %v6980_v28 = vmul.f32 %v10214_v29, %v6579_v62  ;;  %v6982_v34 = vmul.f32 %v10214_v29, %v6620_v1 }
 0x253   :  { %v7373_v5 = vmax.f32 %v7324_v54, 0.0  ;;  %v7375_v19 = vmax.f32 %v7326_v8, 0.0  ;;  %v7134_v31 = vadd.f32 %v10256_v23, %v6932_v51  ;;  %v7181_v7 = vadd.f32 %v10256_v23, %v6979_v36  ;;  %v12015_v54 = vld [vmem:[#allocation66_spill] sm:$0xff]  ;;  %v12018_v8 = vld [vmem:[#allocation69_spill] sm:$0xff] }
 0x254   :  { %v7374_v55 = vmax.f32 %v7325_v53, 0.0  ;;  %v7183_v25 = vadd.f32 %v10256_v23, %v6981_v42  ;;  %v7135_v35 = vadd.f32 %v10256_v23, %v6933_v52  ;;  %v7182_v50 = vadd.f32 %v10256_v23, %v6980_v28  ;;  %v12012_v52 = vld [vmem:[#allocation4_spill] sm:$0xff] }
 0x255   :  { %v8146_v32 = vpack.c.bf16 %v7373_v5, %v7372_v44  ;;  %v7184_v9 = vadd.f32 %v10256_v23, %v6982_v34  ;;  %v7279_v26 = vmax.f32 %v7132_v58, %v7181_v7  ;;  %v7136_v56 = vadd.f32 %v10256_v23, %v6934_v47  ;;  %v12009_v58 = vld [vmem:[#allocation64_spill] sm:$0xff]  ;;  %v6659_v17 = vpop.f32.mrb[188].mxu0 }
 0x256   :  { %v8147_v13 = vpack.c.bf16 %v7375_v19, %v7374_v55  ;;  %v7281_v27 = vmax.f32 %v7134_v31, %v7183_v25  ;;  %v6935_v30 = vmul.f32 %v10214_v29, %v12005_v59  ;;  %v7280_v33 = vmax.f32 %v7133_v49, %v7182_v50  ;;  %v6700_v60 = vpop.f32.mrb[188].mxu1  ;;  %v6661_v24 = vpop.f32.mrb[189].mxu0  ;;  %v12024_v59 = vld [vmem:[#allocation5_spill] sm:$0xff] }
 0x257   :  { %7602 = vst [vmem:[%s11696_s4 + $0x80] sm:$0xff] %v8146_v32  ;;  %v7282_v40 = vmax.f32 %v7135_v35, %v7184_v9  ;;  %v6937_v41 = vmul.f32 %v10214_v29, %v12006_v11  ;;  %v6936_v43 = vmul.f32 %v10214_v29, %v12007_v21  ;;  %v12010_v0 = vmax.f32 %v12008_v10, %v12009_v58  ;;  %v6702_v16 = vpop.f32.mrb[189].mxu1  ;;  %v6663_v36 = vpop.f32.mrb[190].mxu0  ;;  %v12022_v9 = vld [vmem:[#allocation101_spill] sm:$0xff]  ;;  %v12029_v21 = vld [vmem:[#allocation100_spill] sm:$0xff]  ;;  %v12030_v58 = vld [vmem:[#allocation70_spill] sm:$0xff] }
 0x258   :  { %7603 = vst [vmem:[%s11696_s4 + $0x88] sm:$0xff] %v8147_v13  ;;  %v12013_v14 = vmax.f32 %v12011_v18, %v12012_v52  ;;  %v6938_v15 = vmul.f32 %v10214_v29, %v12014_v2  ;;  %v7376_v57 = vmax.f32 %v7327_v3, 0.0  ;;  %v12017_v39 = vmax.f32 %v12015_v54, %v12016_v37  ;;  %v6704_v42 = vpop.f32.mrb[190].mxu1  ;;  %v6664_v28 = vpop.f32.mrb[191].mxu0  ;;  %v12033_v52 = vld [vmem:[#allocation73_spill] sm:$0xff] }
 0x259   :  { %v7328_v46 = vmax.f32 %v12010_v0, %v7279_v26  ;;  %v12020_v47 = vmax.f32 %v12018_v8, %v12019_v20  ;;  %v6983_v12 = vmul.f32 %v10214_v29, %v6659_v17  ;;  %v6985_v4 = vmul.f32 %v10214_v29, %v6700_v60  ;;  %v6705_v34 = vpop.f32.mrb[191].mxu1  ;;  %v12031_v0 = vld [vmem:[#allocation72_spill] sm:$0xff]  ;;  %v12037_v28 = vld [vmem:[#allocation9_spill] sm:$0xff] }
 0x25a   :  { %v7330_v51 = vmax.f32 %v12013_v14, %v7281_v27  ;;  %v7329_v22 = vmax.f32 %v12017_v39, %v7280_v33  ;;  %v7137_v3 = vadd.f32 %v10256_v23, %v6935_v30  ;;  %v6984_v5 = vmul.f32 %v10214_v29, %v6661_v24  ;;  %v12023_v27 = vld [vmem:[#allocation6_spill] sm:$0xff]  ;;  %v12034_v14 = vld [vmem:[#allocation75_spill] sm:$0xff] }
 0x25b   :  { %v7331_v44 = vmax.f32 %v12020_v47, %v7282_v40  ;;  %v7377_v45 = vmax.f32 %v7328_v46, 0.0  ;;  %v6986_v19 = vmul.f32 %v10214_v29, %v6702_v16  ;;  %v7138_v62 = vadd.f32 %v10256_v23, %v6936_v43  ;;  %v12027_v40 = vld [vmem:[#allocation8_spill] sm:$0xff] }
 0x25c   :  { %v7379_v53 = vmax.f32 %v7330_v51, 0.0  ;;  %v7378_v6 = vmax.f32 %v7329_v22, 0.0  ;;  %v7185_v49 = vadd.f32 %v10256_v23, %v6983_v12  ;;  %v7187_v55 = vadd.f32 %v10256_v23, %v6985_v4 }
 0x25d   :  { %v8148_v1 = vpack.c.bf16 %v7377_v45, %v7376_v57  ;;  %v7139_v38 = vadd.f32 %v10256_v23, %v6937_v41  ;;  %v7186_v31 = vadd.f32 %v10256_v23, %v6984_v5  ;;  %v7188_v32 = vadd.f32 %v10256_v23, %v6986_v19 }
 0x25e   :  { %v8149_v61 = vpack.c.bf16 %v7379_v53, %v7378_v6  ;;  %v7283_v7 = vmax.f32 %v7136_v56, %v7185_v49  ;;  %v7285_v25 = vmax.f32 %v7138_v62, %v7187_v55  ;;  %v6939_v48 = vmul.f32 %v10214_v29, %v12021_v63  ;;  %v12026_v56 = vld [vmem:[#allocation7_spill] sm:$0xff]  ;;  %v6782_v57 = vpop.f32.mrb[192].mxu1  ;;  %v12036_v55 = vld [vmem:[#allocation10_spill] sm:$0xff] }
 0x25f   :  { %7604 = vst [vmem:[%s11696_s4 + $0x90] sm:$0xff] %v8148_v1  ;;  %v7284_v35 = vmax.f32 %v7137_v3, %v7186_v31  ;;  %v7286_v13 = vmax.f32 %v7139_v38, %v7188_v32  ;;  %v7140_v50 = vadd.f32 %v10256_v23, %v6938_v15  ;;  %v6940_v26 = vmul.f32 %v10214_v29, %v12022_v9  ;;  %v6741_v15 = vpop.f32.mrb[192].mxu0  ;;  %v6784_v20 = vpop.f32.mrb[193].mxu1  ;;  %v12040_v31 = vld [vmem:[#allocation12_spill] sm:$0xff] }
 0x260   :  { %7605 = vst [vmem:[%s11696_s4 + $0x98] sm:$0xff] %v8149_v61  ;;  %v12025_v30 = vmax.f32 %v12023_v27, %v12024_v59  ;;  %v12028_v11 = vmax.f32 %v12026_v56, %v12027_v40  ;;  %v6941_v43 = vmul.f32 %v10214_v29, %v12029_v21  ;;  %v7380_v10 = vmax.f32 %v7331_v44, 0.0  ;;  %v6743_v8 = vpop.f32.mrb[193].mxu0  ;;  %v6786_v53 = vpop.f32.mrb[194].mxu1  ;;  %v12039_v61 = vld [vmem:[#allocation11_spill] sm:$0xff] }
 0x261   :  { %v12032_v46 = vmax.f32 %v12030_v58, %v12031_v0  ;;  %v12035_v51 = vmax.f32 %v12033_v52, %v12034_v14  ;;  %v6987_v39 = vmul.f32 %v10214_v29, %v6741_v15  ;;  %v6989_v22 = vmul.f32 %v10214_v29, %v6782_v57  ;;  %v6745_v45 = vpop.f32.mrb[194].mxu0  ;;  %v6787_v6 = vpop.f32.mrb[195].mxu1 }
 0x262   :  { %v7332_v33 = vmax.f32 %v12025_v30, %v7283_v7  ;;  %v7334_v41 = vmax.f32 %v12028_v11, %v7285_v25  ;;  %v7141_v47 = vadd.f32 %v10256_v23, %v6939_v48  ;;  %v6988_v17 = vmul.f32 %v10214_v29, %v6743_v8  ;;  %v6746_v3 = vpop.f32.mrb[195].mxu0  ;;  %v12042_v7 = vld [vmem:[#allocation74_spill] sm:$0xff]  ;;  %v12043_v25 = vld [vmem:[#allocation76_spill] sm:$0xff] }
 0x263   :  { %v7333_v18 = vmax.f32 %v12032_v46, %v7284_v35  ;;  %v7335_v2 = vmax.f32 %v12035_v51, %v7286_v13  ;;  %v6990_v60 = vmul.f32 %v10214_v29, %v6784_v20  ;;  %v7142_v12 = vadd.f32 %v10256_v23, %v6940_v26  ;;  %v12045_v35 = vld [vmem:[#allocation77_spill] sm:$0xff]  ;;  %v12046_v13 = vld [vmem:[#allocation78_spill] sm:$0xff] }
 0x264   :  { %v7381_v54 = vmax.f32 %v7332_v33, 0.0  ;;  %v7383_v37 = vmax.f32 %v7334_v41, 0.0  ;;  %v7189_v24 = vadd.f32 %v10256_v23, %v6987_v39  ;;  %v7191_v16 = vadd.f32 %v10256_v23, %v6989_v22 }
 0x265   :  { %v7382_v44 = vmax.f32 %v7333_v18, 0.0  ;;  %v7143_v5 = vadd.f32 %v10256_v23, %v6941_v43  ;;  %v7190_v36 = vadd.f32 %v10256_v23, %v6988_v17  ;;  %v7192_v42 = vadd.f32 %v10256_v23, %v6990_v60 }
 0x266   :  { %v8150_v4 = vpack.c.bf16 %v7381_v54, %v7380_v10  ;;  %v7287_v29 = vmax.f32 %v7140_v50, %v7189_v24  ;;  %v7289_v62 = vmax.f32 %v7142_v12, %v7191_v16  ;;  %v12038_v34 = vmax.f32 %v12036_v55, %v12037_v28 }
 0x267   :  { %v8151_v19 = vpack.c.bf16 %v7383_v37, %v7382_v44  ;;  %v7288_v1 = vmax.f32 %v7141_v47, %v7190_v36  ;;  %v7290_v49 = vmax.f32 %v7143_v5, %v7192_v42  ;;  %v12041_v32 = vmax.f32 %v12039_v61, %v12040_v31 }
 0x268   :  { %7606 = vst [vmem:[%s11696_s4 + $0xa0] sm:$0xff] %v8150_v4  ;;  %v7336_v38 = vmax.f32 %v12038_v34, %v7287_v29  ;;  %v12044_v63 = vmax.f32 %v12042_v7, %v12043_v25  ;;  %v12047_v50 = vmax.f32 %v12045_v35, %v12046_v13  ;;  %v7384_v26 = vmax.f32 %v7335_v2, 0.0 }
 0x269   :  { %7607 = vst [vmem:[%s11696_s4 + $0xa8] sm:$0xff] %v8151_v19  ;;  %v7338_v23 = vmax.f32 %v12041_v32, %v7289_v62 }
 0x26a   :  { %v7337_v48 = vmax.f32 %v12044_v63, %v7288_v1  ;;  %v7339_v9 = vmax.f32 %v12047_v50, %v7290_v49  ;;  %v7385_v27 = vmax.f32 %v7336_v38, 0.0 }
 0x26b   :  { %v7387_v59 = vmax.f32 %v7338_v23, 0.0 }
 0x26c   :  { %v7386_v30 = vmax.f32 %v7337_v48, 0.0  ;;  %v7388_v33 = vmax.f32 %v7339_v9, 0.0  ;;  %v8152_v56 = vpack.c.bf16 %v7385_v27, %v7384_v26 }
 0x26e   :  { %v8153_v40 = vpack.c.bf16 %v7387_v59, %v7386_v30  ;;  %v8154_v11 = vpack.c.bf16 %v7388_v33, %v7388_v33  ;;  %7608 = vst [vmem:[%s11696_s4 + $0xb0] sm:$0xff] %v8152_v56 }
 0x270   :  { %7609 = vst [vmem:[%s11696_s4 + $0xb8] sm:$0xff] %v8153_v40  ;;  %7610 = vst [vmem:[%s11696_s4 + $0xc0] sm:$0xf] %v8154_v11 }

// kernel: femnist_forward.3
= control target key start
LH: loop header
LB: loop body
LE: loop exit
PB: predicated region body
PF: predicated region fallthrough
CT: control target
= control target key end

     0   :  { %vm964_vm0 = vcmask 261120   ;;  %s2172_s1 = inlined_call_operand.vmem [shape: bf16[1568,128], index: 1, kind: input, shape index: {}]   ;;  %s2173_s0 = inlined_call_operand.vmem [shape: bf16[32,1568], index: 0, kind: input, shape index: {}]   ;;  %s2174_s2 = inlined_call_operand.vmem [shape: f32[1,128], index: 2, kind: input, shape index: {}]   ;;  %s2175_s3 = inlined_call_operand.vmem [shape: f32[32,128], index: 3, kind: output, shape index: {}]  }
   0x1   :  { %v1629_v0 = vld [vmem:[%s2172_s1 + $0x40] sm:$0xff]   ;;  %v1633_v4 = vld [vmem:[%s2172_s1 + $0x48] sm:$0xff]   ;;  %v1637_v8 = vld [vmem:[%s2172_s1 + $0x50] sm:$0xff]  }
   0x2   :  { %v1630_v1 = vld [vmem:[%s2172_s1] sm:$0xff]   ;;  %1449 = vmatprep.subr.bf16.mxu0 %v1629_v0  ;;  %v1634_v5 = vld [vmem:[%s2172_s1 + $0x8] sm:$0xff]   ;;  %v1638_v9 = vld [vmem:[%s2172_s1 + $0x10] sm:$0xff]  }
   0x3   :  { %v1631_v2 = vld [vmem:[%s2172_s1 + $0xc0] sm:$0xff]   ;;  %1450 = vmatpush3.bf16.msra.mxu0 %v1630_v1  ;;  %v1635_v6 = vld [vmem:[%s2172_s1 + $0xc8] sm:$0xff]   ;;  %v1639_v10 = vld [vmem:[%s2172_s1 + $0xd0] sm:$0xff]  }
   0x4   :  { %v1632_v3 = vld [vmem:[%s2172_s1 + $0x80] sm:$0xff]   ;;  %1477 = vmatprep.subr.bf16.mxu1 %v1631_v2  ;;  %1451 = vmatprep.subr.bf16.mxu0 %v1633_v4  ;;  %v1636_v7 = vld [vmem:[%s2172_s1 + $0x88] sm:$0xff]   ;;  %v1640_v11 = vld [vmem:[%s2172_s1 + $0x90] sm:$0xff]  }
   0x5   :  { %1478 = vmatpush3.bf16.msra.mxu1 %v1632_v3  ;;  %v1641_v12 = vld [vmem:[%s2172_s1 + $0x58] sm:$0xff]   ;;  %v1645_v16 = vld [vmem:[%s2172_s1 + $0x60] sm:$0xff]   ;;  %v1649_v20 = vld [vmem:[%s2172_s1 + $0x68] sm:$0xff]  }
   0x6   :  { %1479 = vmatprep.subr.bf16.mxu1 %v1635_v6  ;;  %v1642_v13 = vld [vmem:[%s2172_s1 + $0x18] sm:$0xff]   ;;  %v1646_v17 = vld [vmem:[%s2172_s1 + $0x20] sm:$0xff]   ;;  %v1650_v21 = vld [vmem:[%s2172_s1 + $0x28] sm:$0xff]  }
   0x7   :  { %1452 = vmatpush3.bf16.msra.mxu0 %v1634_v5  ;;  %v1643_v14 = vld [vmem:[%s2172_s1 + $0xd8] sm:$0xff]   ;;  %v1647_v18 = vld [vmem:[%s2172_s1 + $0xe0] sm:$0xff]   ;;  %v1651_v22 = vld [vmem:[%s2172_s1 + $0xe8] sm:$0xff]  }
   0x8   :  { %1453 = vmatprep.subr.bf16.mxu0 %v1637_v8  ;;  %v1644_v15 = vld [vmem:[%s2172_s1 + $0x98] sm:$0xff]   ;;  %v1648_v19 = vld [vmem:[%s2172_s1 + $0xa0] sm:$0xff]   ;;  %v1652_v23 = vld [vmem:[%s2172_s1 + $0xa8] sm:$0xff]  }
   0x9   :  { %1480 = vmatpush3.bf16.msra.mxu1 %v1636_v7  ;;  %v1653_v24 = vld [vmem:[%s2172_s1 + $0x70] sm:$0xff]   ;;  %v1657_v28 = vld [vmem:[%s2172_s1 + $0x78] sm:$0xff]   ;;  %v1664_v34 = vld [vmem:[%s2172_s1 + $0x140] sm:$0xff]  }
   0xa   :  { %1481 = vmatprep.subr.bf16.mxu1 %v1639_v10  ;;  %v1654_v25 = vld [vmem:[%s2172_s1 + $0x30] sm:$0xff]   ;;  %v1658_v29 = vld [vmem:[%s2172_s1 + $0x38] sm:$0xff]   ;;  %v1667_v36 = vld [vmem:[%s2173_s0 + $0xc] ss:$52 sps:$4 sm:$0xff]  }
   0xb   :  { %1454 = vmatpush3.bf16.msra.mxu0 %v1638_v9  ;;  %v1655_v26 = vld [vmem:[%s2172_s1 + $0xf0] sm:$0xff]   ;;  %v1659_v30 = vld [vmem:[%s2172_s1 + $0xf8] sm:$0xff]   ;;  %v1668_v37 = vld [vmem:[%s2172_s1 + $0x100] sm:$0xff]   ;;  %1052 = vmatprep.mubr.bf16.mxu1 %v1667_v36 }
   0xc   :  { %1455 = vmatprep.subr.bf16.mxu0 %v1641_v12  ;;  %v1656_v27 = vld [vmem:[%s2172_s1 + $0xb0] sm:$0xff]   ;;  %v1662_v32 = vld [vmem:[%s2173_s0 + $0x4] ss:$52 sps:$4 sm:$0xff]   ;;  %v1665_v35 = vld [vmem:[%s2173_s0 + $0x8] ss:$52 sps:$4 sm:$0xff]  }
   0xd   :  { %1482 = vmatpush3.bf16.msra.mxu1 %v1640_v11  ;;  %v1660_v31 = vld [vmem:[%s2173_s0] ss:$52 sps:$4 sm:$0xff]   ;;  %v1663_v33 = vld [vmem:[%s2172_s1 + $0xb8] sm:$0xff]   ;;  %1003 = vmatprep.mubr.bf16.mxu0 %v1662_v32  ;;  %v1671_v40 = vld [vmem:[%s2172_s1 + $0x148] sm:$0xff]  }
   0xe   :  { %1483 = vmatprep.subr.bf16.mxu1 %v1643_v14  ;;  %v1669_v38 = vld [vmem:[%s2172_s1 + $0x1c0] sm:$0xff]   ;;  %v1672_v41 = vld [vmem:[%s2172_s1 + $0x108] sm:$0xff]   ;;  %v1675_v44 = vld [vmem:[%s2172_s1 + $0x150] sm:$0xff]  }
   0xf   :  { %1456 = vmatpush3.bf16.msra.mxu0 %v1642_v13  ;;  %v1670_v39 = vld [vmem:[%s2172_s1 + $0x180] sm:$0xff]   ;;  %v1673_v42 = vld [vmem:[%s2172_s1 + $0x1c8] sm:$0xff]   ;;  %v1676_v45 = vld [vmem:[%s2172_s1 + $0x110] sm:$0xff]  }
  0x10   :  { %1457 = vmatprep.subr.bf16.mxu0 %v1645_v16  ;;  %v1674_v43 = vld [vmem:[%s2172_s1 + $0x188] sm:$0xff]   ;;  %v1677_v46 = vld [vmem:[%s2172_s1 + $0x1d0] sm:$0xff]   ;;  %v1679_v48 = vld [vmem:[%s2172_s1 + $0x158] sm:$0xff]  }
  0x11   :  { %1484 = vmatpush3.bf16.msra.mxu1 %v1644_v15  ;;  %v1678_v47 = vld [vmem:[%s2172_s1 + $0x190] sm:$0xff]   ;;  %v1680_v49 = vld [vmem:[%s2172_s1 + $0x118] sm:$0xff]   ;;  %v1683_v52 = vld [vmem:[%s2172_s1 + $0x160] sm:$0xff]  }
  0x12   :  { %1485 = vmatprep.subr.bf16.mxu1 %v1647_v18  ;;  %v1681_v50 = vld [vmem:[%s2172_s1 + $0x1d8] sm:$0xff]   ;;  %v1684_v53 = vld [vmem:[%s2172_s1 + $0x120] sm:$0xff]   ;;  %v1687_v56 = vld [vmem:[%s2172_s1 + $0x168] sm:$0xff]  }
  0x13   :  { %1458 = vmatpush3.bf16.msra.mxu0 %v1646_v17  ;;  %v1682_v51 = vld [vmem:[%s2172_s1 + $0x198] sm:$0xff]   ;;  %v1685_v54 = vld [vmem:[%s2172_s1 + $0x1e0] sm:$0xff]   ;;  %v1690_v58 = vld [vmem:[%s2172_s1 + $0x128] sm:$0xff]  }
  0x14   :  { %1459 = vmatprep.subr.bf16.mxu0 %v1649_v20  ;;  %v1686_v55 = vld [vmem:[%s2172_s1 + $0x1a0] sm:$0xff]   ;;  %v1691_v59 = vld [vmem:[%s2173_s0 + $0x68] ss:$52 sps:$4 sm:$0xff]   ;;  %v1697_v0 = vld [vmem:[%s2172_s1 + $0x170] sm:$0xff]  }
  0x15   :  { %1486 = vmatpush3.bf16.msra.mxu1 %v1648_v19  ;;  %v1688_v57 = vld [vmem:[%s2173_s0 + $0x6c] ss:$52 sps:$4 sm:$0xff]   ;;  %v1693_v61 = vld [vmem:[%s2173_s0 + $0x74] ss:$52 sps:$4 sm:$0xff]   ;;  %v1696_v63 = vld [vmem:[%s2173_s0 + $0x70] ss:$52 sps:$4 sm:$0xff]  }
  0x16   :  { %1487 = vmatprep.subr.bf16.mxu1 %v1651_v22  ;;  %v1692_v60 = vld [vmem:[%s2172_s1 + $0x1e8] sm:$0xff]   ;;  %v1698_v1 = vld [vmem:[%s2172_s1 + $0x130] sm:$0xff]   ;;  %v1701_v4 = vld [vmem:[%s2172_s1 + $0x178] sm:$0xff]  }
  0x17   :  { %1460 = vmatpush3.bf16.msra.mxu0 %v1650_v21  ;;  %v1695_v62 = vld [vmem:[%s2172_s1 + $0x1a8] sm:$0xff]   ;;  %v1699_v2 = vld [vmem:[%s2172_s1 + $0x1f0] sm:$0xff]   ;;  %v1702_v5 = vld [vmem:[%s2172_s1 + $0x138] sm:$0xff]  }
  0x18   :  { %1461 = vmatprep.subr.bf16.mxu0 %v1653_v24  ;;  %v1700_v3 = vld [vmem:[%s2172_s1 + $0x1b0] sm:$0xff]   ;;  %v1703_v6 = vld [vmem:[%s2172_s1 + $0x1f8] sm:$0xff]   ;;  %v1708_v10 = vld [vmem:[%s2172_s1 + $0x240] sm:$0xff]  }
  0x19   :  { %1488 = vmatpush3.bf16.msra.mxu1 %v1652_v23  ;;  %v1704_v7 = vld [vmem:[%s2173_s0 + $0x10] ss:$52 sps:$4 sm:$0xff]   ;;  %v1706_v8 = vld [vmem:[%s2173_s0 + $0x14] ss:$52 sps:$4 sm:$0xff]   ;;  %v1707_v9 = vld [vmem:[%s2172_s1 + $0x1b8] sm:$0xff]  }
  0x1a   :  { %1489 = vmatprep.subr.bf16.mxu1 %v1655_v26  ;;  %v1709_v11 = vld [vmem:[%s2173_s0 + $0x18] ss:$52 sps:$4 sm:$0xff]   ;;  %v1711_v12 = vld [vmem:[%s2173_s0 + $0x1c] ss:$52 sps:$4 sm:$0xff]   ;;  %v1712_v13 = vld [vmem:[%s2172_s1 + $0x200] sm:$0xff]  }
  0x1b   :  { %1462 = vmatpush3.bf16.msra.mxu0 %v1654_v25  ;;  %v1713_v14 = vld [vmem:[%s2172_s1 + $0x2c0] sm:$0xff]   ;;  %v1715_v16 = vld [vmem:[%s2172_s1 + $0x248] sm:$0xff]   ;;  %v1718_v19 = vld [vmem:[%s2173_s0 + $0x7c] ss:$52 sps:$4 sm:$0xff]  }
  0x1c   :  { %1463 = vmatprep.subr.bf16.mxu0 %v1657_v28  ;;  %v1714_v15 = vld [vmem:[%s2172_s1 + $0x280] sm:$0xff]   ;;  %v1716_v17 = vld [vmem:[%s2172_s1 + $0x208] sm:$0xff]   ;;  %v1722_v22 = vld [vmem:[%s2172_s1 + $0x250] sm:$0xff]  }
  0x1d   :  { %1490 = vmatpush3.bf16.msra.mxu1 %v1656_v27  ;;  %v1717_v18 = vld [vmem:[%s2172_s1 + $0x2c8] sm:$0xff]   ;;  %v1723_v23 = vld [vmem:[%s2173_s0 + $0x84] ss:$52 sps:$4 sm:$0xff]   ;;  %v1725_v24 = vld [vmem:[%s2172_s1 + $0x210] sm:$0xff]  }
  0x1e   :  { %1491 = vmatprep.subr.bf16.mxu1 %v1659_v30  ;;  %v1720_v20 = vld [vmem:[%s2172_s1 + $0x288] sm:$0xff]   ;;  %v1726_v25 = vld [vmem:[%s2173_s0 + $0x80] ss:$52 sps:$4 sm:$0xff]   ;;  %v1729_v28 = vld [vmem:[%s2172_s1 + $0x258] sm:$0xff]  }
  0x1f   :  { %1464 = vmatpush3.bf16.msra.mxu0 %v1658_v29  ;;  %v1721_v21 = vld [vmem:[%s2173_s0 + $0x78] ss:$52 sps:$4 sm:$0xff]   ;;  %v1727_v26 = vld [vmem:[%s2172_s1 + $0x2d0] sm:$0xff]   ;;  %v1733_v32 = vld [vmem:[%s2172_s1 + $0x260] sm:$0xff]  }
  0x20   :  { %1505 = vmatprep.subr.bf16.mxu0 %v1664_v34  ;;  %v1728_v27 = vld [vmem:[%s2172_s1 + $0x290] sm:$0xff]   ;;  %v1730_v29 = vld [vmem:[%s2172_s1 + $0x218] sm:$0xff]   ;;  %v1735_v34 = vld [vmem:[%s2172_s1 + $0x2e0] sm:$0xff]  }
  0x21   :  { %1492 = vmatpush3.bf16.msra.mxu1 %v1663_v33  ;;  %v1731_v30 = vld [vmem:[%s2172_s1 + $0x2d8] sm:$0xff]   ;;  %v1734_v33 = vld [vmem:[%s2172_s1 + $0x220] sm:$0xff]   ;;  %v1737_v36 = vld [vmem:[%s2172_s1 + $0x268] sm:$0xff]  }
  0x22   :  { %1004 = vmatmul.mubr.bf16.vlgmr.msra.gmra.mrb[0].mxu0 %v1660_v31  ;;  %1533 = vmatprep.subr.bf16.mxu1 %v1669_v38  ;;  %v1732_v31 = vld [vmem:[%s2172_s1 + $0x298] sm:$0xff]   ;;  %v1739_v38 = vld [vmem:[%s2172_s1 + $0x2e8] sm:$0xff]  }
  0x23   :  { %1506 = vmatpush3.bf16.msra.mxu0 %v1668_v37  ;;  %1011 = vmatprep.mubr.bf16.mxu0 %v1688_v57  ;;  %v1738_v37 = vld [vmem:[%s2172_s1 + $0x228] sm:$0xff]   ;;  %v1763_v57 = vld [vmem:[%s2173_s0 + $0x30] ss:$52 sps:$4 sm:$0xff]  }
  0x24   :  { %1053 = vmatmul.mubr.bf16.vlgmr.msra.gmra.mrb[0].mxu1 %v1665_v35  ;;  %1507 = vmatprep.subr.bf16.mxu0 %v1671_v40  ;;  %v1736_v35 = vld [vmem:[%s2172_s1 + $0x2a0] sm:$0xff]   ;;  %v1741_v40 = vld [vmem:[%s2172_s1 + $0x270] sm:$0xff]  }
  0x25   :  { %1534 = vmatpush3.bf16.msra.mxu1 %v1670_v39  ;;  %1060 = vmatprep.mubr.bf16.mxu1 %v1693_v61  ;;  %v1740_v39 = vld [vmem:[%s2172_s1 + $0x2a8] sm:$0xff]   ;;  %v1322_v61 = vld [vmem:[%s2174_s2] ss:$0 sm:$0xff] }
  0x26   :  { %1535 = vmatprep.subr.bf16.mxu1 %v1673_v42  ;;  %v1743_v42 = vld [vmem:[%s2172_s1 + $0x2f0] sm:$0xff]  }
  0x27   :  { %1508 = vmatpush3.bf16.msra.mxu0 %v1672_v41  ;;  %v1742_v41 = vld [vmem:[%s2172_s1 + $0x230] sm:$0xff]  }
  0x28   :  { %1509 = vmatprep.subr.bf16.mxu0 %v1675_v44  ;;  %v1745_v44 = vld [vmem:[%s2172_s1 + $0x278] sm:$0xff]  }
  0x29   :  { %1536 = vmatpush3.bf16.msra.mxu1 %v1674_v43  ;;  %v1744_v43 = vld [vmem:[%s2172_s1 + $0x2b0] sm:$0xff]  }
  0x2a   :  { %1537 = vmatprep.subr.bf16.mxu1 %v1677_v46  ;;  %1012 = vmatmul.mubr.bf16.gmra.mrb[4].mxu0 %v1691_v59  ;;  %v1747_v46 = vld [vmem:[%s2172_s1 + $0x2f8] sm:$0xff]  }
  0x2b   :  { %1510 = vmatpush3.bf16.msra.mxu0 %v1676_v45  ;;  %1101 = vmatprep.mubr.bf16.mxu0 %v1706_v8  ;;  %v1746_v45 = vld [vmem:[%s2172_s1 + $0x238] sm:$0xff]  }
  0x2c   :  { %1511 = vmatprep.subr.bf16.mxu0 %v1679_v48  ;;  %1061 = vmatmul.mubr.bf16.gmra.mrb[4].mxu1 %v1696_v63  ;;  %v1750_v48 = vld [vmem:[%s2173_s0 + $0x24] ss:$52 sps:$4 sm:$0xff]  }
  0x2d   :  { %1538 = vmatpush3.bf16.msra.mxu1 %v1678_v47  ;;  %1150 = vmatprep.mubr.bf16.mxu1 %v1711_v12  ;;  %v1748_v47 = vld [vmem:[%s2173_s0 + $0x20] ss:$52 sps:$4 sm:$0xff]   ;;  %v1764_v59 = vld [vmem:[%s2173_s0 + $0x98] ss:$52 sps:$4 sm:$0xff]  }
  0x2e   :  { %1539 = vmatprep.subr.bf16.mxu1 %v1681_v50  ;;  %v1752_v50 = vld [vmem:[%s2172_s1 + $0x300] sm:$0xff]  }
  0x2f   :  { %1512 = vmatpush3.bf16.msra.mxu0 %v1680_v49  ;;  %v1751_v49 = vld [vmem:[%s2172_s1 + $0x2b8] sm:$0xff]  }
  0x30   :  { %1513 = vmatprep.subr.bf16.mxu0 %v1683_v52  ;;  %v1755_v52 = vld [vmem:[%s2173_s0 + $0x2c] ss:$52 sps:$4 sm:$0xff]  }
  0x31   :  { %1540 = vmatpush3.bf16.msra.mxu1 %v1682_v51  ;;  %v1753_v51 = vld [vmem:[%s2173_s0 + $0x28] ss:$52 sps:$4 sm:$0xff]  }
  0x32   :  { %1541 = vmatprep.subr.bf16.mxu1 %v1685_v54  ;;  %v1759_v54 = vld [vmem:[%s2172_s1 + $0x308] sm:$0xff]  }
  0x33   :  { %1514 = vmatpush3.bf16.msra.mxu0 %v1684_v53  ;;  %v1756_v53 = vld [vmem:[%s2173_s0 + $0x8c] ss:$52 sps:$4 sm:$0xff]  }
  0x34   :  { %1515 = vmatprep.subr.bf16.mxu0 %v1687_v56  ;;  %v1760_v56 = vld [vmem:[%s2173_s0 + $0x94] ss:$52 sps:$4 sm:$0xff]  }
  0x35   :  { %1542 = vmatpush3.bf16.msra.mxu1 %v1686_v55  ;;  %v1758_v55 = vld [vmem:[%s2173_s0 + $0x88] ss:$52 sps:$4 sm:$0xff]  }
  0x36   :  { %1543 = vmatprep.subr.bf16.mxu1 %v1692_v60 }
  0x37   :  { %1516 = vmatpush3.bf16.msra.mxu0 %v1690_v58  ;;  %v1762_v58 = vld [vmem:[%s2173_s0 + $0x90] ss:$52 sps:$4 sm:$0xff]  }
  0x38   :  { %1517 = vmatprep.subr.bf16.mxu0 %v1697_v0 }
  0x39   :  { %1544 = vmatpush3.bf16.msra.mxu1 %v1695_v62 }
  0x3a   :  { %1545 = vmatprep.subr.bf16.mxu1 %v1699_v2 }
  0x3b   :  { %1518 = vmatpush3.bf16.msra.mxu0 %v1698_v1 }
  0x3c   :  { %1519 = vmatprep.subr.bf16.mxu0 %v1701_v4 }
  0x3d   :  { %1546 = vmatpush3.bf16.msra.mxu1 %v1700_v3 }
  0x3e   :  { %1547 = vmatprep.subr.bf16.mxu1 %v1703_v6 }
  0x3f   :  { %1520 = vmatpush3.bf16.msra.mxu0 %v1702_v5 }
  0x40   :  { %1561 = vmatprep.subr.bf16.mxu0 %v1708_v10 }
  0x41   :  { %1548 = vmatpush3.bf16.msra.mxu1 %v1707_v9 }
  0x42   :  { %1102 = vmatmul.mubr.bf16.vlgmr.msra.gmra.mrb[8].mxu0 %v1704_v7  ;;  %1589 = vmatprep.subr.bf16.mxu1 %v1713_v14 }
  0x43   :  { %1562 = vmatpush3.bf16.msra.mxu0 %v1712_v13  ;;  %1109 = vmatprep.mubr.bf16.mxu0 %v1718_v19 }
  0x44   :  { %1151 = vmatmul.mubr.bf16.vlgmr.msra.gmra.mrb[8].mxu1 %v1709_v11  ;;  %1563 = vmatprep.subr.bf16.mxu0 %v1715_v16 }
  0x45   :  { %1590 = vmatpush3.bf16.msra.mxu1 %v1714_v15  ;;  %1158 = vmatprep.mubr.bf16.mxu1 %v1723_v23 }
  0x46   :  { %1591 = vmatprep.subr.bf16.mxu1 %v1717_v18 }
  0x47   :  { %1564 = vmatpush3.bf16.msra.mxu0 %v1716_v17 }
  0x48   :  { %1565 = vmatprep.subr.bf16.mxu0 %v1722_v22 }
  0x49   :  { %1592 = vmatpush3.bf16.msra.mxu1 %v1720_v20 }
  0x4a   :  { %1110 = vmatmul.mubr.bf16.gmra.mrb[12].mxu0 %v1721_v21  ;;  %1593 = vmatprep.subr.bf16.mxu1 %v1727_v26 }
  0x4b   :  { %1566 = vmatpush3.bf16.msra.mxu0 %v1725_v24  ;;  %1199 = vmatprep.mubr.bf16.mxu0 %v1750_v48 }
  0x4c   :  { %1159 = vmatmul.mubr.bf16.gmra.mrb[12].mxu1 %v1726_v25  ;;  %1567 = vmatprep.subr.bf16.mxu0 %v1729_v28 }
  0x4d   :  { %1594 = vmatpush3.bf16.msra.mxu1 %v1728_v27  ;;  %1248 = vmatprep.mubr.bf16.mxu1 %v1755_v52 }
  0x4e   :  { %1595 = vmatprep.subr.bf16.mxu1 %v1731_v30 }
  0x4f   :  { %1568 = vmatpush3.bf16.msra.mxu0 %v1730_v29 }
  0x50   :  { %1569 = vmatprep.subr.bf16.mxu0 %v1733_v32 }
  0x51   :  { %1596 = vmatpush3.bf16.msra.mxu1 %v1732_v31 }
  0x52   :  { %1597 = vmatprep.subr.bf16.mxu1 %v1735_v34 }
  0x53   :  { %1570 = vmatpush3.bf16.msra.mxu0 %v1734_v33 }
  0x54   :  { %1571 = vmatprep.subr.bf16.mxu0 %v1737_v36 }
  0x55   :  { %1598 = vmatpush3.bf16.msra.mxu1 %v1736_v35 }
  0x56   :  { %1599 = vmatprep.subr.bf16.mxu1 %v1739_v38 }
  0x57   :  { %1572 = vmatpush3.bf16.msra.mxu0 %v1738_v37 }
  0x58   :  { %1573 = vmatprep.subr.bf16.mxu0 %v1741_v40 }
  0x59   :  { %1600 = vmatpush3.bf16.msra.mxu1 %v1740_v39 }
  0x5a   :  { %1601 = vmatprep.subr.bf16.mxu1 %v1743_v42 }
  0x5b   :  { %1574 = vmatpush3.bf16.msra.mxu0 %v1742_v41 }
  0x5c   :  { %1575 = vmatprep.subr.bf16.mxu0 %v1745_v44 }
  0x5d   :  { %1602 = vmatpush3.bf16.msra.mxu1 %v1744_v43 }
  0x5e   :  { %1603 = vmatprep.subr.bf16.mxu1 %v1747_v46 }
  0x5f   :  { %1576 = vmatpush3.bf16.msra.mxu0 %v1746_v45 }
  0x60   :  { %1621 = vmatprep.subr.bf16.mxu0 %v1752_v50 }
  0x61   :  { %1604 = vmatpush3.bf16.msra.mxu1 %v1751_v49 }
  0x62   :  { %1200 = vmatmul.mubr.bf16.vlgmr.msra.gmra.mrb[16].mxu0 %v1748_v47 }
  0x63   :  { %1622 = vmatpush3.bf16.msra.mxu0 %v1752_v50  ;;  %1207 = vmatprep.mubr.bf16.mxu0 %v1756_v53 }
  0x64   :  { %1249 = vmatmul.mubr.bf16.vlgmr.msra.gmra.mrb[16].mxu1 %v1753_v51  ;;  %1623 = vmatprep.subr.bf16.mxu0 %v1759_v54 }
  0x65   :  { %1256 = vmatprep.mubr.bf16.mxu1 %v1760_v56 }
  0x67   :  { %1624 = vmatpush3.bf16.msra.mxu0 %v1759_v54 }
  0x6a   :  { %1208 = vmatmul.mubr.bf16.gmra.mrb[20].mxu0 %v1758_v55 }
  0x6b   :  { %1625 = vmatprep.mubr.msk.bf16.mxu0 %vm964_vm0, %v1763_v57 }
  0x6c   :  { %1257 = vmatmul.mubr.bf16.gmra.mrb[20].mxu1 %v1762_v58 }
  0x72   :  { %1626 = vmatmul.mubr.msk.bf16.vlgmr.msra.gmra.mrb[24].mxu0 %vm964_vm0, %v1764_v59 }
  0xf5   :  { %v1465_v60 = vpop.f32.mrb[0].mxu0 }
  0xf6   :  { %v1466_v62 = vpop.f32.mrb[1].mxu0 }
  0xf7   :  { %v1467_v63 = vadd.f32 %v1466_v62, %v1465_v60  ;;  %v1468_v0 = vpop.f32.mrb[2].mxu0  ;;  %v1493_v1 = vpop.f32.mrb[0].mxu1 }
  0xf8   :  { %v1469_v2 = vpop.f32.mrb[3].mxu0  ;;  %v1494_v5 = vpop.f32.mrb[1].mxu1 }
  0xf9   :  { %v1006_v3 = vadd.f32 %v1467_v63, %v1322_v61  ;;  %v1470_v4 = vadd.f32 %v1469_v2, %v1468_v0  ;;  %v1495_v6 = vadd.f32 %v1494_v5, %v1493_v1  ;;  %v1496_v7 = vpop.f32.mrb[2].mxu1 }
  0xfa   :  { %v1497_v9 = vpop.f32.mrb[3].mxu1 }
  0xfb   :  { %v1009_v8 = vadd.f32 %v1470_v4, %v1322_v61  ;;  %v1055_v10 = vadd.f32 %v1495_v6, %v1006_v3  ;;  %v1498_v11 = vadd.f32 %v1497_v9, %v1496_v7 }
  0xfd   :  { %v1058_v12 = vadd.f32 %v1498_v11, %v1009_v8  ;;  %v1471_v13 = vpop.f32.mrb[4].mxu0 }
  0xfe   :  { %v1472_v14 = vpop.f32.mrb[5].mxu0 }
  0xff   :  { %v1473_v15 = vadd.f32 %v1472_v14, %v1471_v13  ;;  %v1474_v16 = vpop.f32.mrb[6].mxu0  ;;  %v1499_v17 = vpop.f32.mrb[4].mxu1 }
 0x100   :  { %v1475_v18 = vpop.f32.mrb[7].mxu0  ;;  %v1500_v21 = vpop.f32.mrb[5].mxu1 }
 0x101   :  { %v1014_v19 = vadd.f32 %v1473_v15, %v1322_v61  ;;  %v1476_v20 = vadd.f32 %v1475_v18, %v1474_v16  ;;  %v1501_v22 = vadd.f32 %v1500_v21, %v1499_v17  ;;  %v1502_v23 = vpop.f32.mrb[6].mxu1 }
 0x102   :  { %v1503_v25 = vpop.f32.mrb[7].mxu1 }
 0x103   :  { %v1017_v24 = vadd.f32 %v1476_v20, %v1322_v61  ;;  %v1063_v26 = vadd.f32 %v1501_v22, %v1014_v19  ;;  %v1504_v27 = vadd.f32 %v1503_v25, %v1502_v23 }
 0x105   :  { %v1066_v28 = vadd.f32 %v1504_v27, %v1017_v24 }
 0x115   :  { %v1521_v29 = vpop.f32.mrb[8].mxu0 }
 0x116   :  { %v1522_v30 = vpop.f32.mrb[9].mxu0 }
 0x117   :  { %v1523_v31 = vadd.f32 %v1522_v30, %v1521_v29  ;;  %v1524_v32 = vpop.f32.mrb[10].mxu0  ;;  %v1549_v33 = vpop.f32.mrb[8].mxu1 }
 0x118   :  { %v1525_v34 = vpop.f32.mrb[11].mxu0  ;;  %v1550_v37 = vpop.f32.mrb[9].mxu1 }
 0x119   :  { %v1104_v35 = vadd.f32 %v1523_v31, %v1055_v10  ;;  %v1526_v36 = vadd.f32 %v1525_v34, %v1524_v32  ;;  %v1551_v38 = vadd.f32 %v1550_v37, %v1549_v33  ;;  %v1552_v39 = vpop.f32.mrb[10].mxu1 }
 0x11a   :  { %v1553_v41 = vpop.f32.mrb[11].mxu1 }
 0x11b   :  { %v1107_v40 = vadd.f32 %v1526_v36, %v1058_v12  ;;  %v1153_v42 = vadd.f32 %v1551_v38, %v1104_v35  ;;  %v1554_v43 = vadd.f32 %v1553_v41, %v1552_v39 }
 0x11d   :  { %v1156_v44 = vadd.f32 %v1554_v43, %v1107_v40  ;;  %v1527_v45 = vpop.f32.mrb[12].mxu0 }
 0x11e   :  { %v1528_v46 = vpop.f32.mrb[13].mxu0 }
 0x11f   :  { %v1529_v47 = vadd.f32 %v1528_v46, %v1527_v45  ;;  %v1530_v48 = vpop.f32.mrb[14].mxu0  ;;  %v1555_v49 = vpop.f32.mrb[12].mxu1 }
 0x120   :  { %v1531_v50 = vpop.f32.mrb[15].mxu0  ;;  %v1556_v53 = vpop.f32.mrb[13].mxu1 }
 0x121   :  { %v1112_v51 = vadd.f32 %v1529_v47, %v1063_v26  ;;  %v1532_v52 = vadd.f32 %v1531_v50, %v1530_v48  ;;  %v1557_v54 = vadd.f32 %v1556_v53, %v1555_v49  ;;  %v1558_v55 = vpop.f32.mrb[14].mxu1 }
 0x122   :  { %v1559_v57 = vpop.f32.mrb[15].mxu1 }
 0x123   :  { %v1115_v56 = vadd.f32 %v1532_v52, %v1066_v28  ;;  %v1161_v58 = vadd.f32 %v1557_v54, %v1112_v51  ;;  %v1560_v59 = vadd.f32 %v1559_v57, %v1558_v55 }
 0x125   :  { %v1164_v60 = vadd.f32 %v1560_v59, %v1115_v56 }
 0x135   :  { %v1577_v61 = vpop.f32.mrb[16].mxu0 }
 0x136   :  { %v1578_v62 = vpop.f32.mrb[17].mxu0 }
 0x137   :  { %v1579_v63 = vadd.f32 %v1578_v62, %v1577_v61  ;;  %v1580_v0 = vpop.f32.mrb[18].mxu0  ;;  %v1605_v3 = vpop.f32.mrb[16].mxu1 }
 0x138   :  { %v1581_v1 = vpop.f32.mrb[19].mxu0  ;;  %v1606_v5 = vpop.f32.mrb[17].mxu1 }
 0x139   :  { %v1202_v2 = vadd.f32 %v1579_v63, %v1153_v42  ;;  %v1582_v4 = vadd.f32 %v1581_v1, %v1580_v0  ;;  %v1607_v7 = vadd.f32 %v1606_v5, %v1605_v3  ;;  %v1608_v8 = vpop.f32.mrb[18].mxu1 }
 0x13a   :  { %v1609_v9 = vpop.f32.mrb[19].mxu1 }
 0x13b   :  { %v1205_v6 = vadd.f32 %v1582_v4, %v1156_v44  ;;  %v1610_v10 = vadd.f32 %v1609_v9, %v1608_v8  ;;  %v1251_v12 = vadd.f32 %v1607_v7, %v1202_v2 }
 0x13d   :  { %v1583_v11 = vpop.f32.mrb[20].mxu0  ;;  %v1254_v16 = vadd.f32 %v1610_v10, %v1205_v6 }
 0x13e   :  { %v1584_v13 = vpop.f32.mrb[21].mxu0 }
 0x13f   :  { %v1585_v14 = vadd.f32 %v1584_v13, %v1583_v11  ;;  %v1586_v15 = vpop.f32.mrb[22].mxu0  ;;  %v1611_v19 = vpop.f32.mrb[20].mxu1 }
 0x140   :  { %v1587_v17 = vpop.f32.mrb[23].mxu0  ;;  %v1612_v21 = vpop.f32.mrb[21].mxu1 }
 0x141   :  { %v1210_v18 = vadd.f32 %v1585_v14, %v1161_v58  ;;  %v1588_v20 = vadd.f32 %v1587_v17, %v1586_v15  ;;  %v1613_v23 = vadd.f32 %v1612_v21, %v1611_v19  ;;  %v1614_v24 = vpop.f32.mrb[22].mxu1 }
 0x142   :  { %v1615_v25 = vpop.f32.mrb[23].mxu1 }
 0x143   :  { %v1213_v22 = vadd.f32 %v1588_v20, %v1164_v60  ;;  %v1616_v26 = vadd.f32 %v1615_v25, %v1614_v24  ;;  %v1259_v27 = vadd.f32 %v1613_v23, %v1210_v18 }
 0x145   :  { %v1627_v28 = vpop.f32.mrb[24].mxu0  ;;  %v1262_v32 = vadd.f32 %v1616_v26, %v1213_v22 }
 0x146   :  { %v1299_v29 = vpop.f32.mrb[25].mxu0  ;;  %v1308_v30 = vadd.f32 %v1627_v28, %v1259_v27 }
 0x147   :  { %v1300_v31 = vadd.f32 %v1299_v29, %v1251_v12  ;;  %v1628_v33 = vpop.f32.mrb[26].mxu0 }
 0x148   :  { %v1302_v34 = vpop.f32.mrb[27].mxu0  ;;  %1316 = vst [vmem:[%s2175_s3 + $0x10] sm:$0xff] %v1308_v30  ;;  %v1311_v35 = vadd.f32 %v1628_v33, %v1262_v32 }
 0x149   :  { %1314 = vst [vmem:[%s2175_s3] sm:$0xff] %v1300_v31  ;;  %v1303_v36 = vadd.f32 %v1302_v34, %v1254_v16 }
 0x14a   :  { %1317 = vst [vmem:[%s2175_s3 + $0x18] sm:$0xff] %v1311_v35 }
 0x14b   :  { %1315 = vst [vmem:[%s2175_s3 + $0x8] sm:$0xff] %v1303_v36 }

</bundles_post_ra>
